<compile_context>
chip_gen: v5e
topology: v5e:2x2
jax: 0.10.0
libtpu: 0.0.40
codegen_flags: <defaults>
</compile_context>

<pallas_src>
import functools
import math

import jax
import jax.numpy as jnp
import numpy as np
from jax.experimental import pallas as pl
from jax.experimental.pallas import tpu as pltpu


def _round_up(x, m):
    return (x + m - 1) // m * m


# ---------------------------------------------------------------------------
# Fused path (C >= ~64): one (HW, M) weighted one-hot, one MXU matmul.
# ---------------------------------------------------------------------------
def _roi_align_kernel_fused(pk_ref, feat_ref, out_ref, *, sub2, rq, precision):
    pk = pk_ref[0]                                   # (8, M) int32: rows 0-3 corner idx, 4-7 weight bits
    wgt = pltpu.bitcast(pk[4:8, :], jnp.float32)     # (4, M) bilinear weights
    feat = feat_ref[...]                             # (C_pad, HW), HW on lanes
    hw = feat.shape[1]
    m = pk.shape[1]

    # ONE hoisted iota shared by all 4 corners (JAX does not CSE broadcasted_iota).
    hw_iota = jax.lax.broadcasted_iota(jnp.int32, (hw, m), 0)

    # Nested select chain (UL outermost ... DR innermost).  Exact: whenever a later
    # corner collides with an earlier one, the later corner's weight is 0.  Saves
    # 3 full-size (HW, M) f32 adds vs. the add-based build.
    wmat = jnp.where(hw_iota == pk[0:1, :], wgt[0:1, :],
           jnp.where(hw_iota == pk[1:2, :], wgt[1:2, :],
           jnp.where(hw_iota == pk[2:3, :], wgt[2:3, :],
           jnp.where(hw_iota == pk[3:4, :], wgt[3:4, :], 0.0))))

    # Single fused MXU matmul: (C_pad, HW) x (HW, M) -> (C_pad, M), M lane-dense.
    res = jnp.dot(feat, wmat, preferred_element_type=jnp.float32, precision=precision)

    # Max-pool over the sub^2 sub-samples: 128-aligned lane-chunk maxes on the VPU.
    acc = res[:, 0:rq]
    for s in range(1, sub2):
        acc = jnp.maximum(acc, res[:, s * rq:(s + 1) * rq])
    out_ref[...] = acc.astype(out_ref.dtype)


# ---------------------------------------------------------------------------
# Separable path (small C): x-interp via a (W, M) one-hot matmul, y-interp via
# per-row weights + a static block-diagonal reduction matmul.  Everything stays
# 2-D (no sublane reshapes / axis-1 reductions), ~5-10x fewer VPU passes than
# the fused one-hot build when C << 128.
# ---------------------------------------------------------------------------
def _roi_align_kernel_separable(pk_ref, feat_ref, out_ref, *, h, w, c_pad, sub2, rq,
                                precision):
    pk = pk_ref[0]                                   # (8, M) int32: iy0, iy1, ix0, ix1, then weight bits
    wf = pltpu.bitcast(pk[4:8, :], jnp.float32)      # (4, M): (1-ly), ly, (1-lx), lx
    m = pk.shape[1]
    feat = feat_ref[...]                             # (C_pad*H, W)

    # x interpolation: (C_pad*H, W) x (W, M) against a 2-nonzero one-hot.
    w_iota = jax.lax.broadcasted_iota(jnp.int32, (w, m), 0)
    xmat = jnp.where(w_iota == pk[2:3, :], wf[2:3, :],           # ix0 -> (1 - lx)
           jnp.where(w_iota == pk[3:4, :], wf[3:4, :], 0.0))     # ix1 -> lx
    gx = jnp.dot(feat, xmat, preferred_element_type=jnp.float32, precision=precision)

    # y interpolation weights (H, M), tiled across the C_pad channel blocks.
    h_iota = jax.lax.broadcasted_iota(jnp.int32, (h, m), 0)
    ymat = jnp.where(h_iota == pk[0:1, :], wf[0:1, :],           # iy0 -> (1 - ly)
           jnp.where(h_iota == pk[1:2, :], wf[1:2, :], 0.0))     # iy1 -> ly
    gy = gx * jnp.concatenate([ymat] * c_pad, axis=0)            # (C_pad*H, M)

    # Per-channel reduce over H with a static block-diagonal 0/1 matrix on the MXU.
    row_c = jax.lax.broadcasted_iota(jnp.int32, (c_pad, c_pad * h), 0)
    col_r = jax.lax.broadcasted_iota(jnp.int32, (c_pad, c_pad * h), 1)
    rmat = jnp.where((col_r >= row_c * h) & (col_r < row_c * h + h), 1.0, 0.0)
    res = jnp.dot(rmat, gy, preferred_element_type=jnp.float32, precision=precision)

    acc = res[:, 0:rq]
    for s in range(1, sub2):
        acc = jnp.maximum(acc, res[:, s * rq:(s + 1) * rq])
    out_ref[...] = acc.astype(out_ref.dtype)


def roi_align(features, rois, ratio, pool_out_size=(4, 4), sub_sample=2,
              roi_tile=None, mode="auto", precision=jax.lax.Precision.HIGHEST,
              vmem_budget_bytes=40 * 2**20):
    """features: (1, C, H, W) f32; rois: (N, 4) f32 (y0, x0, y1, x1); ratio: float.

    Returns (N, C, P0, P1) f32, matching the PyTorch ROIAlign.forward."""
    b, c, h, w = features.shape
    assert b == 1
    p0, p1 = pool_out_size
    sub = sub_sample
    sub2 = sub * sub
    s0, s1 = p0 * sub, p1 * sub
    q = p0 * p1
    hw = h * w
    n = rois.shape[0]
    c_pad = _round_up(c, 8)                       # unmasked sublane stores

    if mode == "auto":
        # Separable wins while C << 128; H % 8 keeps the (H, M) y-weight tiles aligned.
        separable = (c_pad <= 64) and (h % 8 == 0)
    else:
        separable = (mode == "separable")

    # ---- roi_tile: amortize ~0.35us/step overhead, keep output lanes dense ----
    base = max(1, math.lcm(q, 128) // q)          # smallest tile with rq % 128 == 0

    def vmem_estimate(t):
        rq_t = t * q
        m_t = sub2 * rq_t
        io = 2 * 8 * m_t + 2 * c_pad * rq_t       # double-buffered packed input + output
        if separable:
            feat_b = c_pad * h * _round_up(w, 128)
            tmp = (2 * w + 3 * c_pad * h + h + c_pad) * m_t
        else:
            feat_b = c_pad * _round_up(hw, 128)
            tmp = (2 * hw + c_pad) * m_t
        return int((feat_b + io + tmp) * 4 * 1.25)

    if roi_tile is None:
        cap = max(base, 64)                       # review: 32-64 is the v6e sweet spot
        roi_tile = base
        t = base
        while t <= cap:
            if vmem_estimate(t) <= vmem_budget_bytes:
                roi_tile = t
            t += base
        # Keep >= 2 grid blocks so the "parallel" axis splits over v7x's 2 TCs.
        half = _round_up(max(1, pl.cdiv(n, 2)), base)
        roi_tile = max(base, min(roi_tile, half))

    rq = roi_tile * q
    m = sub2 * rq
    assert rq % 128 == 0, "roi_tile * prod(pool_out_size) must be a multiple of 128"
    n_blocks = max(2, pl.cdiv(n, roi_tile))       # >= 2 so megacore sharding is real
    n_pad = n_blocks * roi_tile
    vmem_limit = int(min(60 * 2**20, max(2 * vmem_estimate(roi_tile), 32 * 2**20)))

    # Pad ROIs (zero boxes are valid: they sample feat[:, 0, 0] and get sliced off).
    rois_p = jnp.zeros((n_pad, 4), jnp.float32).at[:n].set(rois.astype(jnp.float32))

    # ---- cheap glue: ROI -> corner indices + bilinear weights (PyTorch math) ----
    rif = rois_p * ratio
    y0 = jnp.clip(rif[:, 0], 0.0, h - 1)
    x0 = jnp.clip(rif[:, 1], 0.0, w - 1)
    y1 = jnp.clip(rif[:, 2], 0.0, h - 1)
    x1 = jnp.clip(rif[:, 3], 0.0, w - 1)
    h_step = (y1 - y0) / (p0 * sub)
    w_step = (x1 - x0) / (p1 * sub)

    ii = jnp.arange(s0, dtype=jnp.float32)
    jj = jnp.arange(s1, dtype=jnp.float32)
    y_shift = ii[None, :] * h_step[:, None] + h_step[:, None] / 2 + y0[:, None]   # (Np, S0)
    x_shift = jj[None, :] * w_step[:, None] + w_step[:, None] / 2 + x0[:, None]   # (Np, S1)
    yy = jnp.broadcast_to(y_shift[:, :, None], (n_pad, s0, s1))
    xx = jnp.broadcast_to(x_shift[:, None, :], (n_pad, s0, s1))

    ly = yy - jnp.trunc(yy)                       # torch.frac (coords are non-negative)
    lx = xx - jnp.trunc(xx)
    iy0 = jnp.floor(yy).astype(jnp.int32)
    iy1 = jnp.ceil(yy).astype(jnp.int32)
    ix0 = jnp.floor(xx).astype(jnp.int32)
    ix1 = jnp.ceil(xx).astype(jnp.int32)

    if separable:
        ints = jnp.stack([iy0, iy1, ix0, ix1], axis=1)                            # (Np, 4, S0, S1)
        flts = jnp.stack([1 - ly, ly, 1 - lx, lx], axis=1).astype(jnp.float32)
        feat_k = jnp.zeros((c_pad, h, w), jnp.float32).at[:c].set(
            features[0].astype(jnp.float32)).reshape(c_pad * h, w)
        kernel = functools.partial(_roi_align_kernel_separable, h=h, w=w,
                                   c_pad=c_pad, sub2=sub2, rq=rq, precision=precision)
        feat_spec = pl.BlockSpec((c_pad * h, w), lambda r: (0, 0),
                                 pipeline_mode=pl.Buffered(1))   # grid-invariant: 1 buffer
    else:
        # 4 corners UL, DL, UR, DR; flattened index matches the (C, H*W) feat layout.
        ints = jnp.stack([iy0 * w + ix0, iy1 * w + ix0, iy0 * w + ix1, iy1 * w + ix1],
                         axis=1)
        flts = jnp.stack([(1 - ly) * (1 - lx), ly * (1 - lx), (1 - ly) * lx, ly * lx],
                         axis=1).astype(jnp.float32)
        feat_k = jnp.zeros((c_pad, hw), jnp.float32).at[:c].set(
            features[0].reshape(c, hw).astype(jnp.float32))
        kernel = functools.partial(_roi_align_kernel_fused, sub2=sub2, rq=rq,
                                   precision=precision)
        feat_spec = pl.BlockSpec((c_pad, hw), lambda r: (0, 0),
                                 pipeline_mode=pl.Buffered(1))   # grid-invariant: 1 buffer

    # Pack indices + (bitcast) weights into ONE int32 input: halves per-step DMAs,
    # and the 8 sublanes are exactly what the (1, 4, M) blocks were padding to.
    packed = jnp.concatenate(
        [ints.astype(jnp.int32), jax.lax.bitcast_convert_type(flts, jnp.int32)],
        axis=1)                                                                   # (Np, 8, S0, S1)

    def to_block_layout(a):
        # (Np, K, S0, S1) -> (n_blocks, K, sub2*roi_tile*Q)
        # lane order per block = ((di, dj), roi_local, (io, jo)).
        k = a.shape[1]
        a = a.reshape(n_pad, k, p0, sub, p1, sub)
        a = a.transpose(0, 1, 3, 5, 2, 4)                 # (Np, K, di, dj, io, jo)
        a = a.reshape(n_blocks, roi_tile, k, sub2, q)
        a = a.transpose(0, 2, 3, 1, 4)                    # (nb, K, sub2, roi_tile, Q)
        return a.reshape(n_blocks, k, sub2 * rq)

    packed_b = to_block_layout(packed)                    # (nb, 8, M) int32

    out = pl.pallas_call(
        kernel,
        out_shape=jax.ShapeDtypeStruct((c_pad, n_pad * q), jnp.float32),
        grid_spec=pltpu.PrefetchScalarGridSpec(
            num_scalar_prefetch=0,
            grid=(n_blocks,),
            in_specs=[
                pl.BlockSpec((1, 8, m), lambda r: (r, 0, 0)),     # packed idx + weights
                feat_spec,                                        # feature slab (1 buffer)
            ],
            out_specs=pl.BlockSpec((c_pad, rq), lambda r: (0, r)),
        ),
        compiler_params=pltpu.CompilerParams(
            dimension_semantics=("parallel",),            # v7x: shard ROI blocks over 2 TCs
            vmem_limit_bytes=vmem_limit),
    )(packed_b, feat_k)

    # (C_pad, Npad*Q) -> (N, C, P0, P1)  (PyTorch output convention)
    out = out[:c].reshape(c, n_pad, q)[:, :n].transpose(1, 0, 2)
    return out.reshape(n, c, p0, p1)


def roi_align_ref(features, rois, ratio, pool_out_size=(4, 4), sub_sample=2):
    """Pure-JAX reference mirroring the PyTorch module (for correctness check)."""
    b, c, h, w = features.shape
    p0, p1 = pool_out_size
    sub = sub_sample
    s0, s1 = p0 * sub, p1 * sub
    n = rois.shape[0]

    rif = rois.astype(jnp.float32) * ratio
    y0 = jnp.clip(rif[:, 0], 0.0, h - 1)
    x0 = jnp.clip(rif[:, 1], 0.0, w - 1)
    y1 = jnp.clip(rif[:, 2], 0.0, h - 1)
    x1 = jnp.clip(rif[:, 3], 0.0, w - 1)
    h_step = (y1 - y0) / (p0 * sub)
    w_step = (x1 - x0) / (p1 * sub)
    y_shift = (jnp.arange(s0)[None, :] * h_step[:, None]
               + h_step[:, None] / 2 + y0[:, None])                    # (N, S0)
    x_shift = (jnp.arange(s1)[None, :] * w_step[:, None]
               + w_step[:, None] / 2 + x0[:, None])                    # (N, S1)
    yy = jnp.broadcast_to(y_shift[:, :, None], (n, s0, s1))
    xx = jnp.broadcast_to(x_shift[:, None, :], (n, s0, s1))
    ly = yy - jnp.trunc(yy)
    lx = xx - jnp.trunc(xx)
    iy0 = jnp.floor(yy).astype(jnp.int32)
    iy1 = jnp.ceil(yy).astype(jnp.int32)
    ix0 = jnp.floor(xx).astype(jnp.int32)
    ix1 = jnp.ceil(xx).astype(jnp.int32)
    f = features[0]                                                    # (C, H, W)
    g = lambda iy, ix: f[:, iy, ix]                                    # (C, N, S0, S1)
    pre = (g(iy0, ix0) * (1 - ly) * (1 - lx) + g(iy1, ix0) * ly * (1 - lx)
           + g(iy0, ix1) * (1 - ly) * lx + g(iy1, ix1) * ly * lx)
    pre = pre.transpose(1, 0, 2, 3)                                    # (N, C, S0, S1)
    return pre.reshape(n, c, p0, sub, p1, sub).max(axis=(3, 5))


if __name__ == "__main__":
    C, H, W = 4, 16, 16
    N = 3
    P = (4, 4)
    SUB = 2
    RATIO = 0.5

    key = jax.random.PRNGKey(0)
    kf, kr0, kr1 = jax.random.split(key, 3)
    features = jax.random.normal(kf, (1, C, H, W), dtype=jnp.float32)
    start = jax.random.uniform(kr0, (N, 2), minval=0.0, maxval=12.0)
    size = jax.random.uniform(kr1, (N, 2), minval=4.0, maxval=20.0)
    rois = jnp.concatenate([start, start + size], axis=1).astype(jnp.float32)  # (y0,x0,y1,x1)

    ref = roi_align_ref(features, rois, RATIO, pool_out_size=P, sub_sample=SUB)

    # auto -> separable path (C=4 << 64): the small-C VPU-optimized contraction.
    out_sep = jax.block_until_ready(
        roi_align(features, rois, RATIO, pool_out_size=P, sub_sample=SUB))
    np.testing.assert_allclose(np.asarray(out_sep), np.asarray(ref), rtol=1e-4, atol=1e-4)

    # fused single-matmul path (used for large C in production): also verified.
    out_fused = jax.block_until_ready(
        roi_align(features, rois, RATIO, pool_out_size=P, sub_sample=SUB, mode="fused"))
    np.testing.assert_allclose(np.asarray(out_fused), np.asarray(ref), rtol=1e-4, atol=1e-4)

    print("KERNEL_OK")
</pallas_src>

<mosaic_0001>
module attributes {stable_mosaic.version = 11 : i64} {
  func.func @_roi_align_kernel_separable(%arg0: i32, %arg1: memref<1x8x512xi32, #tpu.memory_space<vmem>>, %arg2: memref<128x16xf32, #tpu.memory_space<vmem>>, %arg3: memref<8x128xf32, #tpu.memory_space<vmem>>) attributes {dimension_semantics = [#tpu.dimension_semantics<parallel>], iteration_bounds = array<i64: 2>, scalar_prefetch = 0 : i64, scratch_operands = 0 : i64, tpu.core_type = #tpu.core_type<tc>, window_params = [{transform_indices = @transform_0, window_bounds = array<i64: 1, 8, 512>}, {pipeline_mode = #tpu.pipeline_mode<synchronous>, transform_indices = @transform_1, window_bounds = array<i64: 128, 16>}, {transform_indices = @transform_2, window_bounds = array<i64: 8, 128>}]} {
    %c0 = arith.constant 0 : index
    %c0_0 = arith.constant 0 : index
    %c0_1 = arith.constant 0 : index
    %0 = vector.load %arg1[%c0, %c0_0, %c0_1] : memref<1x8x512xi32, #tpu.memory_space<vmem>>, vector<1x8x512xi32>
    %1 = vector.shape_cast %0 : vector<1x8x512xi32> to vector<8x512xi32>
    %2 = vector.extract_strided_slice %1 {offsets = [4, 0], sizes = [4, 512], strides = [1, 1]} : vector<8x512xi32> to vector<4x512xi32>
    %3 = tpu.bitcast %2 : vector<4x512xi32> -> vector<4x512xf32>
    %c0_2 = arith.constant 0 : index
    %c0_3 = arith.constant 0 : index
    %4 = vector.load %arg2[%c0_2, %c0_3] : memref<128x16xf32, #tpu.memory_space<vmem>>, vector<128x16xf32>
    %5 = tpu.iota {dimensions = array<i32: 0>} : vector<16x512xi32>
    %6 = vector.extract_strided_slice %1 {offsets = [2, 0], sizes = [1, 512], strides = [1, 1]} : vector<8x512xi32> to vector<1x512xi32>
    %7 = vector.broadcast %6 : vector<1x512xi32> to vector<16x512xi32>
    %8 = arith.cmpi eq, %5, %7 : vector<16x512xi32>
    %9 = vector.extract_strided_slice %3 {offsets = [2, 0], sizes = [1, 512], strides = [1, 1]} : vector<4x512xf32> to vector<1x512xf32>
    %10 = vector.extract_strided_slice %1 {offsets = [3, 0], sizes = [1, 512], strides = [1, 1]} : vector<8x512xi32> to vector<1x512xi32>
    %11 = vector.broadcast %10 : vector<1x512xi32> to vector<16x512xi32>
    %12 = arith.cmpi eq, %5, %11 : vector<16x512xi32>
    %13 = vector.extract_strided_slice %3 {offsets = [3, 0], sizes = [1, 512], strides = [1, 1]} : vector<4x512xf32> to vector<1x512xf32>
    %cst = arith.constant 0.000000e+00 : f32
    %14 = vector.shape_cast %13 : vector<1x512xf32> to vector<1x512xf32>
    %15 = vector.broadcast %14 : vector<1x512xf32> to vector<16x512xf32>
    %16 = vector.broadcast %cst : f32 to vector<16x512xf32>
    %17 = arith.select %12, %15, %16 : vector<16x512xi1>, vector<16x512xf32>
    %18 = vector.shape_cast %9 : vector<1x512xf32> to vector<1x512xf32>
    %19 = vector.broadcast %18 : vector<1x512xf32> to vector<16x512xf32>
    %20 = arith.select %8, %19, %17 : vector<16x512xi1>, vector<16x512xf32>
    %cst_4 = arith.constant dense<0.000000e+00> : vector<128x512xf32>
    %21 = tpu.matmul %4, %20, %cst_4 {dimension_numbers = #tpu.dot_dimension_numbers<[1], [0], [0], [1], [0, 0, 1, 1], [], []>, precision = #tpu.contract_precision<fp32>} : vector<128x16xf32>, vector<16x512xf32>, vector<128x512xf32> -> vector<128x512xf32>
    %22 = tpu.iota {dimensions = array<i32: 0>} : vector<16x512xi32>
    %23 = vector.extract_strided_slice %1 {offsets = [0, 0], sizes = [1, 512], strides = [1, 1]} : vector<8x512xi32> to vector<1x512xi32>
    %24 = vector.broadcast %23 : vector<1x512xi32> to vector<16x512xi32>
    %25 = arith.cmpi eq, %22, %24 : vector<16x512xi32>
    %26 = vector.extract_strided_slice %3 {offsets = [0, 0], sizes = [1, 512], strides = [1, 1]} : vector<4x512xf32> to vector<1x512xf32>
    %27 = vector.extract_strided_slice %1 {offsets = [1, 0], sizes = [1, 512], strides = [1, 1]} : vector<8x512xi32> to vector<1x512xi32>
    %28 = vector.broadcast %27 : vector<1x512xi32> to vector<16x512xi32>
    %29 = arith.cmpi eq, %22, %28 : vector<16x512xi32>
    %30 = vector.extract_strided_slice %3 {offsets = [1, 0], sizes = [1, 512], strides = [1, 1]} : vector<4x512xf32> to vector<1x512xf32>
    %cst_5 = arith.constant 0.000000e+00 : f32
    %31 = vector.shape_cast %30 : vector<1x512xf32> to vector<1x512xf32>
    %32 = vector.broadcast %31 : vector<1x512xf32> to vector<16x512xf32>
    %33 = vector.broadcast %cst_5 : f32 to vector<16x512xf32>
    %34 = arith.select %29, %32, %33 : vector<16x512xi1>, vector<16x512xf32>
    %35 = vector.shape_cast %26 : vector<1x512xf32> to vector<1x512xf32>
    %36 = vector.broadcast %35 : vector<1x512xf32> to vector<16x512xf32>
    %37 = arith.select %25, %36, %34 : vector<16x512xi1>, vector<16x512xf32>
    %38 = tpu.concatenate %37, %37, %37, %37, %37, %37, %37, %37 in 0 : vector<16x512xf32>, vector<16x512xf32>, vector<16x512xf32>, vector<16x512xf32>, vector<16x512xf32>, vector<16x512xf32>, vector<16x512xf32>, vector<16x512xf32> -> vector<128x512xf32>
    %39 = arith.mulf %21, %38 : vector<128x512xf32>
    %40 = tpu.iota {dimensions = array<i32: 0>} : vector<8x128xi32>
    %41 = tpu.iota {dimensions = array<i32: 1>} : vector<8x128xi32>
    %c16_i32 = arith.constant 16 : i32
    %42 = vector.broadcast %c16_i32 : i32 to vector<8x128xi32>
    %43 = arith.muli %40, %42 : vector<8x128xi32>
    %44 = arith.cmpi sge, %41, %43 : vector<8x128xi32>
    %c16_i32_6 = arith.constant 16 : i32
    %45 = vector.broadcast %c16_i32_6 : i32 to vector<8x128xi32>
    %46 = arith.muli %40, %45 : vector<8x128xi32>
    %c16_i32_7 = arith.constant 16 : i32
    %47 = vector.broadcast %c16_i32_7 : i32 to vector<8x128xi32>
    %48 = arith.addi %46, %47 : vector<8x128xi32>
    %49 = arith.cmpi slt, %41, %48 : vector<8x128xi32>
    %50 = arith.andi %44, %49 : vector<8x128xi1>
    %cst_8 = arith.constant 1.000000e+00 : f32
    %cst_9 = arith.constant 0.000000e+00 : f32
    %51 = vector.broadcast %cst_8 : f32 to vector<8x128xf32>
    %52 = vector.broadcast %cst_9 : f32 to vector<8x128xf32>
    %53 = arith.select %50, %51, %52 : vector<8x128xi1>, vector<8x128xf32>
    %cst_10 = arith.constant dense<0.000000e+00> : vector<8x512xf32>
    %54 = tpu.matmul %53, %39, %cst_10 {dimension_numbers = #tpu.dot_dimension_numbers<[1], [0], [0], [1], [0, 0, 1, 1], [], []>, precision = #tpu.contract_precision<fp32>} : vector<8x128xf32>, vector<128x512xf32>, vector<8x512xf32> -> vector<8x512xf32>
    %55 = vector.extract_strided_slice %54 {offsets = [0, 0], sizes = [8, 128], strides = [1, 1]} : vector<8x512xf32> to vector<8x128xf32>
    %56 = vector.extract_strided_slice %54 {offsets = [0, 128], sizes = [8, 128], strides = [1, 1]} : vector<8x512xf32> to vector<8x128xf32>
    %57 = arith.maximumf %55, %56 : vector<8x128xf32>
    %58 = vector.extract_strided_slice %54 {offsets = [0, 256], sizes = [8, 128], strides = [1, 1]} : vector<8x512xf32> to vector<8x128xf32>
    %59 = arith.maximumf %57, %58 : vector<8x128xf32>
    %60 = vector.extract_strided_slice %54 {offsets = [0, 384], sizes = [8, 128], strides = [1, 1]} : vector<8x512xf32> to vector<8x128xf32>
    %61 = arith.maximumf %59, %60 : vector<8x128xf32>
    %c0_11 = arith.constant 0 : index
    %c0_12 = arith.constant 0 : index
    %62 = vector.load %arg3[%c0_11, %c0_12] : memref<8x128xf32, #tpu.memory_space<vmem>>, vector<8x128xf32>
    tpu.vector_store %arg3[%c0_11, %c0_12], %61 {strides = array<i32>} : memref<8x128xf32, #tpu.memory_space<vmem>>, vector<8x128xf32>,
    return
  }
  func.func @transform_0(%arg0: i32) -> (i32, i32, i32) {
    %c0_i32 = arith.constant 0 : i32
    %c0_i32_0 = arith.constant 0 : i32
    %c0_i32_1 = arith.constant 0 : i32
    return %arg0, %c0_i32, %c0_i32_0 : i32, i32, i32
  }
  func.func @transform_1(%arg0: i32) -> (i32, i32) {
    %c0_i32 = arith.constant 0 : i32
    %c0_i32_0 = arith.constant 0 : i32
    %c0_i32_1 = arith.constant 0 : i32
    return %c0_i32, %c0_i32_0 : i32, i32
  }
  func.func @transform_2(%arg0: i32) -> (i32, i32) {
    %c0_i32 = arith.constant 0 : i32
    %c0_i32_0 = arith.constant 0 : i32
    return %c0_i32, %arg0 : i32, i32
  }
}

</mosaic_0001>

<bundles_post_ra>
// kernel: tpu_custom_call.1
= control target key start
LH: loop header
LB: loop body
LE: loop exit
PB: predicated region body
PF: predicated region fallthrough
CT: control target
= control target key end

     0   :  { %7 = vsyncpa [#allocation3], 0  ;;  %s7154_s0 = inlined_call_operand.vmem [shape: s32[2,8,512], index: 0, kind: input, shape index: {}]   ;;  %s7155_s1 = inlined_call_operand.vmem [shape: f32[128,16], index: 1, kind: input, shape index: {}]   ;;  %s7156_s2 = inlined_call_operand.hbm [shape: f32[8,256], index: 2, kind: output, shape index: {}]  }
   0x1   :  { %9 = vsyncpa [#allocation3 + $0x1], 0  ;;  %s4451_s9 = smov 0   ;;  %s4453_s10 = smov 0  }
   0x2   :  { %s4455_s11 = smov 0   ;;  %s4457_s12 = smov 0  }
   0x3 LB: > { %s4472_s13 = sadd.s32 4294967295, %s4432_s12   ;;  %s4301_s14 = sadd.s32 4294967294, %s4432_s12   ;;  %s4432_s12 = sphi %s4457_s12, %s7965_s12   ;;  %s4428_s11 = sphi %s4455_s11, %s7964_s11   ;;  %s4424_s10 = sphi %s4453_s10, %s7963_s10   ;;  %s4420_s9 = sphi %s4451_s9, %s7962_s9  }
   0x4   : > { %s4476_s15 = sadd.s32 1, %s4432_s12   ;;  %s69_s16 = sadd.s32 1, %s4428_s11 }
   0x5   : > { %s66_s17 = ssub.s32 %s4432_s12, %s4476_s15  ;;  %p79_p0 = scmp.ne.s32.totalorder %s4428_s11, %s4424_s10 }
   0x6   : > { %p67_p1 = scmp.eq.s32.totalorder %s66_s17, 0  ;;  %p80_p2 = scmp.eq.s32.totalorder %s4472_s13, 1 }
   0x7   : > { %p85_p3 = scmp.ne.s32.totalorder %s4424_s10, %s4420_s9  ;;  %p86_p4 = scmp.eq.s32.totalorder %s4301_s14, 1 }
   0x8   : > { %s4487_s18 = scalar_select %p67_p1, %s4428_s11, %s69_s16  }
   0x9   : > { %p4489_p5 = por %p80_p2, %p79_p0  ;;  %p4493_p6 = por %p86_p4, %p85_p3 }
   0xa   : > { %p4304_p7 = scmp.ge.s32.totalorder %s4432_s12, 1  ;;  %p115_p8 = scmp.lt.s32.totalorder %s4432_s12, 3 }
   0xc   : > { %p116_p9 = pnand %p4304_p7, %p115_p8 }
   0xe   : > { %119 = sbr.rel (%p116_p9) target bundleno = 1164 (0x48c), region = 28 }
  0x13   : > { %p137_p10 = scmp.lt.s32.totalorder %s4472_s13, 1  ;;  %v7157_v0 = vlaneseq  ;;  %v150_v1 = vld [vmem:[%s7155_s1] sm:$0xff]  ;;  %vm217_vm0 = vcmask 130048   ;;  %v151_v2 = vld [vmem:[%s7155_s1 + $0x8] sm:$0xff]  ;;  %v152_v10 = vld [vmem:[%s7155_s1 + $0x10] sm:$0xff]  ;;  %s4321_s22 = sshll.u32 %s4472_s13, 3 }
  0x14   : > { %v219_v3 = vsel %vm217_vm0, %v150_v1, 0  ;;  %v222_v4 = vsel %vm217_vm0, %v151_v2, 0  ;;  %v225_v19 = vsel %vm217_vm0, %v152_v10, 0  ;;  %v153_v36 = vld [vmem:[%s7155_s1 + $0x18] sm:$0xff]  ;;  %v154_v54 = vld [vmem:[%s7155_s1 + $0x20] sm:$0xff]  ;;  %v155_v63 = vld [vmem:[%s7155_s1 + $0x28] sm:$0xff] }
  0x15   : > { %s138_s25 = scalar_select %p137_p10, %s4472_s13, 1  ;;  %v4510_v5 = vshrl.u32 %v7157_v0, 7  ;;  %v4512_v6 = vand.u32 4294901760, %v219_v3  ;;  %v4517_v8 = vand.u32 4294901760, %v222_v4  ;;  %v4544_v24 = vand.u32 4294901760, %v225_v19 }
  0x16   : > { %v228_v45 = vsel %vm217_vm0, %v153_v36, 0  ;;  %v231_v59 = vsel %vm217_vm0, %v154_v54, 0  ;;  %v158_v36 = vld [vmem:[%s7155_s1 + $0x40] sm:$0xff]  ;;  %s4390_s6 = scalar_lea.hbm %s7156_s2, 16 }
  0x17   : > { %s4324_s26 = sshll.u32 %s138_s25, 5  ;;  %v4515_v7 = vsub.f32 %v219_v3, %v4512_v6  ;;  %v4525_v9 = vadd.s32 8, %v4510_v5  ;;  %v4537_v18 = vsub.f32 %v222_v4, %v4517_v8  ;;  %v4573_v41 = vsub.f32 %v225_v19, %v4544_v24  ;;  %s4237_s25 = scalar_lea.hbm %s7156_s2, %s4321_s22 }
  0x18   : > { %s4522_s29 = scalar_lea.vmem %s7154_s0, %s4324_s26  ;;  %v4591_v52 = vand.u32 4294901760, %v228_v45  ;;  %v4616_v62 = vand.u32 4294901760, %v231_v59  ;;  %v234_v3 = vsel %vm217_vm0, %v155_v63, 0  ;;  %s4241_s28 = sshll.u32 %s4237_s25, 4  ;;  %s4242_s28 = int_to_ptr.hbm [resolvable:$true] %s4241_s28 }
  0x19   : > { %7332 = vst [vmem:[#allocation5_spill] sm:$0xff] %v4515_v7  ;;  %v142_v11 = vld [vmem:[%s4522_s29] sm:$0xff]  ;;  %v4532_v12 = vand.u32 4294901760, %v4515_v7  ;;  %v4547_v25 = vld [vmem:[%s4522_s29 + $0x8] sm:$0xff]  ;;  %v4554_v31 = vand.u32 4294901760, %v4537_v18  ;;  %v4589_v51 = vand.u32 4294901760, %v4573_v41 }
  0x1a   : > { %7333 = vst [vmem:[#allocation6_spill] sm:$0xff] %v4525_v9  ;;  %v169_v13 = vperm.slane %v142_v11, 2  ;;  %v181_v14 = vperm.slane %v142_v11, 3  ;;  %v193_v15 = vperm.slane %v142_v11, 7  ;;  %v205_v16 = vperm.slane %v142_v11, 6  ;;  %s4384_s30 = sshra.s32 %s4242_s28, 4  ;;  %s4385_s30 = int_to_ptr.hbm [resolvable:$true] %s4384_s30 }
  0x1b   : > { %7334 = vst [vmem:[#allocation7_spill] sm:$0xff] %v4532_v12  ;;  %v287_v17 = vsub.f32 %v4515_v7, %v4532_v12  ;;  %v170_v28 = vperm.slane %v4547_v25, 2  ;;  %v182_v29 = vperm.slane %v4547_v25, 3  ;;  %v194_v32 = vperm.slane %v4547_v25, 7  ;;  %s4386_s3 = scalar_lea.hbm %s4385_s30, 8  ;;  %p4391_p0 = scmp.lt.s32.totalorder %s4385_s30, %s7156_s2 }
  0x1c   : > { %7335 = vst [vmem:[#allocation8_spill] sm:$0xff] %v4537_v18  ;;  %vm177_vm1 = vcmp.eq.s32.totalorder %v4525_v9, %v169_v13  ;;  %vm189_vm2 = vcmp.eq.s32.totalorder %v4525_v9, %v181_v14  ;;  %vm173_vm3 = vcmp.eq.s32.totalorder %v4510_v5, %v169_v13  ;;  %vm185_vm4 = vcmp.eq.s32.totalorder %v4510_v5, %v181_v14  ;;  %v156_v13 = vld [vmem:[%s7155_s1 + $0x30] sm:$0xff]  ;;  %p4387_p11 = scmp.ne.s32.totalorder %s4385_s30, %s4386_s3  ;;  %p4392_p1 = scmp.lt.s32.totalorder %s4390_s6, %s4386_s3 }
  0x1d   : > { %v201_v20 = vsel %vm189_vm2, %v193_v15, 0.0  ;;  %v197_v21 = vsel %vm185_vm4, %v193_v15, 0.0  ;;  %v4551_v30 = vand.u32 4294901760, %v287_v17  ;;  %7337 = vst [vmem:[#allocation10_spill] sm:$0xff] %v4554_v31  ;;  %v206_v33 = vperm.slane %v4547_v25, 6 }
  0x1e   : > { %v213_v22 = vsel %vm177_vm1, %v205_v16, %v201_v20  ;;  %v209_v23 = vsel %vm173_vm3, %v205_v16, %v197_v21  ;;  %vm178_vm5 = vcmp.eq.s32.totalorder %v4525_v9, %v170_v28  ;;  %vm190_vm6 = vcmp.eq.s32.totalorder %v4525_v9, %v182_v29  ;;  %7338 = vst [vmem:[#allocation11_spill] sm:$0xff] %v4573_v41  ;;  %v157_v21 = vld [vmem:[%s7155_s1 + $0x38] sm:$0xff]  ;;  %p4388_p12 = pnand %p4387_p11, %p4489_p5  ;;  %p4393_p2 = por %p4392_p1, %p4391_p0 }
  0x1f   : > { %v280_v26 = vand.u32 4294901760, %v213_v22  ;;  %v282_v27 = vand.u32 4294901760, %v209_v23  ;;  %7336 = vst [vmem:[#allocation9_spill] sm:$0xff] %v4551_v30  ;;  %v202_v39 = vsel %vm190_vm6, %v194_v32, 0.0  ;;  %v295_v40 = vsub.f32 %v4537_v18, %v4554_v31 }
  0x20   : > { %v214_v42 = vsel %vm178_vm5, %v206_v33, %v202_v39  ;;  %7339 = vst [vmem:[#allocation12_spill] sm:$0xff] %v4589_v51  ;;  %v303_v56 = vsub.f32 %v4573_v41, %v4589_v51  ;;  %v4606_v57 = vsub.f32 %v228_v45, %v4591_v52  ;;  %v4627_v2 = vsub.f32 %v231_v59, %v4616_v62  ;;  %p4389_p13 = pneg %p4388_p12 }
  0x21   : > { %281 = vmatpush.msra.mxu0 %v280_v26  ;;  %620 = vmatpush.msra.mxu3 %v280_v26  ;;  %v428_v34 = vsub.f32 %v213_v22, %v280_v26  ;;  %v434_v35 = vsub.f32 %v209_v23, %v282_v27  ;;  %v4579_v46 = vand.u32 4294901760, %v214_v42  ;;  %v4586_v50 = vand.u32 4294901760, %v295_v40 }
  0x22   : > { %7340 = vst [vmem:[#allocation13_spill] sm:$0xff] %v4606_v57  ;;  %v4611_v60 = vand.u32 4294901760, %v303_v56  ;;  %v4614_v61 = vand.u32 4294901760, %v4606_v57  ;;  %v4635_v10 = vand.u32 4294901760, %v4627_v2  ;;  %v4637_v11 = vand.u32 4294901760, %v234_v3  ;;  %p4394_p3 = pnand %p4393_p2, %p4389_p13 }
  0x23   : > { %283 = vmatpush.msra.mxu0 %v282_v27  ;;  %520 = vmatpush.msra.mxu2 %v428_v34  ;;  %v429_v37 = vand.u32 4294901760, %v428_v34  ;;  %v435_v38 = vand.u32 4294901760, %v434_v35  ;;  %v4584_v49 = vsub.f32 %v214_v42, %v4579_v46  ;;  %7342 = vst [vmem:[#allocation15_spill] sm:$0xff] %v4627_v2  ;;  %v237_v16 = vsel %vm217_vm0, %v156_v13, 0 }
  0x24   : > { %622 = vmatpush.msra.mxu3 %v282_v27  ;;  %289 = vmatmul.f32.vlgmr.msra.gmra.mxu0 %v4551_v30  ;;  %7341 = vst [vmem:[#allocation14_spill] sm:$0xff] %v4614_v61  ;;  %v311_v1 = vsub.f32 %v4606_v57, %v4614_v61  ;;  %v319_v14 = vsub.f32 %v4627_v2, %v4635_v10  ;;  %v4657_v20 = vand.u32 4294901760, %v237_v16  ;;  %v243_v39 = vsel %vm217_vm0, %v158_v36, 0 }
  0x25   : > { %626 = vmatmul.f32.vlgmr.msra.gmra.mxu3 %v4532_v12  ;;  %523 = vmatpush.msra.mxu2 %v434_v35  ;;  %v430_v43 = vsub.f32 %v428_v34, %v429_v37  ;;  %v436_v44 = vsub.f32 %v434_v35, %v435_v38  ;;  %v1053_v53 = vand.u32 4294901760, %v4584_v49  ;;  %7343 = vst [vmem:[#allocation16_spill] sm:$0xff] %v4635_v10 }
  0x26   : > { %526 = vmatmul.f32.vlgmr.msra.gmra.mxu2 %v4515_v7  ;;  %737 = vmatpush.msrb.mxu0 %v429_v37  ;;  %v4632_v4 = vand.u32 4294901760, %v311_v1  ;;  %v4647_v15 = vsub.f32 %v234_v3, %v4637_v11  ;;  %v4652_v17 = vand.u32 4294901760, %v319_v14  ;;  %v4667_v23 = vsub.f32 %v237_v16, %v4657_v20 }
  0x27   : > { %v431_v47 = vand.u32 4294901760, %v430_v43  ;;  %v437_v48 = vand.u32 4294901760, %v436_v44  ;;  %905 = vmatpush.msrb.mxu2 %v4579_v46  ;;  %v1054_v55 = vsub.f32 %v4584_v49, %v1053_v53  ;;  %v4697_v43 = vand.u32 4294901760, %v243_v39  ;;  %v159_v44 = vld [vmem:[%s7155_s1 + $0x48] sm:$0xff] }
  0x28   : > { %741 = vmatpush.msrb.mxu0 %v435_v38  ;;  %7344 = vst [vmem:[#allocation17_spill] sm:$0xff] %v4647_v15  ;;  %v4655_v19 = vand.u32 4294901760, %v4647_v15  ;;  %v4675_v34 = vand.u32 4294901760, %v4667_v23  ;;  %vm174_vm7 = vcmp.eq.s32.totalorder %v4510_v5, %v170_v28  ;;  %vm186_vm8 = vcmp.eq.s32.totalorder %v4510_v5, %v182_v29  ;;  %v161_v28 = vld [vmem:[%s7155_s1 + $0x58] sm:$0xff] }
  0x29   : > { %432 = vmatpush.msra.mxu1 %v431_v47  ;;  %v1055_v58 = vand.u32 4294901760, %v1054_v55  ;;  %7346 = vst [vmem:[#allocation19_spill] sm:$0xff] %v4667_v23  ;;  %v4707_v47 = vsub.f32 %v243_v39, %v4697_v43  ;;  %v198_v3 = vsel %vm186_vm8, %v194_v32, 0.0  ;;  %v252_v25 = vsel %vm217_vm0, %v161_v28, 0 }
  0x2a   : > { %1144 = vmatpush.msra.mxu0 %v4584_v49  ;;  %7345 = vst [vmem:[#allocation18_spill] sm:$0xff] %v4655_v19  ;;  %v327_v22 = vsub.f32 %v4647_v15, %v4655_v19  ;;  %v335_v37 = vsub.f32 %v4667_v23, %v4675_v34 }
  0x2b   : > { %438 = vmatpush.msra.mxu1 %v437_v48  ;;  %1056 = vmatpush.msrb.mxu3 %v1055_v58  ;;  %7347 = vst [vmem:[#allocation20_spill] sm:$0xff] %v4675_v34  ;;  %v246_v48 = vsel %vm217_vm0, %v159_v44, 0  ;;  %v4715_v55 = vand.u32 4294901760, %v4707_v47  ;;  %v160_v58 = vld [vmem:[%s7155_s1 + $0x50] sm:$0xff]  ;;  %v4769_v44 = vand.u32 4294901760, %v252_v25 }
  0x2c   : > { %297 = vmatmul.f32.gmra.mxu0 %v4586_v50  ;;  %440 = vmatmul.f32.vlgmr.msra.gmra.mxu1 %v4512_v6  ;;  %v4692_v40 = vand.u32 4294901760, %v335_v37  ;;  %7351 = vst [vmem:[#allocation24_spill] sm:$0xff] %v4707_v47  ;;  %v4717_v56 = vand.u32 4294901760, %v246_v48  ;;  %v249_v1 = vsel %vm217_vm0, %v160_v58, 0 }
  0x2d   : > { %632 = vmatmul.f32.gmra.mxu3 %v4554_v31  ;;  %822 = vmatpush.msrb.mxu1 %v280_v26  ;;  %v240_v26 = vsel %vm217_vm0, %v157_v21, 0  ;;  %7352 = vst [vmem:[#allocation25_spill] sm:$0xff] %v4715_v55  ;;  %v351_v59 = vsub.f32 %v4707_v47, %v4715_v55  ;;  %v4745_v16 = vand.u32 4294901760, %v249_v1  ;;  %v210_v21 = vsel %vm174_vm7, %v206_v33, %v198_v3 }
  0x2e   : > { %531 = vmatmul.f32.gmra.mxu2 %v4537_v18  ;;  %v4677_v35 = vand.u32 4294901760, %v240_v26  ;;  %v4727_v63 = vsub.f32 %v246_v48, %v4717_v56  ;;  %7359 = vst [vmem:[#allocation32_spill] sm:$0xff] %v4769_v44  ;;  %v162_v48 = vld [vmem:[%s7155_s1 + $0x60] sm:$0xff] }
  0x2f   : > { %824 = vmatpush.msrb.mxu1 %v282_v27  ;;  %v4672_v27 = vand.u32 4294901760, %v327_v22  ;;  %v4740_v13 = vand.u32 4294901760, %v351_v59  ;;  %7355 = vst [vmem:[#allocation28_spill] sm:$0xff] %v4745_v16  ;;  %v906_v22 = vand.u32 4294901760, %v210_v21  ;;  %v255_v58 = vsel %vm217_vm0, %v162_v48, 0 }
  0x30   : > { %7348 = vst [vmem:[#allocation21_spill] sm:$0xff] %v4677_v35  ;;  %v4687_v38 = vsub.f32 %v240_v26, %v4677_v35  ;;  %v4743_v14 = vand.u32 4294901760, %v4727_v63  ;;  %v4757_v26 = vsub.f32 %v249_v1, %v4745_v16  ;;  %v4790_v3 = vand.u32 4294901760, %v255_v58 }
  0x31   : > { %1244 = vmatpush.msra.mxu1 %v4579_v46  ;;  %7353 = vst [vmem:[#allocation26_spill] sm:$0xff] %v4727_v63  ;;  %907 = vmatpush.msrb.mxu2 %v906_v22  ;;  %v1058_v29 = vsub.f32 %v210_v21, %v906_v22  ;;  %v163_v21 = vld [vmem:[%s7155_s1 + $0x68] sm:$0xff] }
  0x32   : > { %7349 = vst [vmem:[#allocation22_spill] sm:$0xff] %v4687_v38  ;;  %v4695_v42 = vand.u32 4294901760, %v4687_v38  ;;  %v359_v32 = vsub.f32 %v4727_v63, %v4743_v14  ;;  %v4767_v39 = vand.u32 4294901760, %v4757_v26 }
  0x33   : > { %7354 = vst [vmem:[#allocation27_spill] sm:$0xff] %v4743_v14  ;;  %1246 = vmatpush.msra.mxu1 %v906_v22  ;;  %v1059_v33 = vand.u32 4294901760, %v1058_v29  ;;  %1361 = vmatpush.msra.mxu2 %v1053_v53  ;;  %v4779_v53 = vsub.f32 %v252_v25, %v4769_v44 }
  0x34   : > { %305 = vmatmul.f32.gmra.mxu0 %v4611_v60  ;;  %444 = vmatmul.f32.gmra.mxu1 %v4517_v8  ;;  %7350 = vst [vmem:[#allocation23_spill] sm:$0xff] %v4695_v42  ;;  %v343_v45 = vsub.f32 %v4687_v38, %v4695_v42  ;;  %v4764_v37 = vand.u32 4294901760, %v359_v32  ;;  %v367_v49 = vsub.f32 %v4757_v26, %v4767_v39 }
  0x35   : > { %638 = vmatmul.f32.gmra.mxu3 %v4589_v51  ;;  %7356 = vst [vmem:[#allocation29_spill] sm:$0xff] %v4757_v26  ;;  %1147 = vmatpush.msra.mxu0 %v1058_v29  ;;  %v1060_v36 = vsub.f32 %v1058_v29, %v1059_v33  ;;  %v4788_v1 = vand.u32 4294901760, %v4779_v53  ;;  %v258_v29 = vsel %vm217_vm0, %v163_v21, 0 }
  0x36   : > { %536 = vmatmul.f32.gmra.mxu2 %v4573_v41  ;;  %v4712_v54 = vand.u32 4294901760, %v343_v45  ;;  %7357 = vst [vmem:[#allocation30_spill] sm:$0xff] %v4764_v37  ;;  %v4785_v59 = vand.u32 4294901760, %v367_v49  ;;  %v4810_v25 = vand.u32 4294901760, %v258_v29 }
  0x37   : > { %1365 = vmatpush.msra.mxu2 %v1059_v33  ;;  %7358 = vst [vmem:[#allocation31_spill] sm:$0xff] %v4767_v39  ;;  %v1061_v45 = vand.u32 4294901760, %v1060_v36  ;;  %v375_v28 = vsub.f32 %v4779_v53, %v4788_v1  ;;  %v164_v33 = vld [vmem:[%s7155_s1 + $0x70] sm:$0xff] }
  0x38   : > { %7360 = vst [vmem:[#allocation33_spill] sm:$0xff] %v4779_v53  ;;  %v261_v48 = vsel %vm217_vm0, %v164_v33, 0 }
  0x39   : > { %1062 = vmatpush.msrb.mxu3 %v1061_v45  ;;  %7361 = vst [vmem:[#allocation34_spill] sm:$0xff] %v4785_v59  ;;  %v4820_v45 = vsub.f32 %v258_v29, %v4810_v25  ;;  %v4830_v21 = vand.u32 4294901760, %v261_v48 }
  0x3a   : > { %7362 = vst [vmem:[#allocation35_spill] sm:$0xff] %v4788_v1 }
  0x3b   : > { %1446 = vmatpush.msra.mxu3 %v4579_v46  ;;  %7363 = vst [vmem:[#allocation36_spill] sm:$0xff] %v4790_v3  ;;  %v4800_v46 = vsub.f32 %v255_v58, %v4790_v3  ;;  %v4828_v58 = vand.u32 4294901760, %v4820_v45  ;;  %v4840_v33 = vsub.f32 %v261_v48, %v4830_v21 }
  0x3c   : > { %313 = vmatmul.f32.gmra.mxu0 %v4632_v4  ;;  %448 = vmatmul.f32.gmra.mxu1 %v4544_v24  ;;  %7367 = vst [vmem:[#allocation40_spill] sm:$0xff] %v4810_v25 }
  0x3d   : > { %644 = vmatmul.f32.gmra.mxu3 %v4614_v61  ;;  %7364 = vst [vmem:[#allocation37_spill] sm:$0xff] %v4800_v46  ;;  %v4808_v32 = vand.u32 4294901760, %v4800_v46  ;;  %v391_v29 = vsub.f32 %v4820_v45, %v4828_v58 }
  0x3e   : > { %541 = vmatmul.f32.gmra.mxu2 %v4606_v57  ;;  %1448 = vmatpush.msra.mxu3 %v906_v22  ;;  %v4805_v22 = vand.u32 4294901760, %v375_v28  ;;  %7368 = vst [vmem:[#allocation41_spill] sm:$0xff] %v4820_v45  ;;  %v165_v28 = vld [vmem:[%s7155_s1 + $0x78] sm:$0xff] }
  0x3f   : > { %7366 = vst [vmem:[#allocation39_spill] sm:$0xff] %v4808_v32  ;;  %v383_v36 = vsub.f32 %v4800_v46, %v4808_v32  ;;  %v4845_v0 = vand.u32 4294901760, %v391_v29 }
  0x40   : > { %7365 = vst [vmem:[#allocation38_spill] sm:$0xff] %v4805_v22 }
  0x41   : > { %v4825_v49 = vand.u32 4294901760, %v383_v36  ;;  %7370 = vst [vmem:[#allocation43_spill] sm:$0xff] %v4828_v58  ;;  %v264_v36 = vsel %vm217_vm0, %v165_v28, 0 }
  0x42   : > { %7371 = vst [vmem:[#allocation44_spill] sm:$0xff] %v4830_v21 }
  0x43   : > { %7369 = vst [vmem:[#allocation42_spill] sm:$0xff] %v4825_v49 }
  0x44   : > { %321 = vmatmul.f32.gmra.mxu0 %v4652_v17  ;;  %452 = vmatmul.f32.gmra.mxu1 %v4591_v52  ;;  %7372 = vst [vmem:[#allocation45_spill] sm:$0xff] %v4840_v33 }
  0x45   : > { %650 = vmatmul.f32.gmra.mxu3 %v4635_v10  ;;  %7373 = vst [vmem:[#allocation46_spill] sm:$0xff] %v4845_v0 }
  0x46   : > { %546 = vmatmul.f32.gmra.mxu2 %v4627_v2 }
  0x4c   : > { %329 = vmatmul.f32.gmra.mxu0 %v4672_v27  ;;  %456 = vmatmul.f32.gmra.mxu1 %v4616_v62 }
  0x4d   : > { %656 = vmatmul.f32.gmra.mxu3 %v4655_v19 }
  0x4e   : > { %551 = vmatmul.f32.gmra.mxu2 %v4647_v15 }
  0x54   : > { %337 = vmatmul.f32.gmra.mxu0 %v4692_v40  ;;  %460 = vmatmul.f32.gmra.mxu1 %v4637_v11 }
  0x55   : > { %662 = vmatmul.f32.gmra.mxu3 %v4675_v34 }
  0x56   : > { %556 = vmatmul.f32.gmra.mxu2 %v4667_v23 }
  0x5c   : > { %345 = vmatmul.f32.gmra.mxu0 %v4712_v54  ;;  %464 = vmatmul.f32.gmra.mxu1 %v4657_v20 }
  0x5d   : > { %668 = vmatmul.f32.gmra.mxu3 %v4695_v42 }
  0x5e   : > { %561 = vmatmul.f32.gmra.mxu2 %v4687_v38 }
  0x64   : > { %353 = vmatmul.f32.gmra.mxu0 %v4740_v13  ;;  %468 = vmatmul.f32.gmra.mxu1 %v4677_v35 }
  0x65   : > { %674 = vmatmul.f32.gmra.mxu3 %v4715_v55 }
  0x66   : > { %566 = vmatmul.f32.gmra.mxu2 %v4707_v47 }
  0x6c   : > { %361 = vmatmul.f32.gmra.mxu0 %v4764_v37  ;;  %472 = vmatmul.f32.gmra.mxu1 %v4697_v43 }
  0x6d   : > { %680 = vmatmul.f32.gmra.mxu3 %v4743_v14 }
  0x6e   : > { %571 = vmatmul.f32.gmra.mxu2 %v4727_v63 }
  0x74   : > { %369 = vmatmul.f32.gmra.mxu0 %v4785_v59  ;;  %476 = vmatmul.f32.gmra.mxu1 %v4717_v56 }
  0x75   : > { %686 = vmatmul.f32.gmra.mxu3 %v4767_v39  ;;  %v4850_v39 = vand.u32 4294901760, %v264_v36 }
  0x76   : > { %576 = vmatmul.f32.gmra.mxu2 %v4757_v26 }
  0x77   : > { %7375 = vst [vmem:[#allocation48_spill] sm:$0xff] %v4850_v39 }
  0x7c   : > { %377 = vmatmul.f32.gmra.mxu0 %v4805_v22  ;;  %480 = vmatmul.f32.gmra.mxu1 %v4745_v16 }
  0x7d   : > { %692 = vmatmul.f32.gmra.mxu3 %v4788_v1  ;;  %v4848_v1 = vand.u32 4294901760, %v4840_v33 }
  0x7e   : > { %581 = vmatmul.f32.gmra.mxu2 %v4779_v53 }
  0x7f   : > { %7374 = vst [vmem:[#allocation47_spill] sm:$0xff] %v4848_v1  ;;  %v399_v48 = vsub.f32 %v4840_v33, %v4848_v1 }
  0x81   : > { %v4861_v28 = vand.u32 4294901760, %v399_v48 }
  0x83   : > { %7377 = vst [vmem:[#allocation50_spill] sm:$0xff] %v4861_v28 }
  0x84   : > { %385 = vmatmul.f32.gmra.mxu0 %v4825_v49  ;;  %484 = vmatmul.f32.gmra.mxu1 %v4769_v44 }
  0x85   : > { %698 = vmatmul.f32.gmra.mxu3 %v4808_v32  ;;  %v4857_v32 = vsub.f32 %v264_v36, %v4850_v39 }
  0x86   : > { %586 = vmatmul.f32.gmra.mxu2 %v4800_v46 }
  0x87   : > { %7376 = vst [vmem:[#allocation49_spill] sm:$0xff] %v4857_v32  ;;  %v4864_v29 = vand.u32 4294901760, %v4857_v32 }
  0x89   : > { %7378 = vst [vmem:[#allocation51_spill] sm:$0xff] %v4864_v29  ;;  %v407_v46 = vsub.f32 %v4857_v32, %v4864_v29 }
  0x8b   : > { %v4872_v36 = vand.u32 4294901760, %v407_v46 }
  0x8c   : > { %393 = vmatmul.f32.gmra.mxu0 %v4845_v0  ;;  %488 = vmatmul.f32.gmra.mxu1 %v4790_v3 }
  0x8d   : > { %704 = vmatmul.f32.gmra.mxu3 %v4828_v58  ;;  %7379 = vst [vmem:[#allocation52_spill] sm:$0xff] %v4872_v36 }
  0x8e   : > { %591 = vmatmul.f32.gmra.mxu2 %v4820_v45 }
  0x94   : > { %401 = vmatmul.f32.gmra.mxu0 %v4861_v28  ;;  %492 = vmatmul.f32.gmra.mxu1 %v4810_v25 }
  0x95   : > { %710 = vmatmul.f32.gmra.mxu3 %v4848_v1 }
  0x96   : > { %596 = vmatmul.f32.gmra.mxu2 %v4840_v33 }
  0x9c   : > { %409 = vmatmul.f32.gmra.mxu0 %v4872_v36  ;;  %496 = vmatmul.f32.gmra.mxu1 %v4830_v21 }
  0x9d   : > { %716 = vmatmul.f32.gmra.mxu3 %v4864_v29 }
  0x9e   : > { %601 = vmatmul.f32.gmra.mxu2 %v4857_v32 }
  0xa1   : > { %v290_v48 = vpop.f32.mrf.mxu0 }
  0xa4   : > { %500 = vmatmul.f32.gmra.mxu1 %v4850_v39  ;;  %743 = vmatmul.f32.vlgmr.msrb.gmra.mxu0 %v4512_v6 }
  0xa5   : > { %1064 = vmatmul.f32.vlgmr.msrb.gmra.mxu3 %v4512_v6 }
  0xa6   : > { %913 = vmatmul.f32.vlgmr.msrb.gmra.mxu2 %v4551_v30 }
  0xa8   : > { %v627_v1 = vpop.f32.mrf.mxu3 }
  0xa9   : > { %v298_v46 = vpop.f32.mrf.mxu0  ;;  %v441_v58 = vpop.f32.mrf.mxu1 }
  0xaa   : > { %v442_v33 = vadd.f32 %v441_v58, %v290_v48  ;;  %v527_v45 = vpop.f32.mrf.mxu2 }
  0xac   : > { %v528_v53 = vadd.f32 %v527_v45, %v442_v33  ;;  %747 = vmatmul.f32.gmra.mxu0 %v4517_v8  ;;  %826 = vmatmul.f32.vlgmr.msrb.gmra.mxu1 %v4512_v6 }
  0xad   : > { %1068 = vmatmul.f32.gmra.mxu3 %v4517_v8 }
  0xae   : > { %v4885_v29 = vadd.f32 %v627_v1, %v528_v53  ;;  %921 = vmatmul.f32.gmra.mxu2 %v4586_v50 }
  0xb0   : > { %7380 = vst [vmem:[#allocation53_spill] sm:$0xff] %v4885_v29  ;;  %v633_v32 = vpop.f32.mrf.mxu3 }
  0xb1   : > { %v306_v14 = vpop.f32.mrf.mxu0  ;;  %v445_v26 = vpop.f32.mrf.mxu1 }
  0xb2   : > { %v446_v30 = vadd.f32 %v445_v26, %v298_v46  ;;  %v532_v55 = vpop.f32.mrf.mxu2 }
  0xb4   : > { %v533_v63 = vadd.f32 %v532_v55, %v446_v30  ;;  %751 = vmatmul.f32.gmra.mxu0 %v4544_v24  ;;  %830 = vmatmul.f32.gmra.mxu1 %v4517_v8 }
  0xb5   : > { %1072 = vmatmul.f32.gmra.mxu3 %v4544_v24 }
  0xb6   : > { %v4891_v45 = vadd.f32 %v633_v32, %v533_v63  ;;  %929 = vmatmul.f32.gmra.mxu2 %v4611_v60 }
  0xb8   : > { %7381 = vst [vmem:[#allocation54_spill] sm:$0xff] %v4891_v45  ;;  %v639_v53 = vpop.f32.mrf.mxu3 }
  0xb9   : > { %v314_v1 = vpop.f32.mrf.mxu0  ;;  %v449_v58 = vpop.f32.mrf.mxu1 }
  0xba   : > { %v450_v33 = vadd.f32 %v449_v58, %v306_v14  ;;  %v537_v48 = vpop.f32.mrf.mxu2 }
  0xbc   : > { %v538_v29 = vadd.f32 %v537_v48, %v450_v33  ;;  %755 = vmatmul.f32.gmra.mxu0 %v4591_v52  ;;  %834 = vmatmul.f32.gmra.mxu1 %v4544_v24 }
  0xbd   : > { %1076 = vmatmul.f32.gmra.mxu3 %v4591_v52 }
  0xbe   : > { %v4897_v30 = vadd.f32 %v639_v53, %v538_v29  ;;  %937 = vmatmul.f32.gmra.mxu2 %v4632_v4 }
  0xc0   : > { %7382 = vst [vmem:[#allocation55_spill] sm:$0xff] %v4897_v30  ;;  %v645_v55 = vpop.f32.mrf.mxu3 }
  0xc1   : > { %v322_v63 = vpop.f32.mrf.mxu0  ;;  %v453_v26 = vpop.f32.mrf.mxu1 }
  0xc2   : > { %v454_v32 = vadd.f32 %v453_v26, %v314_v1  ;;  %v542_v46 = vpop.f32.mrf.mxu2 }
  0xc4   : > { %v543_v45 = vadd.f32 %v542_v46, %v454_v32  ;;  %759 = vmatmul.f32.gmra.mxu0 %v4616_v62  ;;  %838 = vmatmul.f32.gmra.mxu1 %v4591_v52 }
  0xc5   : > { %1080 = vmatmul.f32.gmra.mxu3 %v4616_v62 }
  0xc6   : > { %v4903_v14 = vadd.f32 %v645_v55, %v543_v45  ;;  %945 = vmatmul.f32.gmra.mxu2 %v4652_v17 }
  0xc8   : > { %7383 = vst [vmem:[#allocation56_spill] sm:$0xff] %v4903_v14  ;;  %v651_v29 = vpop.f32.mrf.mxu3 }
  0xc9   : > { %v330_v53 = vpop.f32.mrf.mxu0  ;;  %v457_v58 = vpop.f32.mrf.mxu1 }
  0xca   : > { %v458_v33 = vadd.f32 %v457_v58, %v322_v63  ;;  %v547_v48 = vpop.f32.mrf.mxu2 }
  0xcc   : > { %v548_v30 = vadd.f32 %v547_v48, %v458_v33  ;;  %763 = vmatmul.f32.gmra.mxu0 %v4637_v11  ;;  %842 = vmatmul.f32.gmra.mxu1 %v4616_v62 }
  0xcd   : > { %1084 = vmatmul.f32.gmra.mxu3 %v4637_v11 }
  0xce   : > { %v4909_v1 = vadd.f32 %v651_v29, %v548_v30  ;;  %953 = vmatmul.f32.gmra.mxu2 %v4672_v27 }
  0xd0   : > { %7384 = vst [vmem:[#allocation57_spill] sm:$0xff] %v4909_v1  ;;  %v657_v45 = vpop.f32.mrf.mxu3 }
  0xd1   : > { %v338_v55 = vpop.f32.mrf.mxu0  ;;  %v461_v26 = vpop.f32.mrf.mxu1 }
  0xd2   : > { %v462_v32 = vadd.f32 %v461_v26, %v330_v53  ;;  %v552_v46 = vpop.f32.mrf.mxu2 }
  0xd4   : > { %v553_v14 = vadd.f32 %v552_v46, %v462_v32  ;;  %767 = vmatmul.f32.gmra.mxu0 %v4657_v20  ;;  %846 = vmatmul.f32.gmra.mxu1 %v4637_v11 }
  0xd5   : > { %1088 = vmatmul.f32.gmra.mxu3 %v4657_v20 }
  0xd6   : > { %v4915_v63 = vadd.f32 %v657_v45, %v553_v14  ;;  %961 = vmatmul.f32.gmra.mxu2 %v4692_v40 }
  0xd8   : > { %7385 = vst [vmem:[#allocation58_spill] sm:$0xff] %v4915_v63  ;;  %v663_v30 = vpop.f32.mrf.mxu3 }
  0xd9   : > { %v346_v29 = vpop.f32.mrf.mxu0  ;;  %v465_v58 = vpop.f32.mrf.mxu1 }
  0xda   : > { %v466_v33 = vadd.f32 %v465_v58, %v338_v55  ;;  %v557_v48 = vpop.f32.mrf.mxu2 }
  0xdc   : > { %v558_v1 = vadd.f32 %v557_v48, %v466_v33  ;;  %771 = vmatmul.f32.gmra.mxu0 %v4677_v35  ;;  %850 = vmatmul.f32.gmra.mxu1 %v4657_v20 }
  0xdd   : > { %1092 = vmatmul.f32.gmra.mxu3 %v4677_v35 }
  0xde   : > { %v4921_v53 = vadd.f32 %v663_v30, %v558_v1  ;;  %969 = vmatmul.f32.gmra.mxu2 %v4712_v54 }
  0xe0   : > { %7386 = vst [vmem:[#allocation59_spill] sm:$0xff] %v4921_v53  ;;  %v669_v14 = vpop.f32.mrf.mxu3 }
  0xe1   : > { %v354_v45 = vpop.f32.mrf.mxu0  ;;  %v469_v26 = vpop.f32.mrf.mxu1 }
  0xe2   : > { %v470_v32 = vadd.f32 %v469_v26, %v346_v29  ;;  %v562_v46 = vpop.f32.mrf.mxu2 }
  0xe4   : > { %v563_v63 = vadd.f32 %v562_v46, %v470_v32  ;;  %775 = vmatmul.f32.gmra.mxu0 %v4697_v43  ;;  %854 = vmatmul.f32.gmra.mxu1 %v4677_v35 }
  0xe5   : > { %1096 = vmatmul.f32.gmra.mxu3 %v4697_v43 }
  0xe6   : > { %v4927_v55 = vadd.f32 %v669_v14, %v563_v63  ;;  %977 = vmatmul.f32.gmra.mxu2 %v4740_v13 }
  0xe8   : > { %7387 = vst [vmem:[#allocation60_spill] sm:$0xff] %v4927_v55  ;;  %v675_v1 = vpop.f32.mrf.mxu3 }
  0xe9   : > { %v362_v30 = vpop.f32.mrf.mxu0  ;;  %v473_v58 = vpop.f32.mrf.mxu1 }
  0xea   : > { %v474_v33 = vadd.f32 %v473_v58, %v354_v45  ;;  %v567_v48 = vpop.f32.mrf.mxu2 }
  0xec   : > { %v568_v53 = vadd.f32 %v567_v48, %v474_v33  ;;  %779 = vmatmul.f32.gmra.mxu0 %v4717_v56  ;;  %858 = vmatmul.f32.gmra.mxu1 %v4697_v43 }
  0xed   : > { %1100 = vmatmul.f32.gmra.mxu3 %v4717_v56 }
  0xee   : > { %v4933_v29 = vadd.f32 %v675_v1, %v568_v53  ;;  %985 = vmatmul.f32.gmra.mxu2 %v4764_v37 }
  0xf0   : > { %7388 = vst [vmem:[#allocation61_spill] sm:$0xff] %v4933_v29  ;;  %v681_v63 = vpop.f32.mrf.mxu3 }
  0xf1   : > { %v370_v14 = vpop.f32.mrf.mxu0  ;;  %v477_v26 = vpop.f32.mrf.mxu1 }
  0xf2   : > { %v478_v32 = vadd.f32 %v477_v26, %v362_v30  ;;  %v572_v46 = vpop.f32.mrf.mxu2 }
  0xf4   : > { %v573_v55 = vadd.f32 %v572_v46, %v478_v32  ;;  %783 = vmatmul.f32.gmra.mxu0 %v4745_v16  ;;  %862 = vmatmul.f32.gmra.mxu1 %v4717_v56 }
  0xf5   : > { %1104 = vmatmul.f32.gmra.mxu3 %v4745_v16 }
  0xf6   : > { %v4939_v45 = vadd.f32 %v681_v63, %v573_v55  ;;  %993 = vmatmul.f32.gmra.mxu2 %v4785_v59 }
  0xf8   : > { %7389 = vst [vmem:[#allocation62_spill] sm:$0xff] %v4939_v45  ;;  %v687_v53 = vpop.f32.mrf.mxu3 }
  0xf9   : > { %v378_v1 = vpop.f32.mrf.mxu0  ;;  %v481_v58 = vpop.f32.mrf.mxu1 }
  0xfa   : > { %v482_v33 = vadd.f32 %v481_v58, %v370_v14  ;;  %v577_v48 = vpop.f32.mrf.mxu2 }
  0xfc   : > { %v578_v29 = vadd.f32 %v577_v48, %v482_v33  ;;  %787 = vmatmul.f32.gmra.mxu0 %v4769_v44  ;;  %866 = vmatmul.f32.gmra.mxu1 %v4745_v16 }
  0xfd   : > { %1108 = vmatmul.f32.gmra.mxu3 %v4769_v44 }
  0xfe   : > { %v4945_v30 = vadd.f32 %v687_v53, %v578_v29  ;;  %1001 = vmatmul.f32.gmra.mxu2 %v4805_v22 }
 0x100   : > { %7390 = vst [vmem:[#allocation63_spill] sm:$0xff] %v4945_v30  ;;  %v693_v55 = vpop.f32.mrf.mxu3 }
 0x101   : > { %v386_v63 = vpop.f32.mrf.mxu0  ;;  %v485_v26 = vpop.f32.mrf.mxu1 }
 0x102   : > { %v486_v32 = vadd.f32 %v485_v26, %v378_v1  ;;  %v582_v46 = vpop.f32.mrf.mxu2 }
 0x104   : > { %v583_v45 = vadd.f32 %v582_v46, %v486_v32  ;;  %791 = vmatmul.f32.gmra.mxu0 %v4790_v3  ;;  %870 = vmatmul.f32.gmra.mxu1 %v4769_v44 }
 0x105   : > { %1112 = vmatmul.f32.gmra.mxu3 %v4790_v3 }
 0x106   : > { %v4951_v14 = vadd.f32 %v693_v55, %v583_v45  ;;  %1009 = vmatmul.f32.gmra.mxu2 %v4825_v49 }
 0x108   : > { %7391 = vst [vmem:[#allocation64_spill] sm:$0xff] %v4951_v14  ;;  %v699_v29 = vpop.f32.mrf.mxu3 }
 0x109   : > { %v394_v53 = vpop.f32.mrf.mxu0  ;;  %v489_v58 = vpop.f32.mrf.mxu1 }
 0x10a   : > { %v490_v33 = vadd.f32 %v489_v58, %v386_v63  ;;  %v587_v48 = vpop.f32.mrf.mxu2 }
 0x10c   : > { %v588_v30 = vadd.f32 %v587_v48, %v490_v33  ;;  %795 = vmatmul.f32.gmra.mxu0 %v4810_v25  ;;  %874 = vmatmul.f32.gmra.mxu1 %v4790_v3 }
 0x10d   : > { %1116 = vmatmul.f32.gmra.mxu3 %v4810_v25 }
 0x10e   : > { %v4957_v1 = vadd.f32 %v699_v29, %v588_v30  ;;  %1017 = vmatmul.f32.gmra.mxu2 %v4845_v0 }
 0x110   : > { %7392 = vst [vmem:[#allocation65_spill] sm:$0xff] %v4957_v1  ;;  %v705_v45 = vpop.f32.mrf.mxu3 }
 0x111   : > { %v402_v55 = vpop.f32.mrf.mxu0  ;;  %v493_v26 = vpop.f32.mrf.mxu1 }
 0x112   : > { %v494_v32 = vadd.f32 %v493_v26, %v394_v53  ;;  %v592_v46 = vpop.f32.mrf.mxu2 }
 0x114   : > { %v593_v14 = vadd.f32 %v592_v46, %v494_v32  ;;  %799 = vmatmul.f32.gmra.mxu0 %v4830_v21  ;;  %878 = vmatmul.f32.gmra.mxu1 %v4810_v25 }
 0x115   : > { %1120 = vmatmul.f32.gmra.mxu3 %v4830_v21 }
 0x116   : > { %v4963_v63 = vadd.f32 %v705_v45, %v593_v14  ;;  %1025 = vmatmul.f32.gmra.mxu2 %v4861_v28  ;;  %v4973_v14 = vld [vmem:[%s4522_s29 + $0x10] sm:$0xff] }
 0x117   : > { %v7192_v45 = vperm.slane %v4973_v14, 2  ;;  %v7195_v26 = vperm.slane %v4973_v14, 3  ;;  %v7193_v32 = vperm.slane %v4973_v14, 6 }
 0x118   : > { %7393 = vst [vmem:[#allocation66_spill] sm:$0xff] %v4963_v63  ;;  %v711_v30 = vpop.f32.mrf.mxu3 }
 0x119   : > { %v410_v29 = vpop.f32.mrf.mxu0  ;;  %v497_v58 = vpop.f32.mrf.mxu1  ;;  %vm179_vm9 = vcmp.eq.s32.totalorder %v4525_v9, %v7192_v45  ;;  %vm191_vm10 = vcmp.eq.s32.totalorder %v4525_v9, %v7195_v26 }
 0x11a   : > { %v498_v33 = vadd.f32 %v497_v58, %v402_v55  ;;  %v597_v48 = vpop.f32.mrf.mxu2  ;;  %v7194_v55 = vperm.slane %v4973_v14, 7 }
 0x11c   : > { %v598_v1 = vadd.f32 %v597_v48, %v498_v33  ;;  %803 = vmatmul.f32.gmra.mxu0 %v4850_v39  ;;  %882 = vmatmul.f32.gmra.mxu1 %v4830_v21  ;;  %v203_v48 = vsel %vm191_vm10, %v7194_v55, 0.0 }
 0x11d   : > { %1124 = vmatmul.f32.gmra.mxu3 %v4850_v39 }
 0x11e   : > { %v4969_v53 = vadd.f32 %v711_v30, %v598_v1  ;;  %1033 = vmatmul.f32.gmra.mxu2 %v4872_v36  ;;  %v215_v36 = vsel %vm179_vm9, %v7193_v32, %v203_v48 }
 0x120   : > { %7394 = vst [vmem:[#allocation67_spill] sm:$0xff] %v4969_v53  ;;  %v717_v46 = vpop.f32.mrf.mxu3 }
 0x121   : > { %v501_v58 = vpop.f32.mrf.mxu1  ;;  %v4979_v33 = vpop.f32.mrf.mxu0 }
 0x122   : > { %7395 = vst [vmem:[#allocation68_spill] sm:$0xff] %v4979_v33  ;;  %v502_v1 = vadd.f32 %v501_v58, %v410_v29  ;;  %v602_v30 = vpop.f32.mrf.mxu2  ;;  %v4993_v33 = vand.u32 4294901760, %v215_v36 }
 0x124   : > { %v603_v63 = vadd.f32 %v602_v30, %v502_v1  ;;  %886 = vmatmul.f32.gmra.mxu1 %v4850_v39  ;;  %1150 = vmatmul.f32.vlgmr.msra.gmra.mxu0 %v4515_v7  ;;  %v5000_v29 = vsub.f32 %v215_v36, %v4993_v33 }
 0x125   : > { %1450 = vmatmul.f32.vlgmr.msra.gmra.mxu3 %v4512_v6  ;;  %1529 = vmatpush.msrb.mxu0 %v4993_v33 }
 0x126   : > { %v4996_v45 = vadd.f32 %v717_v46, %v603_v63  ;;  %1367 = vmatmul.f32.vlgmr.msra.gmra.mxu2 %v4512_v6  ;;  %1868 = vmatpush.msrb.mxu3 %v4993_v33  ;;  %v7196_v1 = vand.u32 4294901760, %v5000_v29 }
 0x127   : > { %1768 = vmatpush.msrb.mxu2 %v5000_v29 }
 0x128   : > { %7396 = vst [vmem:[#allocation69_spill] sm:$0xff] %v4996_v45  ;;  %v1065_v58 = vpop.f32.mrf.mxu3  ;;  %v1678_v46 = vsub.f32 %v5000_v29, %v7196_v1 }
 0x129   : > { %v5006_v30 = vpop.f32.mrf.mxu0  ;;  %v5008_v48 = vpop.f32.mrf.mxu1 }
 0x12a   : > { %7397 = vst [vmem:[#allocation70_spill] sm:$0xff] %v5006_v30  ;;  %v914_v63 = vpop.f32.mrf.mxu2  ;;  %v1679_v32 = vand.u32 4294901760, %v1678_v46 }
 0x12b   : > { %7398 = vst [vmem:[#allocation71_spill] sm:$0xff] %v5008_v48  ;;  %v5013_v36 = vadd.f32 %v1065_v58, %v914_v63 }
 0x12c   : > { %1155 = vmatmul.f32.gmra.mxu0 %v4537_v18  ;;  %1250 = vmatmul.f32.vlgmr.msra.gmra.mxu1 %v4532_v12 }
 0x12d   : > { %1454 = vmatmul.f32.gmra.mxu3 %v4517_v8  ;;  %1680 = vmatpush.msrb.mxu1 %v1679_v32 }
 0x12e   : > { %1371 = vmatmul.f32.gmra.mxu2 %v4517_v8 }
 0x130   : > { %v1069_v55 = vpop.f32.mrf.mxu3 }
 0x131   : > { %v5019_v26 = vpop.f32.mrf.mxu0  ;;  %v5021_v48 = vpop.f32.mrf.mxu1 }
 0x132   : > { %7399 = vst [vmem:[#allocation72_spill] sm:$0xff] %v5019_v26  ;;  %v922_v30 = vpop.f32.mrf.mxu2 }
 0x133   : > { %7400 = vst [vmem:[#allocation73_spill] sm:$0xff] %v5021_v48  ;;  %v5023_v53 = vadd.f32 %v1069_v55, %v922_v30 }
 0x134   : > { %1160 = vmatmul.f32.gmra.mxu0 %v4573_v41  ;;  %1256 = vmatmul.f32.gmra.mxu1 %v4554_v31 }
 0x135   : > { %1458 = vmatmul.f32.gmra.mxu3 %v4544_v24 }
 0x136   : > { %1375 = vmatmul.f32.gmra.mxu2 %v4544_v24 }
 0x138   : > { %v1073_v58 = vpop.f32.mrf.mxu3 }
 0x139   : > { %v5029_v63 = vpop.f32.mrf.mxu0  ;;  %v5031_v32 = vpop.f32.mrf.mxu1 }
 0x13a   : > { %7401 = vst [vmem:[#allocation74_spill] sm:$0xff] %v5029_v63  ;;  %v930_v46 = vpop.f32.mrf.mxu2 }
 0x13b   : > { %7402 = vst [vmem:[#allocation75_spill] sm:$0xff] %v5031_v32  ;;  %v5033_v1 = vadd.f32 %v1073_v58, %v930_v46 }
 0x13c   : > { %1165 = vmatmul.f32.gmra.mxu0 %v4606_v57  ;;  %1262 = vmatmul.f32.gmra.mxu1 %v4589_v51 }
 0x13d   : > { %1462 = vmatmul.f32.gmra.mxu3 %v4591_v52 }
 0x13e   : > { %1379 = vmatmul.f32.gmra.mxu2 %v4591_v52 }
 0x140   : > { %v1077_v55 = vpop.f32.mrf.mxu3 }
 0x141   : > { %v5039_v30 = vpop.f32.mrf.mxu0  ;;  %v5041_v48 = vpop.f32.mrf.mxu1 }
 0x142   : > { %7403 = vst [vmem:[#allocation76_spill] sm:$0xff] %v5039_v30  ;;  %v938_v26 = vpop.f32.mrf.mxu2 }
 0x143   : > { %7404 = vst [vmem:[#allocation77_spill] sm:$0xff] %v5041_v48  ;;  %v5043_v63 = vadd.f32 %v1077_v55, %v938_v26 }
 0x144   : > { %1170 = vmatmul.f32.gmra.mxu0 %v4627_v2  ;;  %1268 = vmatmul.f32.gmra.mxu1 %v4614_v61 }
 0x145   : > { %1466 = vmatmul.f32.gmra.mxu3 %v4616_v62 }
 0x146   : > { %1383 = vmatmul.f32.gmra.mxu2 %v4616_v62 }
 0x148   : > { %v1081_v58 = vpop.f32.mrf.mxu3 }
 0x149   : > { %v5049_v46 = vpop.f32.mrf.mxu0  ;;  %v5051_v32 = vpop.f32.mrf.mxu1 }
 0x14a   : > { %7405 = vst [vmem:[#allocation78_spill] sm:$0xff] %v5049_v46  ;;  %v946_v28 = vpop.f32.mrf.mxu2 }
 0x14b   : > { %7406 = vst [vmem:[#allocation79_spill] sm:$0xff] %v5051_v32  ;;  %v5053_v30 = vadd.f32 %v1081_v58, %v946_v28 }
 0x14c   : > { %1175 = vmatmul.f32.gmra.mxu0 %v4647_v15  ;;  %1274 = vmatmul.f32.gmra.mxu1 %v4635_v10 }
 0x14d   : > { %1470 = vmatmul.f32.gmra.mxu3 %v4637_v11 }
 0x14e   : > { %1387 = vmatmul.f32.gmra.mxu2 %v4637_v11 }
 0x150   : > { %v1085_v26 = vpop.f32.mrf.mxu3 }
 0x151   : > { %v5059_v55 = vpop.f32.mrf.mxu0  ;;  %v5061_v48 = vpop.f32.mrf.mxu1 }
 0x152   : > { %7407 = vst [vmem:[#allocation80_spill] sm:$0xff] %v5059_v55  ;;  %v954_v45 = vpop.f32.mrf.mxu2 }
 0x153   : > { %7408 = vst [vmem:[#allocation81_spill] sm:$0xff] %v5061_v48  ;;  %v5063_v46 = vadd.f32 %v1085_v26, %v954_v45  ;;  %v7411_v45 = vperm.slane %v4973_v14, 2  ;;  %v7412_v26 = vperm.slane %v4973_v14, 3  ;;  %v7413_v48 = vperm.slane %v4973_v14, 7 }
 0x154   : > { %1180 = vmatmul.f32.gmra.mxu0 %v4667_v23  ;;  %1280 = vmatmul.f32.gmra.mxu1 %v4655_v19 }
 0x155   : > { %1474 = vmatmul.f32.gmra.mxu3 %v4657_v20  ;;  %vm175_vm11 = vcmp.eq.s32.totalorder %v4510_v5, %v7411_v45  ;;  %vm187_vm12 = vcmp.eq.s32.totalorder %v4510_v5, %v7412_v26 }
 0x156   : > { %1391 = vmatmul.f32.gmra.mxu2 %v4657_v20 }
 0x158   : > { %v1089_v28 = vpop.f32.mrf.mxu3 }
 0x159   : > { %v5069_v58 = vpop.f32.mrf.mxu0  ;;  %v5071_v32 = vpop.f32.mrf.mxu1 }
 0x15a   : > { %7409 = vst [vmem:[#allocation82_spill] sm:$0xff] %v5069_v58  ;;  %v962_v0 = vpop.f32.mrf.mxu2 }
 0x15b   : > { %7410 = vst [vmem:[#allocation83_spill] sm:$0xff] %v5071_v32  ;;  %v5073_v55 = vadd.f32 %v1089_v28, %v962_v0  ;;  %v199_v0 = vsel %vm187_vm12, %v7413_v48, 0.0  ;;  %v7414_v32 = vperm.slane %v4973_v14, 6  ;;  %v7417_v48 = vand.u32 4294901760, %v5000_v29 }
 0x15c   : > { %1185 = vmatmul.f32.gmra.mxu0 %v4687_v38  ;;  %1286 = vmatmul.f32.gmra.mxu1 %v4675_v34 }
 0x15d   : > { %1478 = vmatmul.f32.gmra.mxu3 %v4677_v35  ;;  %v211_v58 = vsel %vm175_vm11, %v7414_v32, %v199_v0 }
 0x15e   : > { %1395 = vmatmul.f32.gmra.mxu2 %v4677_v35  ;;  %v1530_v59 = vand.u32 4294901760, %v211_v58 }
 0x160   : > { %v1093_v28 = vpop.f32.mrf.mxu3  ;;  %v1682_v45 = vsub.f32 %v211_v58, %v1530_v59  ;;  %1531 = vmatpush.msrb.mxu0 %v1530_v59  ;;  %1870 = vmatpush.msrb.mxu3 %v1530_v59 }
 0x161   : > { %v5089_v49 = vpop.f32.mrf.mxu0  ;;  %v5091_v22 = vpop.f32.mrf.mxu1 }
 0x162   : > { %7415 = vst [vmem:[#allocation84_spill] sm:$0xff] %v5089_v49  ;;  %v970_v37 = vpop.f32.mrf.mxu2  ;;  %1771 = vmatpush.msrb.mxu2 %v1682_v45  ;;  %v1683_v14 = vand.u32 4294901760, %v1682_v45  ;;  %1985 = vmatpush.msra.mxu0 %v7417_v48  ;;  %v7420_v49 = vld [vmem:[#allocation26_spill] sm:$0xff] }
 0x163   : > { %7416 = vst [vmem:[#allocation85_spill] sm:$0xff] %v5091_v22  ;;  %v5093_v35 = vadd.f32 %v1093_v28, %v970_v37 }
 0x164   : > { %1190 = vmatmul.f32.gmra.mxu0 %v4707_v47  ;;  %1292 = vmatmul.f32.gmra.mxu1 %v4695_v42  ;;  %v1684_v26 = vsub.f32 %v1682_v45, %v1683_v14  ;;  %v7421_v47 = vld [vmem:[#allocation25_spill] sm:$0xff] }
 0x165   : > { %1482 = vmatmul.f32.gmra.mxu3 %v4697_v43  ;;  %1989 = vmatpush.msra.mxu0 %v1683_v14 }
 0x166   : > { %1399 = vmatmul.f32.gmra.mxu2 %v4697_v43  ;;  %v1685_v28 = vand.u32 4294901760, %v1684_v26  ;;  %v7424_v26 = vld [vmem:[#allocation29_spill] sm:$0xff] }
 0x168   : > { %v1097_v32 = vpop.f32.mrf.mxu3  ;;  %1686 = vmatpush.msrb.mxu1 %v1685_v28 }
 0x169   : > { %v5101_v37 = vpop.f32.mrf.mxu0  ;;  %v5103_v58 = vpop.f32.mrf.mxu1 }
 0x16a   : > { %7418 = vst [vmem:[#allocation86_spill] sm:$0xff] %v5101_v37  ;;  %v978_v0 = vpop.f32.mrf.mxu2  ;;  %2070 = vmatpush.msra.mxu1 %v4993_v33 }
 0x16b   : > { %7419 = vst [vmem:[#allocation87_spill] sm:$0xff] %v5103_v58  ;;  %v5105_v22 = vadd.f32 %v1097_v32, %v978_v0  ;;  %v7425_v0 = vld [vmem:[#allocation27_spill] sm:$0xff] }
 0x16c   : > { %1195 = vmatmul.f32.gmra.mxu0 %v7420_v49  ;;  %1298 = vmatmul.f32.gmra.mxu1 %v7421_v47 }
 0x16d   : > { %1486 = vmatmul.f32.gmra.mxu3 %v4717_v56  ;;  %2072 = vmatpush.msra.mxu1 %v1530_v59 }
 0x16e   : > { %1403 = vmatmul.f32.gmra.mxu2 %v4717_v56 }
 0x170   : > { %v1101_v29 = vpop.f32.mrf.mxu3 }
 0x171   : > { %v5112_v45 = vpop.f32.mrf.mxu0  ;;  %v5114_v14 = vpop.f32.mrf.mxu1 }
 0x172   : > { %7422 = vst [vmem:[#allocation88_spill] sm:$0xff] %v5112_v45  ;;  %v986_v48 = vpop.f32.mrf.mxu2 }
 0x173   : > { %7423 = vst [vmem:[#allocation89_spill] sm:$0xff] %v5114_v14  ;;  %v5116_v32 = vadd.f32 %v1101_v29, %v986_v48  ;;  %v7429_v14 = vld [vmem:[#allocation33_spill] sm:$0xff]  ;;  %v7430_v29 = vld [vmem:[#allocation31_spill] sm:$0xff] }
 0x174   : > { %1200 = vmatmul.f32.gmra.mxu0 %v7424_v26  ;;  %1304 = vmatmul.f32.gmra.mxu1 %v7425_v0 }
 0x175   : > { %1490 = vmatmul.f32.gmra.mxu3 %v4745_v16 }
 0x176   : > { %1407 = vmatmul.f32.gmra.mxu2 %v4745_v16 }
 0x178   : > { %v1105_v28 = vpop.f32.mrf.mxu3 }
 0x179   : > { %v5122_v58 = vpop.f32.mrf.mxu0  ;;  %v5124_v33 = vpop.f32.mrf.mxu1 }
 0x17a   : > { %7426 = vst [vmem:[#allocation90_spill] sm:$0xff] %v5122_v58  ;;  %v994_v59 = vpop.f32.mrf.mxu2 }
 0x17b   : > { %7427 = vst [vmem:[#allocation91_spill] sm:$0xff] %v5124_v33  ;;  %v5126_v37 = vadd.f32 %v1105_v28, %v994_v59  ;;  %v7434_v33 = vld [vmem:[#allocation37_spill] sm:$0xff]  ;;  %v7435_v28 = vld [vmem:[#allocation35_spill] sm:$0xff] }
 0x17c   : > { %1205 = vmatmul.f32.gmra.mxu0 %v7429_v14  ;;  %1310 = vmatmul.f32.gmra.mxu1 %v7430_v29 }
 0x17d   : > { %7428 = vst [vmem:[#allocation92_spill] sm:$0xff] %v5126_v37  ;;  %1494 = vmatmul.f32.gmra.mxu3 %v4769_v44 }
 0x17e   : > { %1411 = vmatmul.f32.gmra.mxu2 %v4769_v44 }
 0x180   : > { %v1109_v48 = vpop.f32.mrf.mxu3 }
 0x181   : > { %v5132_v45 = vpop.f32.mrf.mxu0  ;;  %v5134_v16 = vpop.f32.mrf.mxu1 }
 0x182   : > { %7431 = vst [vmem:[#allocation93_spill] sm:$0xff] %v5132_v45  ;;  %v1002_v26 = vpop.f32.mrf.mxu2 }
 0x183   : > { %7432 = vst [vmem:[#allocation94_spill] sm:$0xff] %v5134_v16  ;;  %v5136_v58 = vadd.f32 %v1109_v48, %v1002_v26  ;;  %v7439_v16 = vld [vmem:[#allocation41_spill] sm:$0xff]  ;;  %v7440_v26 = vld [vmem:[#allocation39_spill] sm:$0xff] }
 0x184   : > { %1210 = vmatmul.f32.gmra.mxu0 %v7434_v33  ;;  %1316 = vmatmul.f32.gmra.mxu1 %v7435_v28 }
 0x185   : > { %7433 = vst [vmem:[#allocation95_spill] sm:$0xff] %v5136_v58  ;;  %1498 = vmatmul.f32.gmra.mxu3 %v4790_v3 }
 0x186   : > { %1415 = vmatmul.f32.gmra.mxu2 %v4790_v3 }
 0x188   : > { %v1113_v59 = vpop.f32.mrf.mxu3 }
 0x189   : > { %v5142_v14 = vpop.f32.mrf.mxu0  ;;  %v5144_v44 = vpop.f32.mrf.mxu1 }
 0x18a   : > { %7436 = vst [vmem:[#allocation96_spill] sm:$0xff] %v5142_v14  ;;  %v1010_v37 = vpop.f32.mrf.mxu2 }
 0x18b   : > { %7437 = vst [vmem:[#allocation97_spill] sm:$0xff] %v5144_v44  ;;  %v5146_v45 = vadd.f32 %v1113_v59, %v1010_v37  ;;  %v7444_v44 = vld [vmem:[#allocation45_spill] sm:$0xff]  ;;  %v7445_v37 = vld [vmem:[#allocation43_spill] sm:$0xff] }
 0x18c   : > { %1215 = vmatmul.f32.gmra.mxu0 %v7439_v16  ;;  %1322 = vmatmul.f32.gmra.mxu1 %v7440_v26 }
 0x18d   : > { %7438 = vst [vmem:[#allocation98_spill] sm:$0xff] %v5146_v45  ;;  %1502 = vmatmul.f32.gmra.mxu3 %v4810_v25 }
 0x18e   : > { %1419 = vmatmul.f32.gmra.mxu2 %v4810_v25 }
 0x190   : > { %v1117_v48 = vpop.f32.mrf.mxu3 }
 0x191   : > { %v5152_v33 = vpop.f32.mrf.mxu0  ;;  %v5154_v3 = vpop.f32.mrf.mxu1 }
 0x192   : > { %7441 = vst [vmem:[#allocation99_spill] sm:$0xff] %v5152_v33  ;;  %v1018_v58 = vpop.f32.mrf.mxu2 }
 0x193   : > { %7442 = vst [vmem:[#allocation100_spill] sm:$0xff] %v5154_v3  ;;  %v5156_v14 = vadd.f32 %v1117_v48, %v1018_v58  ;;  %v7449_v3 = vld [vmem:[#allocation49_spill] sm:$0xff]  ;;  %v7450_v58 = vld [vmem:[#allocation47_spill] sm:$0xff] }
 0x194   : > { %1220 = vmatmul.f32.gmra.mxu0 %v7444_v44  ;;  %1328 = vmatmul.f32.gmra.mxu1 %v7445_v37 }
 0x195   : > { %7443 = vst [vmem:[#allocation101_spill] sm:$0xff] %v5156_v14  ;;  %1506 = vmatmul.f32.gmra.mxu3 %v4830_v21 }
 0x196   : > { %1423 = vmatmul.f32.gmra.mxu2 %v4830_v21 }
 0x198   : > { %v1121_v59 = vpop.f32.mrf.mxu3 }
 0x199   : > { %v5162_v16 = vpop.f32.mrf.mxu0  ;;  %v5164_v25 = vpop.f32.mrf.mxu1 }
 0x19a   : > { %7446 = vst [vmem:[#allocation102_spill] sm:$0xff] %v5162_v16  ;;  %v1026_v33 = vpop.f32.mrf.mxu2  ;;  %v7453_v16 = vld [vmem:[#allocation51_spill] sm:$0xff] }
 0x19b   : > { %7447 = vst [vmem:[#allocation103_spill] sm:$0xff] %v5164_v25  ;;  %v5166_v45 = vadd.f32 %v1121_v59, %v1026_v33  ;;  %v7454_v25 = vld [vmem:[#allocation9_spill] sm:$0xff]  ;;  %v5179_v33 = vld [vmem:[%s4522_s29 + $0x18] sm:$0xff] }
 0x19c   : > { %1225 = vmatmul.f32.gmra.mxu0 %v7449_v3  ;;  %1334 = vmatmul.f32.gmra.mxu1 %v7450_v58  ;;  %v7227_v59 = vperm.slane %v5179_v33, 2  ;;  %v7230_v3 = vperm.slane %v5179_v33, 3 }
 0x19d   : > { %7448 = vst [vmem:[#allocation104_spill] sm:$0xff] %v5166_v45  ;;  %1510 = vmatmul.f32.gmra.mxu3 %v4850_v39  ;;  %v7228_v45 = vperm.slane %v5179_v33, 6 }
 0x19e   : > { %1427 = vmatmul.f32.gmra.mxu2 %v4850_v39  ;;  %v7229_v39 = vperm.slane %v5179_v33, 7  ;;  %vm180_vm13 = vcmp.eq.s32.totalorder %v4525_v9, %v7227_v59  ;;  %vm192_vm14 = vcmp.eq.s32.totalorder %v4525_v9, %v7230_v3 }
 0x1a0   : > { %v1125_v48 = vpop.f32.mrf.mxu3 }
 0x1a1   : > { %v5172_v44 = vpop.f32.mrf.mxu1  ;;  %v1151_v21 = vpop.f32.mrf.mxu0 }
 0x1a2   : > { %7451 = vst [vmem:[#allocation105_spill] sm:$0xff] %v5172_v44  ;;  %v1034_v14 = vpop.f32.mrf.mxu2 }
 0x1a3   : > { %v5174_v37 = vadd.f32 %v1125_v48, %v1034_v14  ;;  %v1152_v14 = vadd.f32 %v1151_v21, %v5013_v36 }
 0x1a4   : > { %1340 = vmatmul.f32.gmra.mxu1 %v7453_v16  ;;  %1537 = vmatmul.f32.vlgmr.msrb.gmra.mxu0 %v7454_v25 }
 0x1a5   : > { %7452 = vst [vmem:[#allocation106_spill] sm:$0xff] %v5174_v37  ;;  %1874 = vmatmul.f32.vlgmr.msrb.gmra.mxu3 %v4532_v12  ;;  %v204_v12 = vsel %vm192_vm14, %v7229_v39, 0.0 }
 0x1a6   : > { %1774 = vmatmul.f32.vlgmr.msrb.gmra.mxu2 %v4515_v7  ;;  %v216_v16 = vsel %vm180_vm13, %v7228_v45, %v204_v12 }
 0x1a7   : > { %v5198_v44 = vand.u32 4294901760, %v216_v16 }
 0x1a8   : > { %v1451_v48 = vpop.f32.mrf.mxu3 }
 0x1a9   : > { %v1156_v25 = vpop.f32.mrf.mxu0  ;;  %v1251_v37 = vpop.f32.mrf.mxu1  ;;  %v5203_v21 = vsub.f32 %v216_v16, %v5198_v44  ;;  %2153 = vmatpush.msra.mxu2 %v5198_v44 }
 0x1aa   : > { %v1252_v7 = vadd.f32 %v1251_v37, %v1152_v14  ;;  %v1368_v58 = vpop.f32.mrf.mxu2 }
 0x1ab   : > { %v7231_v12 = vand.u32 4294901760, %v5203_v21  ;;  %2392 = vmatpush.msrb.mxu0 %v5203_v21 }
 0x1ac   : > { %v1369_v59 = vadd.f32 %v1368_v58, %v1252_v7  ;;  %1545 = vmatmul.f32.gmra.mxu0 %v4586_v50  ;;  %1688 = vmatmul.f32.vlgmr.msrb.gmra.mxu1 %v4512_v6  ;;  %v1157_v7 = vadd.f32 %v1156_v25, %v5023_v53 }
 0x1ad   : > { %1880 = vmatmul.f32.gmra.mxu3 %v4554_v31  ;;  %2492 = vmatpush.msrb.mxu1 %v5198_v44  ;;  %v2302_v16 = vsub.f32 %v5203_v21, %v7231_v12 }
 0x1ae   : > { %v5207_v36 = vadd.f32 %v1451_v48, %v1369_v59  ;;  %1779 = vmatmul.f32.gmra.mxu2 %v4537_v18 }
 0x1af   : > { %v2303_v48 = vand.u32 4294901760, %v2302_v16 }
 0x1b0   : > { %7455 = vst [vmem:[#allocation107_spill] sm:$0xff] %v5207_v36  ;;  %v1455_v37 = vpop.f32.mrf.mxu3 }
 0x1b1   : > { %v1161_v58 = vpop.f32.mrf.mxu0  ;;  %v1257_v14 = vpop.f32.mrf.mxu1  ;;  %2304 = vmatpush.msra.mxu3 %v2303_v48 }
 0x1b2   : > { %v1258_v45 = vadd.f32 %v1257_v14, %v1157_v7  ;;  %v1372_v59 = vpop.f32.mrf.mxu2  ;;  %v1162_v25 = vadd.f32 %v1161_v58, %v5033_v1 }
 0x1b4   : > { %v1373_v39 = vadd.f32 %v1372_v59, %v1258_v45  ;;  %1553 = vmatmul.f32.gmra.mxu0 %v4611_v60  ;;  %1692 = vmatmul.f32.gmra.mxu1 %v4517_v8 }
 0x1b5   : > { %1886 = vmatmul.f32.gmra.mxu3 %v4589_v51 }
 0x1b6   : > { %v5220_v3 = vadd.f32 %v1455_v37, %v1373_v39  ;;  %1784 = vmatmul.f32.gmra.mxu2 %v4573_v41  ;;  %v7496_v41 = vld [vmem:[#allocation99_spill] sm:$0xff] }
 0x1b8   : > { %7456 = vst [vmem:[#allocation108_spill] sm:$0xff] %v5220_v3  ;;  %v1459_v53 = vpop.f32.mrf.mxu3  ;;  %v7497_v3 = vld [vmem:[#allocation47_spill] sm:$0xff] }
 0x1b9   : > { %v1166_v12 = vpop.f32.mrf.mxu0  ;;  %v1263_v31 = vpop.f32.mrf.mxu1 }
 0x1ba   : > { %v1264_v7 = vadd.f32 %v1263_v31, %v1162_v25  ;;  %v1376_v14 = vpop.f32.mrf.mxu2  ;;  %v1167_v39 = vadd.f32 %v1166_v12, %v5043_v63 }
 0x1bc   : > { %v1377_v16 = vadd.f32 %v1376_v14, %v1264_v7  ;;  %1561 = vmatmul.f32.gmra.mxu0 %v4632_v4  ;;  %1696 = vmatmul.f32.gmra.mxu1 %v4544_v24 }
 0x1bd   : > { %1892 = vmatmul.f32.gmra.mxu3 %v4614_v61 }
 0x1be   : > { %v5227_v45 = vadd.f32 %v1459_v53, %v1377_v16  ;;  %1789 = vmatmul.f32.gmra.mxu2 %v4606_v57  ;;  %v7495_v57 = vld [vmem:[#allocation67_spill] sm:$0xff] }
 0x1bf   : > { %v801_v36 = vadd.f32 %v7496_v41, %v7495_v57 }
 0x1c0   : > { %7457 = vst [vmem:[#allocation109_spill] sm:$0xff] %v5227_v45  ;;  %v1463_v37 = vpop.f32.mrf.mxu3  ;;  %v7502_v45 = vld [vmem:[#allocation104_spill] sm:$0xff] }
 0x1c1   : > { %v1171_v1 = vpop.f32.mrf.mxu0  ;;  %v1269_v58 = vpop.f32.mrf.mxu1 }
 0x1c2   : > { %v1270_v59 = vadd.f32 %v1269_v58, %v1167_v39  ;;  %v1380_v48 = vpop.f32.mrf.mxu2  ;;  %v1172_v53 = vadd.f32 %v1171_v1, %v5053_v30 }
 0x1c4   : > { %v1381_v31 = vadd.f32 %v1380_v48, %v1270_v59  ;;  %1569 = vmatmul.f32.gmra.mxu0 %v4652_v17  ;;  %1700 = vmatmul.f32.gmra.mxu1 %v4591_v52 }
 0x1c5   : > { %1898 = vmatmul.f32.gmra.mxu3 %v4635_v10  ;;  %v7491_v10 = vld [vmem:[#allocation102_spill] sm:$0xff] }
 0x1c6   : > { %v5234_v25 = vadd.f32 %v1463_v37, %v1381_v31  ;;  %1794 = vmatmul.f32.gmra.mxu2 %v4627_v2  ;;  %v7494_v2 = vld [vmem:[#allocation40_spill] sm:$0xff] }
 0x1c8   : > { %7458 = vst [vmem:[#allocation110_spill] sm:$0xff] %v5234_v25  ;;  %v1467_v7 = vpop.f32.mrf.mxu3  ;;  %v7504_v25 = vld [vmem:[#allocation93_spill] sm:$0xff] }
 0x1c9   : > { %v1176_v63 = vpop.f32.mrf.mxu0  ;;  %v1275_v12 = vpop.f32.mrf.mxu1 }
 0x1ca   : > { %v1276_v14 = vadd.f32 %v1275_v12, %v1172_v53  ;;  %v1384_v16 = vpop.f32.mrf.mxu2  ;;  %v1177_v37 = vadd.f32 %v1176_v63, %v5063_v46 }
 0x1cc   : > { %v1385_v39 = vadd.f32 %v1384_v16, %v1276_v14  ;;  %1577 = vmatmul.f32.gmra.mxu0 %v4672_v27  ;;  %1704 = vmatmul.f32.gmra.mxu1 %v4616_v62 }
 0x1cd   : > { %1904 = vmatmul.f32.gmra.mxu3 %v4655_v19 }
 0x1ce   : > { %v5241_v58 = vadd.f32 %v1467_v7, %v1385_v39  ;;  %1799 = vmatmul.f32.gmra.mxu2 %v4647_v15 }
 0x1d0   : > { %7459 = vst [vmem:[#allocation111_spill] sm:$0xff] %v5241_v58  ;;  %v1471_v59 = vpop.f32.mrf.mxu3 }
 0x1d1   : > { %v1181_v30 = vpop.f32.mrf.mxu0  ;;  %v1281_v1 = vpop.f32.mrf.mxu1 }
 0x1d2   : > { %v1282_v48 = vadd.f32 %v1281_v1, %v1177_v37  ;;  %v1388_v31 = vpop.f32.mrf.mxu2  ;;  %v1182_v7 = vadd.f32 %v1181_v30, %v5073_v55 }
 0x1d4   : > { %v1389_v53 = vadd.f32 %v1388_v31, %v1282_v48  ;;  %1585 = vmatmul.f32.gmra.mxu0 %v4692_v40  ;;  %1708 = vmatmul.f32.gmra.mxu1 %v4637_v11 }
 0x1d5   : > { %1910 = vmatmul.f32.gmra.mxu3 %v4675_v34 }
 0x1d6   : > { %v5248_v12 = vadd.f32 %v1471_v59, %v1389_v53  ;;  %1804 = vmatmul.f32.gmra.mxu2 %v4667_v23  ;;  %v7490_v23 = vld [vmem:[#allocation69_spill] sm:$0xff] }
 0x1d7   : > { %v805_v15 = vadd.f32 %v7491_v10, %v7490_v23  ;;  %v7498_v23 = vld [vmem:[#allocation45_spill] sm:$0xff] }
 0x1d8   : > { %7460 = vst [vmem:[#allocation112_spill] sm:$0xff] %v5248_v12  ;;  %v1475_v14 = vpop.f32.mrf.mxu3  ;;  %v7506_v12 = vld [vmem:[#allocation97_spill] sm:$0xff] }
 0x1d9   : > { %v1186_v46 = vpop.f32.mrf.mxu0  ;;  %v1287_v63 = vpop.f32.mrf.mxu1 }
 0x1da   : > { %v1288_v16 = vadd.f32 %v1287_v63, %v1182_v7  ;;  %v1392_v39 = vpop.f32.mrf.mxu2  ;;  %v1187_v59 = vadd.f32 %v1186_v46, %v5093_v35  ;;  %v7462_v63 = vld [vmem:[#allocation21_spill] sm:$0xff]  ;;  %v7466_v46 = vld [vmem:[#allocation24_spill] sm:$0xff] }
 0x1dc   : > { %v1393_v37 = vadd.f32 %v1392_v39, %v1288_v16  ;;  %1593 = vmatmul.f32.gmra.mxu0 %v4712_v54  ;;  %1712 = vmatmul.f32.gmra.mxu1 %v4657_v20  ;;  %v7463_v16 = vperm.slane %v5179_v33, 2  ;;  %v7467_v39 = vperm.slane %v5179_v33, 7 }
 0x1dd   : > { %1916 = vmatmul.f32.gmra.mxu3 %v4695_v42 }
 0x1de   : > { %v5255_v1 = vadd.f32 %v1475_v14, %v1393_v37  ;;  %1809 = vmatmul.f32.gmra.mxu2 %v4687_v38  ;;  %vm176_vm15 = vcmp.eq.s32.totalorder %v4510_v5, %v7463_v16  ;;  %v7464_v14 = vperm.slane %v5179_v33, 3 }
 0x1e0   : > { %7461 = vst [vmem:[#allocation113_spill] sm:$0xff] %v5255_v1  ;;  %v1479_v48 = vpop.f32.mrf.mxu3  ;;  %vm188_vm0 = vcmp.eq.s32.totalorder %v4510_v5, %v7464_v14  ;;  %v7510_v1 = vld [vmem:[#allocation52_spill] sm:$0xff] }
 0x1e1   : > { %v1191_v55 = vpop.f32.mrf.mxu0  ;;  %v1293_v30 = vpop.f32.mrf.mxu1  ;;  %v200_v37 = vsel %vm188_vm0, %v7467_v39, 0.0 }
 0x1e2   : > { %v1294_v31 = vadd.f32 %v1293_v30, %v1187_v59  ;;  %v1396_v53 = vpop.f32.mrf.mxu2  ;;  %v7468_v59 = vperm.slane %v5179_v33, 6 }
 0x1e4   : > { %v1397_v7 = vadd.f32 %v1396_v53, %v1294_v31  ;;  %1601 = vmatmul.f32.gmra.mxu0 %v4740_v13  ;;  %1716 = vmatmul.f32.gmra.mxu1 %v7462_v63  ;;  %v212_v30 = vsel %vm176_vm15, %v7468_v59, %v200_v37  ;;  %v1192_v31 = vadd.f32 %v1191_v55, %v5105_v22 }
 0x1e5   : > { %1922 = vmatmul.f32.gmra.mxu3 %v7421_v47  ;;  %v2154_v16 = vand.u32 4294901760, %v212_v30 }
 0x1e6   : > { %v5268_v35 = vadd.f32 %v1479_v48, %v1397_v7  ;;  %1814 = vmatmul.f32.gmra.mxu2 %v7466_v46  ;;  %v7469_v48 = vand.u32 4294901760, %v5203_v21  ;;  %v7470_v46 = vld [vmem:[#allocation30_spill] sm:$0xff] }
 0x1e7   : > { %2155 = vmatpush.msra.mxu2 %v2154_v16  ;;  %v2306_v14 = vsub.f32 %v212_v30, %v2154_v16  ;;  %2494 = vmatpush.msrb.mxu1 %v2154_v16 }
 0x1e8   : > { %7465 = vst [vmem:[#allocation21_spill] sm:$0xff] %v5268_v35  ;;  %v1483_v53 = vpop.f32.mrf.mxu3  ;;  %v7521_v35 = vld [vmem:[#allocation86_spill] sm:$0xff] }
 0x1e9   : > { %v1196_v42 = vpop.f32.mrf.mxu0  ;;  %v1299_v47 = vpop.f32.mrf.mxu1  ;;  %2609 = vmatpush.msrb.mxu2 %v7469_v48  ;;  %v2307_v33 = vand.u32 4294901760, %v2306_v14  ;;  %2395 = vmatpush.msrb.mxu0 %v2306_v14 }
 0x1ea   : > { %v1300_v34 = vadd.f32 %v1299_v47, %v1192_v31  ;;  %v1400_v38 = vpop.f32.mrf.mxu2  ;;  %v1197_v55 = vadd.f32 %v1196_v42, %v5116_v32  ;;  %v7472_v31 = vld [vmem:[#allocation34_spill] sm:$0xff]  ;;  %v7475_v42 = vld [vmem:[#allocation92_spill] sm:$0xff] }
 0x1eb   : > { %v2308_v47 = vsub.f32 %v2306_v14, %v2307_v33  ;;  %2613 = vmatpush.msrb.mxu2 %v2307_v33  ;;  %v7474_v14 = vld [vmem:[#allocation29_spill] sm:$0xff] }
 0x1ec   : > { %v1401_v7 = vadd.f32 %v1400_v38, %v1300_v34  ;;  %1609 = vmatmul.f32.gmra.mxu0 %v7470_v46  ;;  %1720 = vmatmul.f32.gmra.mxu1 %v4697_v43 }
 0x1ed   : > { %1928 = vmatmul.f32.gmra.mxu3 %v7425_v0  ;;  %v2309_v21 = vand.u32 4294901760, %v2308_v47 }
 0x1ee   : > { %v5281_v22 = vadd.f32 %v1483_v53, %v1401_v7  ;;  %1819 = vmatmul.f32.gmra.mxu2 %v7420_v49  ;;  %v7487_v49 = vld [vmem:[#allocation43_spill] sm:$0xff] }
 0x1ef   : > { %2310 = vmatpush.msra.mxu3 %v2309_v21  ;;  %v7476_v21 = vld [vmem:[#allocation38_spill] sm:$0xff] }
 0x1f0   : > { %7471 = vst [vmem:[#allocation30_spill] sm:$0xff] %v5281_v22  ;;  %v1487_v39 = vpop.f32.mrf.mxu3 }
 0x1f1   : > { %v1201_v37 = vpop.f32.mrf.mxu0  ;;  %v1305_v34 = vpop.f32.mrf.mxu1  ;;  %2694 = vmatpush.msrb.mxu3 %v5198_v44 }
 0x1f2   : > { %v1306_v38 = vadd.f32 %v1305_v34, %v1197_v55  ;;  %v1404_v59 = vpop.f32.mrf.mxu2  ;;  %v1202_v32 = vadd.f32 %v1201_v37, %v7475_v42  ;;  %v7477_v34 = vld [vmem:[#allocation28_spill] sm:$0xff] }
 0x1f3   : > { %2696 = vmatpush.msrb.mxu3 %v2154_v16 }
 0x1f4   : > { %v1405_v30 = vadd.f32 %v1404_v59, %v1306_v38  ;;  %1617 = vmatmul.f32.gmra.mxu0 %v7472_v31  ;;  %1724 = vmatmul.f32.gmra.mxu1 %v4717_v56  ;;  %v7480_v59 = vld [vmem:[#allocation95_spill] sm:$0xff] }
 0x1f5   : > { %1934 = vmatmul.f32.gmra.mxu3 %v7430_v29 }
 0x1f6   : > { %v5289_v53 = vadd.f32 %v1487_v39, %v1405_v30  ;;  %1824 = vmatmul.f32.gmra.mxu2 %v7474_v14  ;;  %v7479_v39 = vld [vmem:[#allocation33_spill] sm:$0xff] }
 0x1f8   : > { %7473 = vst [vmem:[#allocation34_spill] sm:$0xff] %v5289_v53  ;;  %v1491_v48 = vpop.f32.mrf.mxu3 }
 0x1f9   : > { %v1206_v7 = vpop.f32.mrf.mxu0  ;;  %v1311_v33 = vpop.f32.mrf.mxu1 }
 0x1fa   : > { %v1312_v47 = vadd.f32 %v1311_v33, %v1202_v32  ;;  %v1408_v55 = vpop.f32.mrf.mxu2  ;;  %v1207_v16 = vadd.f32 %v1206_v7, %v7480_v59  ;;  %v7481_v33 = vld [vmem:[#allocation42_spill] sm:$0xff] }
 0x1fc   : > { %v1409_v44 = vadd.f32 %v1408_v55, %v1312_v47  ;;  %1625 = vmatmul.f32.gmra.mxu0 %v7476_v21  ;;  %1728 = vmatmul.f32.gmra.mxu1 %v7477_v34  ;;  %v7482_v47 = vld [vmem:[#allocation32_spill] sm:$0xff] }
 0x1fd   : > { %1940 = vmatmul.f32.gmra.mxu3 %v7435_v28 }
 0x1fe   : > { %v5296_v38 = vadd.f32 %v1491_v48, %v1409_v44  ;;  %1829 = vmatmul.f32.gmra.mxu2 %v7479_v39  ;;  %v7483_v48 = vld [vmem:[#allocation37_spill] sm:$0xff]  ;;  %v7484_v44 = vld [vmem:[#allocation98_spill] sm:$0xff] }
 0x200   : > { %7478 = vst [vmem:[#allocation92_spill] sm:$0xff] %v5296_v38  ;;  %v1495_v30 = vpop.f32.mrf.mxu3  ;;  %v7527_v38 = vld [vmem:[#allocation89_spill] sm:$0xff] }
 0x201   : > { %v1211_v37 = vpop.f32.mrf.mxu0  ;;  %v1317_v42 = vpop.f32.mrf.mxu1 }
 0x202   : > { %v1318_v29 = vadd.f32 %v1317_v42, %v1207_v16  ;;  %v1412_v0 = vpop.f32.mrf.mxu2  ;;  %v1212_v28 = vadd.f32 %v1211_v37, %v7484_v44 }
 0x204   : > { %v1413_v32 = vadd.f32 %v1412_v0, %v1318_v29  ;;  %1633 = vmatmul.f32.gmra.mxu0 %v7481_v33  ;;  %1732 = vmatmul.f32.gmra.mxu1 %v7482_v47  ;;  %v7485_v0 = vld [vmem:[#allocation46_spill] sm:$0xff]  ;;  %v7486_v29 = vld [vmem:[#allocation36_spill] sm:$0xff] }
 0x205   : > { %1946 = vmatmul.f32.gmra.mxu3 %v7440_v26 }
 0x206   : > { %v5303_v55 = vadd.f32 %v1495_v30, %v1413_v32  ;;  %1834 = vmatmul.f32.gmra.mxu2 %v7483_v48  ;;  %v7488_v30 = vld [vmem:[#allocation41_spill] sm:$0xff]  ;;  %v4366_v32 = vld [vmem:[%s4522_s29] sm:$0xff] }
 0x207   : > { %v2774_v26 = vperm.slane %v4366_v32, 1  ;;  %v7489_v48 = vld [vmem:[#allocation101_spill] sm:$0xff]  ;;  %v2798_v51 = vperm.slane %v4366_v32, 4 }
 0x208   : > { %v1499_v7 = vpop.f32.mrf.mxu3 }
 0x209   : > { %v1216_v59 = vpop.f32.mrf.mxu0  ;;  %v1323_v39 = vpop.f32.mrf.mxu1  ;;  %vm2782_vm1 = vcmp.eq.s32.totalorder %v4525_v9, %v2774_v26  ;;  %vm2778_vm2 = vcmp.eq.s32.totalorder %v4510_v5, %v2774_v26 }
 0x20a   : > { %v1324_v14 = vadd.f32 %v1323_v39, %v1212_v28  ;;  %v1416_v16 = vpop.f32.mrf.mxu2  ;;  %v1217_v37 = vadd.f32 %v1216_v59, %v7489_v48  ;;  %v7493_v59 = vld [vmem:[#allocation50_spill] sm:$0xff] }
 0x20c   : > { %v1417_v42 = vadd.f32 %v1416_v16, %v1324_v14  ;;  %1641 = vmatmul.f32.gmra.mxu0 %v7485_v0  ;;  %1736 = vmatmul.f32.gmra.mxu1 %v7486_v29  ;;  %v2762_v14 = vperm.slane %v4366_v32, 0  ;;  %v2786_v16 = vperm.slane %v4366_v32, 5 }
 0x20d   : > { %1952 = vmatmul.f32.gmra.mxu3 %v7487_v49 }
 0x20e   : > { %v5310_v19 = vadd.f32 %v1499_v7, %v1417_v42  ;;  %1839 = vmatmul.f32.gmra.mxu2 %v7488_v30  ;;  %vm2770_vm3 = vcmp.eq.s32.totalorder %v4525_v9, %v2762_v14  ;;  %v2794_v7 = vsel %vm2782_vm1, %v2786_v16, 0.0  ;;  %v7492_v42 = vld [vmem:[#allocation105_spill] sm:$0xff]  ;;  %vm2766_vm4 = vcmp.eq.s32.totalorder %v4510_v5, %v2762_v14 }
 0x20f   : > { %v888_v30 = vadd.f32 %v7492_v42, %v805_v15  ;;  %v2790_v26 = vsel %vm2778_vm2, %v2786_v16, 0.0  ;;  %v7500_v15 = vld [vmem:[#allocation96_spill] sm:$0xff] }
 0x210   : > { %v1503_v44 = vpop.f32.mrf.mxu3  ;;  %v5340_v16 = vsel %vm2766_vm4, %v2798_v51, %v2790_v26 }
 0x211   : > { %v1221_v28 = vpop.f32.mrf.mxu0  ;;  %v1329_v39 = vpop.f32.mrf.mxu1 }
 0x212   : > { %v1330_v61 = vadd.f32 %v1329_v39, %v1217_v37  ;;  %v1420_v49 = vpop.f32.mrf.mxu2  ;;  %v5330_v37 = vsel %vm2770_vm3, %v2798_v51, %v2794_v7  ;;  %v7501_v39 = vld [vmem:[#allocation103_spill] sm:$0xff]  ;;  %v1222_v41 = vadd.f32 %v1221_v28, %v7502_v45 }
 0x213   : > { %v884_v42 = vadd.f32 %v7501_v39, %v801_v36  ;;  %v2870_v32 = vmul.f32 %v5330_v37, %v888_v30  ;;  %v7508_v30 = vld [vmem:[#allocation90_spill] sm:$0xff]  ;;  %v7512_v51 = vld [vmem:[#allocation51_spill] sm:$0xff] }
 0x214   : > { %v1421_v48 = vadd.f32 %v1420_v49, %v1330_v61  ;;  %1649 = vmatmul.f32.gmra.mxu0 %v7493_v59  ;;  %1740 = vmatmul.f32.gmra.mxu1 %v7494_v2  ;;  %v7499_v61 = vld [vmem:[#allocation66_spill] sm:$0xff] }
 0x215   : > { %1958 = vmatmul.f32.gmra.mxu3 %v7497_v3  ;;  %v797_v49 = vadd.f32 %v7500_v15, %v7499_v61  ;;  %v7503_v3 = vld [vmem:[#allocation65_spill] sm:$0xff]  ;;  %v2866_v36 = vmul.f32 %v5340_v16, %v884_v42  ;;  %v7507_v15 = vld [vmem:[#allocation64_spill] sm:$0xff]  ;;  %v5346_v45 = vand.u32 4294901760, %v2870_v32  ;;  %v7515_v42 = vld [vmem:[#allocation63_spill] sm:$0xff] }
 0x216   : > { %v5327_v10 = vadd.f32 %v1503_v44, %v1421_v48  ;;  %1844 = vmatmul.f32.gmra.mxu2 %v7498_v23  ;;  %v793_v14 = vadd.f32 %v7504_v25, %v7503_v3  ;;  %v7505_v44 = vld [vmem:[#allocation100_spill] sm:$0xff]  ;;  %v789_v39 = vadd.f32 %v7508_v30, %v7507_v15  ;;  %v7519_v15 = vld [vmem:[#allocation106_spill] sm:$0xff] }
 0x217   : > { %v880_v48 = vadd.f32 %v7505_v44, %v797_v49  ;;  %7509 = vst [vmem:[#allocation38_spill] sm:$0xff] %v5346_v45  ;;  %v7511_v3 = vld [vmem:[#allocation44_spill] sm:$0xff] }
 0x218   : > { %v1507_v57 = vpop.f32.mrf.mxu3  ;;  %v876_v61 = vadd.f32 %v7506_v12, %v793_v14  ;;  %v7514_v12 = vld [vmem:[#allocation49_spill] sm:$0xff] }
 0x219   : > { %v1226_v18 = vpop.f32.mrf.mxu0  ;;  %v1335_v23 = vpop.f32.mrf.mxu1  ;;  %v2862_v25 = vmul.f32 %v5330_v37, %v880_v48 }
 0x21a   : > { %v1336_v7 = vadd.f32 %v1335_v23, %v1222_v41  ;;  %v1424_v58 = vpop.f32.mrf.mxu2  ;;  %v7513_v23 = vld [vmem:[#allocation94_spill] sm:$0xff]  ;;  %v7516_v41 = vld [vmem:[#allocation88_spill] sm:$0xff]  ;;  %v2858_v44 = vmul.f32 %v5340_v16, %v876_v61  ;;  %v1227_v48 = vadd.f32 %v1226_v18, %v7519_v15 }
 0x21b   : > { %v872_v26 = vadd.f32 %v7513_v23, %v789_v39  ;;  %v785_v14 = vadd.f32 %v7516_v41, %v7515_v42  ;;  %v5368_v23 = vand.u32 4294901760, %v2862_v25 }
 0x21c   : > { %v1425_v28 = vadd.f32 %v1424_v58, %v1336_v7  ;;  %1657 = vmatmul.f32.gmra.mxu0 %v7510_v1  ;;  %1744 = vmatmul.f32.gmra.mxu1 %v7511_v3  ;;  %v5359_v58 = vand.u32 4294901760, %v2866_v36  ;;  %v5362_v7 = vsub.f32 %v2870_v32, %v5346_v45  ;;  %v7525_v1 = vld [vmem:[#allocation61_spill] sm:$0xff]  ;;  %v7526_v32 = vld [vmem:[#allocation84_spill] sm:$0xff]  ;;  %v5376_v15 = vand.u32 4294901760, %v2858_v44 }
 0x21d   : > { %1964 = vmatmul.f32.gmra.mxu3 %v7512_v51  ;;  %v7520_v51 = vld [vmem:[#allocation62_spill] sm:$0xff]  ;;  %7523 = vst [vmem:[#allocation42_spill] sm:$0xff] %v5368_v23  ;;  %v2854_v61 = vmul.f32 %v5330_v37, %v872_v26  ;;  %v777_v53 = vadd.f32 %v7526_v32, %v7525_v1  ;;  %v7531_v26 = vld [vmem:[#allocation87_spill] sm:$0xff]  ;;  %v5389_v1 = vsub.f32 %v2862_v25, %v5368_v23  ;;  %v7536_v32 = vld [vmem:[#allocation9_spill] sm:$0xff] }
 0x21e   : > { %v5353_v49 = vadd.f32 %v1507_v57, %v1425_v28  ;;  %1849 = vmatmul.f32.gmra.mxu2 %v7514_v12  ;;  %7517 = vst [vmem:[#allocation28_spill] sm:$0xff] %v5359_v58  ;;  %v781_v39 = vadd.f32 %v7521_v35, %v7520_v51  ;;  %v7522_v57 = vld [vmem:[#allocation91_spill] sm:$0xff]  ;;  %v5379_v35 = vsub.f32 %v2866_v36, %v5359_v58  ;;  %v7534_v36 = vld [vmem:[#allocation82_spill] sm:$0xff] }
 0x21f   : > { %7518 = vst [vmem:[#allocation95_spill] sm:$0xff] %v5362_v7  ;;  %v868_v28 = vadd.f32 %v7522_v57, %v785_v14  ;;  %v7530_v14 = vld [vmem:[#allocation48_spill] sm:$0xff]  ;;  %v7253_v57 = vand.u32 4294901760, %v5362_v7  ;;  %v5403_v25 = vsub.f32 %v2858_v44, %v5376_v15 }
 0x220   : > { %v1511_v30 = vpop.f32.mrf.mxu3  ;;  %v864_v18 = vadd.f32 %v7527_v38, %v781_v39  ;;  %7528 = vst [vmem:[#allocation98_spill] sm:$0xff] %v5376_v15  ;;  %v7533_v38 = vld [vmem:[#allocation60_spill] sm:$0xff] }
 0x221   : > { %v1341_v12 = vpop.f32.mrf.mxu1  ;;  %v5370_v22 = vpop.f32.mrf.mxu0  ;;  %7529 = vst [vmem:[#allocation46_spill] sm:$0xff] %v5379_v35  ;;  %v773_v39 = vadd.f32 %v7534_v36, %v7533_v38  ;;  %v7541_v36 = vld [vmem:[#allocation80_spill] sm:$0xff] }
 0x222   : > { %7524 = vst [vmem:[#allocation32_spill] sm:$0xff] %v5370_v22  ;;  %v1342_v42 = vadd.f32 %v1341_v12, %v1227_v48  ;;  %v1428_v41 = vpop.f32.mrf.mxu2  ;;  %v860_v12 = vadd.f32 %v7531_v26, %v777_v53  ;;  %v2850_v48 = vmul.f32 %v5340_v16, %v868_v28  ;;  %v2846_v53 = vmul.f32 %v5330_v37, %v864_v18  ;;  %v7538_v26 = vld [vmem:[#allocation85_spill] sm:$0xff]  ;;  %v7540_v18 = vld [vmem:[#allocation59_spill] sm:$0xff]  ;;  %v7545_v28 = vld [vmem:[#allocation58_spill] sm:$0xff] }
 0x223   : > { %7532 = vst [vmem:[#allocation36_spill] sm:$0xff] %v5389_v1  ;;  %v856_v38 = vadd.f32 %v7538_v26, %v773_v39  ;;  %v7550_v26 = vand.u32 4294901760, %v5379_v35 }
 0x224   : > { %v1429_v51 = vadd.f32 %v1428_v41, %v1342_v42  ;;  %1748 = vmatmul.f32.gmra.mxu1 %v7530_v14  ;;  %1991 = vmatmul.f32.vlgmr.msra.gmra.mxu0 %v4512_v6  ;;  %v5393_v42 = vand.u32 4294901760, %v2854_v61  ;;  %7537 = vst [vmem:[#allocation69_spill] sm:$0xff] %v5403_v25  ;;  %v2842_v22 = vmul.f32 %v5340_v16, %v860_v12 }
 0x225   : > { %2312 = vmatmul.f32.vlgmr.msra.gmra.mxu3 %v4512_v6  ;;  %2883 = vmatpush.msra.mxu0 %v5346_v45 }
 0x226   : > { %7535 = vst [vmem:[#allocation101_spill] sm:$0xff] %v5393_v42  ;;  %v5395_v41 = vadd.f32 %v1511_v30, %v1429_v51  ;;  %3076 = vmatpush.msra.mxu3 %v5346_v45  ;;  %2161 = vmatmul.f32.vlgmr.msra.gmra.mxu2 %v7536_v32  ;;  %v2925_v51 = vsub.f32 %v5362_v7, %v7253_v57  ;;  %v5416_v45 = vand.u32 4294901760, %v2850_v48  ;;  %v5448_v14 = vand.u32 4294901760, %v2842_v22 }
 0x227   : > { %2885 = vmatpush.msra.mxu0 %v5359_v58  ;;  %3024 = vmatpush.msra.mxu2 %v5362_v7  ;;  %v769_v32 = vadd.f32 %v7541_v36, %v7540_v18  ;;  %v5431_v12 = vsub.f32 %v2854_v61, %v5393_v42  ;;  %v7548_v36 = vld [vmem:[#allocation83_spill] sm:$0xff]  ;;  %v5434_v7 = vand.u32 4294901760, %v2846_v53  ;;  %v2838_v61 = vmul.f32 %v5330_v37, %v856_v38 }
 0x228   : > { %3078 = vmatpush.msra.mxu3 %v5359_v58  ;;  %v5408_v30 = vpop.f32.mrf.mxu3  ;;  %7542 = vst [vmem:[#allocation105_spill] sm:$0xff] %v5416_v45  ;;  %v7556_v38 = vld [vmem:[#allocation79_spill] sm:$0xff] }
 0x229   : > { %7539 = vst [vmem:[#allocation102_spill] sm:$0xff] %v5408_v30  ;;  %2887 = vmatpush.msra.mxu0 %v5368_v23  ;;  %3027 = vmatpush.msra.mxu2 %v5379_v35  ;;  %v5420_v44 = vpop.f32.mrf.mxu0  ;;  %v5422_v39 = vpop.f32.mrf.mxu1  ;;  %v7546_v30 = vld [vmem:[#allocation78_spill] sm:$0xff]  ;;  %v852_v58 = vadd.f32 %v7548_v36, %v769_v32  ;;  %v2926_v32 = vand.u32 4294901760, %v2925_v51  ;;  %v7553_v36 = vld [vmem:[#allocation81_spill] sm:$0xff] }
 0x22a   : > { %7543 = vst [vmem:[#allocation50_spill] sm:$0xff] %v5420_v44  ;;  %v765_v57 = vadd.f32 %v7546_v30, %v7545_v28  ;;  %3080 = vmatpush.msra.mxu3 %v5368_v23  ;;  %v5428_v18 = vpop.f32.mrf.mxu2  ;;  %v2931_v44 = vsub.f32 %v5379_v35, %v7550_v26  ;;  %v7551_v30 = vld [vmem:[#allocation57_spill] sm:$0xff]  ;;  %v7555_v26 = vand.u32 4294901760, %v5389_v1 }
 0x22b   : > { %7544 = vst [vmem:[#allocation67_spill] sm:$0xff] %v5422_v39  ;;  %2889 = vmatpush.msra.mxu0 %v5376_v15  ;;  %3030 = vmatpush.msra.mxu2 %v5389_v1  ;;  %v7552_v39 = vld [vmem:[#allocation76_spill] sm:$0xff]  ;;  %v2834_v51 = vmul.f32 %v5340_v16, %v852_v58  ;;  %v7565_v35 = vld [vmem:[#allocation77_spill] sm:$0xff] }
 0x22c   : > { %7547 = vst [vmem:[#allocation99_spill] sm:$0xff] %v5428_v18  ;;  %v761_v18 = vadd.f32 %v7552_v39, %v7551_v30  ;;  %3082 = vmatpush.msra.mxu3 %v5376_v15  ;;  %1995 = vmatmul.f32.gmra.mxu0 %v4517_v8  ;;  %v848_v23 = vadd.f32 %v7553_v36, %v765_v57  ;;  %v2932_v36 = vand.u32 4294901760, %v2931_v44  ;;  %v7557_v15 = vand.u32 4294901760, %v5403_v25 }
 0x22d   : > { %7549 = vst [vmem:[#allocation66_spill] sm:$0xff] %v5434_v7  ;;  %2074 = vmatmul.f32.vlgmr.msra.gmra.mxu1 %v4512_v6  ;;  %2316 = vmatmul.f32.gmra.mxu3 %v4517_v8  ;;  %v2937_v28 = vsub.f32 %v5389_v1, %v7555_v26  ;;  %v5456_v39 = vsub.f32 %v2850_v48, %v5416_v45 }
 0x22e   : > { %7554 = vst [vmem:[#allocation96_spill] sm:$0xff] %v5448_v14  ;;  %v844_v30 = vadd.f32 %v7556_v38, %v761_v18  ;;  %2891 = vmatpush.msra.mxu0 %v5393_v42  ;;  %2927 = vmatpush.msra.mxu1 %v2926_v32  ;;  %v2943_v26 = vsub.f32 %v5403_v25, %v7557_v15  ;;  %v7558_v18 = vld [vmem:[#allocation56_spill] sm:$0xff]  ;;  %v7559_v38 = vld [vmem:[#allocation74_spill] sm:$0xff]  ;;  %v5472_v32 = vand.u32 4294901760, %v2838_v61 }
 0x22f   : > { %3033 = vmatpush.msra.mxu2 %v5403_v25  ;;  %3084 = vmatpush.msra.mxu3 %v5393_v42  ;;  %v5468_v48 = vsub.f32 %v2846_v53, %v5434_v7  ;;  %v757_v1 = vadd.f32 %v7559_v38, %v7558_v18  ;;  %v2830_v44 = vmul.f32 %v5330_v37, %v848_v23  ;;  %v2938_v15 = vand.u32 4294901760, %v2937_v28  ;;  %v7564_v42 = vld [vmem:[#allocation72_spill] sm:$0xff] }
 0x230   : > { %2169 = vmatmul.f32.gmra.mxu2 %v4586_v50  ;;  %2893 = vmatpush.msra.mxu0 %v5416_v45  ;;  %v5476_v58 = vpop.f32.mrf.mxu3  ;;  %v5485_v18 = vsub.f32 %v2842_v22, %v5448_v14  ;;  %v7563_v50 = vld [vmem:[#allocation55_spill] sm:$0xff]  ;;  %v7567_v28 = vand.u32 4294901760, %v5431_v12  ;;  %v2826_v22 = vmul.f32 %v5340_v16, %v844_v30 }
 0x231   : > { %7560 = vst [vmem:[#allocation103_spill] sm:$0xff] %v5476_v58  ;;  %2933 = vmatpush.msra.mxu1 %v2932_v36  ;;  %3036 = vmatpush.msra.mxu2 %v5431_v12  ;;  %v5480_v57 = vpop.f32.mrf.mxu0  ;;  %v5482_v53 = vpop.f32.mrf.mxu1  ;;  %v753_v25 = vadd.f32 %v7564_v42, %v7563_v50  ;;  %v840_v58 = vadd.f32 %v7565_v35, %v757_v1  ;;  %v2944_v42 = vand.u32 4294901760, %v2943_v26  ;;  %v7568_v1 = vld [vmem:[#allocation54_spill] sm:$0xff]  ;;  %v5511_v30 = vand.u32 4294901760, %v2830_v44  ;;  %v7574_v35 = vld [vmem:[#allocation73_spill] sm:$0xff] }
 0x232   : > { %7561 = vst [vmem:[#allocation104_spill] sm:$0xff] %v5480_v57  ;;  %3086 = vmatpush.msra.mxu3 %v5416_v45  ;;  %2895 = vmatpush.msra.mxu0 %v5434_v7  ;;  %v5493_v23 = vpop.f32.mrf.mxu2  ;;  %v2949_v36 = vsub.f32 %v5431_v12, %v7567_v28  ;;  %v5499_v57 = vand.u32 4294901760, %v2834_v51  ;;  %v7569_v50 = vld [vmem:[#allocation70_spill] sm:$0xff]  ;;  %v5509_v28 = vsub.f32 %v2838_v61, %v5472_v32  ;;  %v7571_v26 = vand.u32 4294901760, %v5456_v39 }
 0x233   : > { %7562 = vst [vmem:[#allocation65_spill] sm:$0xff] %v5482_v53  ;;  %2939 = vmatpush.msra.mxu1 %v2938_v15  ;;  %3039 = vmatpush.msra.mxu2 %v5456_v39  ;;  %v749_v38 = vadd.f32 %v7569_v50, %v7568_v1  ;;  %v7570_v53 = vld [vmem:[#allocation75_spill] sm:$0xff]  ;;  %v7572_v50 = vld [vmem:[#allocation53_spill] sm:$0xff] }
 0x234   : > { %7566 = vst [vmem:[#allocation93_spill] sm:$0xff] %v5493_v23  ;;  %v836_v45 = vadd.f32 %v7570_v53, %v753_v25  ;;  %3088 = vmatpush.msra.mxu3 %v5434_v7  ;;  %2897 = vmatpush.msra.mxu0 %v5448_v14  ;;  %v2955_v15 = vsub.f32 %v5456_v39, %v7571_v26  ;;  %v7573_v25 = vld [vmem:[#allocation68_spill] sm:$0xff]  ;;  %v2950_v61 = vand.u32 4294901760, %v2949_v36  ;;  %v7575_v26 = vand.u32 4294901760, %v5468_v48 }
 0x235   : > { %2945 = vmatpush.msra.mxu1 %v2944_v42  ;;  %3042 = vmatpush.msra.mxu2 %v5468_v48  ;;  %v745_v53 = vadd.f32 %v7573_v25, %v7572_v50  ;;  %v832_v23 = vadd.f32 %v7574_v35, %v749_v38  ;;  %v2822_v7 = vmul.f32 %v5330_v37, %v840_v58  ;;  %v5524_v42 = vand.u32 4294901760, %v2826_v22  ;;  %v7576_v38 = vld [vmem:[#allocation71_spill] sm:$0xff] }
 0x236   : > { %3090 = vmatpush.msra.mxu3 %v5448_v14  ;;  %1999 = vmatmul.f32.gmra.mxu0 %v4544_v24  ;;  %v2961_v1 = vsub.f32 %v5468_v48, %v7575_v26  ;;  %v5532_v50 = vsub.f32 %v2834_v51, %v5499_v57  ;;  %v2818_v35 = vmul.f32 %v5340_v16, %v836_v45  ;;  %v2956_v14 = vand.u32 4294901760, %v2955_v15 }
 0x237   : > { %2078 = vmatmul.f32.gmra.mxu1 %v4517_v8  ;;  %2320 = vmatmul.f32.gmra.mxu3 %v4544_v24  ;;  %v828_v58 = vadd.f32 %v7576_v38, %v745_v53  ;;  %v7580_v53 = vand.u32 4294901760, %v5485_v18  ;;  %v5550_v38 = vsub.f32 %v2830_v44, %v5511_v30 }
 0x238   : > { %2899 = vmatpush.msra.mxu0 %v5472_v32  ;;  %2951 = vmatpush.msra.mxu1 %v2950_v61  ;;  %v5537_v36 = vpop.f32.mrf.mxu3  ;;  %v2814_v61 = vmul.f32 %v5330_v37, %v832_v23  ;;  %v2962_v25 = vand.u32 4294901760, %v2961_v1  ;;  %v7265_v44 = vand.u32 4294901760, %v5532_v50  ;;  %v5565_v37 = vand.u32 4294901760, %v2818_v35 }
 0x239   : > { %7577 = vst [vmem:[#allocation100_spill] sm:$0xff] %v5537_v36  ;;  %3045 = vmatpush.msra.mxu2 %v5485_v18  ;;  %3092 = vmatpush.msra.mxu3 %v5472_v32  ;;  %v5542_v26 = vpop.f32.mrf.mxu0  ;;  %v5544_v51 = vpop.f32.mrf.mxu1  ;;  %v2967_v45 = vsub.f32 %v5485_v18, %v7580_v53  ;;  %v5553_v36 = vand.u32 4294901760, %v2822_v7  ;;  %v2810_v53 = vmul.f32 %v5340_v16, %v828_v58 }
 0x23a   : > { %7578 = vst [vmem:[#allocation97_spill] sm:$0xff] %v5542_v26  ;;  %2177 = vmatmul.f32.gmra.mxu2 %v4611_v60  ;;  %2901 = vmatpush.msra.mxu0 %v5499_v57  ;;  %v5557_v15 = vpop.f32.mrf.mxu2  ;;  %v5561_v26 = vsub.f32 %v2826_v22, %v5524_v42  ;;  %v7582_v60 = vand.u32 4294901760, %v5509_v28  ;;  %v5574_v1 = vand.u32 4294901760, %v2814_v61  ;;  %v2979_v58 = vsub.f32 %v5532_v50, %v7265_v44 }
 0x23b   : > { %7579 = vst [vmem:[#allocation64_spill] sm:$0xff] %v5544_v51  ;;  %2957 = vmatpush.msra.mxu1 %v2956_v14  ;;  %3048 = vmatpush.msra.mxu2 %v5509_v28  ;;  %v2968_v23 = vand.u32 4294901760, %v2967_v45  ;;  %v5579_v16 = vsub.f32 %v2822_v7, %v5553_v36  ;;  %v5586_v45 = vand.u32 4294901760, %v2810_v53  ;;  %v5591_v22 = vsub.f32 %v2818_v35, %v5565_v37 }
 0x23c   : > { %7581 = vst [vmem:[#allocation90_spill] sm:$0xff] %v5557_v15  ;;  %3094 = vmatpush.msra.mxu3 %v5499_v57  ;;  %2903 = vmatpush.msra.mxu0 %v5511_v30  ;;  %v2973_v14 = vsub.f32 %v5509_v28, %v7582_v60  ;;  %v5606_v35 = vsub.f32 %v2814_v61, %v5574_v1  ;;  %v2980_v51 = vand.u32 4294901760, %v2979_v58 }
 0x23d   : > { %2963 = vmatpush.msra.mxu1 %v2962_v25  ;;  %3051 = vmatpush.msra.mxu2 %v5532_v50  ;;  %v5619_v61 = vsub.f32 %v2810_v53, %v5586_v45  ;;  %v7589_v58 = vand.u32 4294901760, %v5579_v16 }
 0x23e   : > { %3096 = vmatpush.msra.mxu3 %v5511_v30  ;;  %2905 = vmatpush.msra.mxu0 %v5524_v42  ;;  %v2974_v60 = vand.u32 4294901760, %v2973_v14 }
 0x23f   : > { %2969 = vmatpush.msra.mxu1 %v2968_v23  ;;  %3054 = vmatpush.msra.mxu2 %v5550_v38  ;;  %v7584_v23 = vand.u32 4294901760, %v5550_v38 }
 0x240   : > { %3098 = vmatpush.msra.mxu3 %v5524_v42  ;;  %2003 = vmatmul.f32.gmra.mxu0 %v4591_v52  ;;  %v5593_v7 = vpop.f32.mrf.mxu3 }
 0x241   : > { %7583 = vst [vmem:[#allocation94_spill] sm:$0xff] %v5593_v7  ;;  %2082 = vmatmul.f32.gmra.mxu1 %v4544_v24  ;;  %2324 = vmatmul.f32.gmra.mxu3 %v4591_v52  ;;  %v2985_v44 = vsub.f32 %v5550_v38, %v7584_v23  ;;  %v5600_v25 = vpop.f32.mrf.mxu0  ;;  %v5602_v15 = vpop.f32.mrf.mxu1  ;;  %v7588_v23 = vand.u32 4294901760, %v5561_v26 }
 0x242   : > { %7585 = vst [vmem:[#allocation63_spill] sm:$0xff] %v5600_v25  ;;  %2907 = vmatpush.msra.mxu0 %v5553_v36  ;;  %2975 = vmatpush.msra.mxu1 %v2974_v60  ;;  %v5608_v14 = vpop.f32.mrf.mxu2  ;;  %v7266_v60 = vand.u32 4294901760, %v5591_v22 }
 0x243   : > { %7586 = vst [vmem:[#allocation88_spill] sm:$0xff] %v5602_v15  ;;  %3057 = vmatpush.msra.mxu2 %v5561_v26  ;;  %3100 = vmatpush.msra.mxu3 %v5553_v36  ;;  %v2991_v25 = vsub.f32 %v5561_v26, %v7588_v23  ;;  %v2986_v7 = vand.u32 4294901760, %v2985_v44  ;;  %v2997_v23 = vsub.f32 %v5579_v16, %v7589_v58  ;;  %v7268_v44 = vand.u32 4294901760, %v5619_v61 }
 0x244   : > { %7587 = vst [vmem:[#allocation106_spill] sm:$0xff] %v5608_v14  ;;  %2185 = vmatmul.f32.gmra.mxu2 %v4632_v4  ;;  %2909 = vmatpush.msra.mxu0 %v5565_v37  ;;  %v7267_v4 = vand.u32 4294901760, %v5606_v35 }
 0x245   : > { %2981 = vmatpush.msra.mxu1 %v2980_v51  ;;  %3060 = vmatpush.msra.mxu2 %v5579_v16  ;;  %v2992_v53 = vand.u32 4294901760, %v2991_v25  ;;  %v3003_v51 = vsub.f32 %v5591_v22, %v7266_v60  ;;  %v2998_v25 = vand.u32 4294901760, %v2997_v23 }
 0x246   : > { %3102 = vmatpush.msra.mxu3 %v5565_v37  ;;  %2911 = vmatpush.msra.mxu0 %v5574_v1  ;;  %v3009_v60 = vsub.f32 %v5606_v35, %v7267_v4 }
 0x247   : > { %2987 = vmatpush.msra.mxu1 %v2986_v7  ;;  %3063 = vmatpush.msra.mxu2 %v5591_v22 }
 0x248   : > { %3104 = vmatpush.msra.mxu3 %v5574_v1  ;;  %2913 = vmatpush.msra.mxu0 %v5586_v45  ;;  %v5636_v14 = vpop.f32.mrf.mxu3  ;;  %v3010_v23 = vand.u32 4294901760, %v3009_v60 }
 0x249   : > { %7590 = vst [vmem:[#allocation62_spill] sm:$0xff] %v5636_v14  ;;  %2993 = vmatpush.msra.mxu1 %v2992_v53  ;;  %3066 = vmatpush.msra.mxu2 %v5606_v35  ;;  %v5639_v58 = vpop.f32.mrf.mxu0  ;;  %v5641_v7 = vpop.f32.mrf.mxu1  ;;  %v3004_v53 = vand.u32 4294901760, %v3003_v51  ;;  %v3015_v14 = vsub.f32 %v5619_v61, %v7268_v44 }
 0x24a   : > { %7591 = vst [vmem:[#allocation86_spill] sm:$0xff] %v5639_v58  ;;  %3106 = vmatpush.msra.mxu3 %v5586_v45  ;;  %2007 = vmatmul.f32.gmra.mxu0 %v4616_v62  ;;  %v5648_v15 = vpop.f32.mrf.mxu2 }
 0x24b   : > { %7592 = vst [vmem:[#allocation91_spill] sm:$0xff] %v5641_v7  ;;  %2086 = vmatmul.f32.gmra.mxu1 %v4591_v52  ;;  %2328 = vmatmul.f32.gmra.mxu3 %v4616_v62  ;;  %v3016_v4 = vand.u32 4294901760, %v3015_v14 }
 0x24c   : > { %7593 = vst [vmem:[#allocation61_spill] sm:$0xff] %v5648_v15  ;;  %2999 = vmatpush.msra.mxu1 %v2998_v25  ;;  %3069 = vmatpush.msra.mxu2 %v5619_v61 }
 0x24d   : > { %2193 = vmatmul.f32.gmra.mxu2 %v4652_v17 }
 0x24e   : > { %3005 = vmatpush.msra.mxu1 %v3004_v53 }
 0x250   : > { %3011 = vmatpush.msra.mxu1 %v3010_v23  ;;  %v5657_v58 = vpop.f32.mrf.mxu3 }
 0x251   : > { %7594 = vst [vmem:[#allocation84_spill] sm:$0xff] %v5657_v58  ;;  %v5659_v15 = vpop.f32.mrf.mxu0  ;;  %v5661_v7 = vpop.f32.mrf.mxu1 }
 0x252   : > { %7595 = vst [vmem:[#allocation89_spill] sm:$0xff] %v5659_v15  ;;  %3017 = vmatpush.msra.mxu1 %v3016_v4  ;;  %2011 = vmatmul.f32.gmra.mxu0 %v4637_v11  ;;  %v5664_v51 = vpop.f32.mrf.mxu2 }
 0x253   : > { %7596 = vst [vmem:[#allocation87_spill] sm:$0xff] %v5661_v7  ;;  %2090 = vmatmul.f32.gmra.mxu1 %v4616_v62  ;;  %2332 = vmatmul.f32.gmra.mxu3 %v4637_v11 }
 0x254   : > { %7597 = vst [vmem:[#allocation60_spill] sm:$0xff] %v5664_v51 }
 0x255   : > { %2201 = vmatmul.f32.gmra.mxu2 %v4672_v27 }
 0x258   : > { %v5669_v17 = vpop.f32.mrf.mxu3 }
 0x259   : > { %7598 = vst [vmem:[#allocation82_spill] sm:$0xff] %v5669_v17  ;;  %v5671_v14 = vpop.f32.mrf.mxu0  ;;  %v5673_v60 = vpop.f32.mrf.mxu1 }
 0x25a   : > { %7599 = vst [vmem:[#allocation9_spill] sm:$0xff] %v5671_v14  ;;  %2015 = vmatmul.f32.gmra.mxu0 %v4657_v20  ;;  %v5676_v25 = vpop.f32.mrf.mxu2 }
 0x25b   : > { %7600 = vst [vmem:[#allocation85_spill] sm:$0xff] %v5673_v60  ;;  %2094 = vmatmul.f32.gmra.mxu1 %v4637_v11  ;;  %2336 = vmatmul.f32.gmra.mxu3 %v4657_v20 }
 0x25c   : > { %7601 = vst [vmem:[#allocation59_spill] sm:$0xff] %v5676_v25 }
 0x25d   : > { %2209 = vmatmul.f32.gmra.mxu2 %v4692_v40 }
 0x260   : > { %v5681_v4 = vpop.f32.mrf.mxu3 }
 0x261   : > { %7602 = vst [vmem:[#allocation80_spill] sm:$0xff] %v5681_v4  ;;  %v5683_v53 = vpop.f32.mrf.mxu0  ;;  %v5685_v27 = vpop.f32.mrf.mxu1 }
 0x262   : > { %7603 = vst [vmem:[#allocation58_spill] sm:$0xff] %v5683_v53  ;;  %2019 = vmatmul.f32.gmra.mxu0 %v7462_v63  ;;  %v5688_v23 = vpop.f32.mrf.mxu2 }
 0x263   : > { %7604 = vst [vmem:[#allocation78_spill] sm:$0xff] %v5685_v27  ;;  %2098 = vmatmul.f32.gmra.mxu1 %v4657_v20  ;;  %2340 = vmatmul.f32.gmra.mxu3 %v7462_v63 }
 0x264   : > { %7605 = vst [vmem:[#allocation83_spill] sm:$0xff] %v5688_v23 }
 0x265   : > { %2217 = vmatmul.f32.gmra.mxu2 %v4712_v54 }
 0x268   : > { %v5693_v44 = vpop.f32.mrf.mxu3 }
 0x269   : > { %7606 = vst [vmem:[#allocation57_spill] sm:$0xff] %v5693_v44  ;;  %v5695_v17 = vpop.f32.mrf.mxu0  ;;  %v5697_v40 = vpop.f32.mrf.mxu1 }
 0x26a   : > { %7607 = vst [vmem:[#allocation76_spill] sm:$0xff] %v5695_v17  ;;  %2023 = vmatmul.f32.gmra.mxu0 %v4697_v43  ;;  %v5700_v4 = vpop.f32.mrf.mxu2 }
 0x26b   : > { %7608 = vst [vmem:[#allocation81_spill] sm:$0xff] %v5697_v40  ;;  %2102 = vmatmul.f32.gmra.mxu1 %v7462_v63  ;;  %2344 = vmatmul.f32.gmra.mxu3 %v4697_v43  ;;  %v7648_v40 = vld [vmem:[#allocation30_spill] sm:$0xff] }
 0x26c   : > { %7609 = vst [vmem:[#allocation79_spill] sm:$0xff] %v5700_v4 }
 0x26d   : > { %2225 = vmatmul.f32.gmra.mxu2 %v4740_v13 }
 0x270   : > { %v5705_v58 = vpop.f32.mrf.mxu3 }
 0x271   : > { %7610 = vst [vmem:[#allocation56_spill] sm:$0xff] %v5705_v58  ;;  %v5707_v23 = vpop.f32.mrf.mxu0  ;;  %v5709_v54 = vpop.f32.mrf.mxu1 }
 0x272   : > { %7611 = vst [vmem:[#allocation74_spill] sm:$0xff] %v5707_v23  ;;  %2027 = vmatmul.f32.gmra.mxu0 %v4717_v56  ;;  %v5712_v44 = vpop.f32.mrf.mxu2 }
 0x273   : > { %7612 = vst [vmem:[#allocation55_spill] sm:$0xff] %v5709_v54  ;;  %2106 = vmatmul.f32.gmra.mxu1 %v4697_v43  ;;  %2348 = vmatmul.f32.gmra.mxu3 %v4717_v56 }
 0x274   : > { %7613 = vst [vmem:[#allocation72_spill] sm:$0xff] %v5712_v44 }
 0x275   : > { %2233 = vmatmul.f32.gmra.mxu2 %v7470_v46 }
 0x278   : > { %v5717_v17 = vpop.f32.mrf.mxu3 }
 0x279   : > { %7614 = vst [vmem:[#allocation77_spill] sm:$0xff] %v5717_v17  ;;  %v5719_v4 = vpop.f32.mrf.mxu0  ;;  %v5721_v13 = vpop.f32.mrf.mxu1 }
 0x27a   : > { %7615 = vst [vmem:[#allocation54_spill] sm:$0xff] %v5719_v4  ;;  %2031 = vmatmul.f32.gmra.mxu0 %v7477_v34  ;;  %v5724_v58 = vpop.f32.mrf.mxu2 }
 0x27b   : > { %7616 = vst [vmem:[#allocation70_spill] sm:$0xff] %v5721_v13  ;;  %2110 = vmatmul.f32.gmra.mxu1 %v4717_v56  ;;  %2352 = vmatmul.f32.gmra.mxu3 %v7477_v34 }
 0x27c   : > { %7617 = vst [vmem:[#allocation75_spill] sm:$0xff] %v5724_v58 }
 0x27d   : > { %2241 = vmatmul.f32.gmra.mxu2 %v7472_v31 }
 0x280   : > { %v5729_v23 = vpop.f32.mrf.mxu3 }
 0x281   : > { %7618 = vst [vmem:[#allocation53_spill] sm:$0xff] %v5729_v23  ;;  %v5731_v46 = vpop.f32.mrf.mxu0  ;;  %v5733_v17 = vpop.f32.mrf.mxu1 }
 0x282   : > { %7619 = vst [vmem:[#allocation68_spill] sm:$0xff] %v5731_v46  ;;  %2035 = vmatmul.f32.gmra.mxu0 %v7482_v47  ;;  %v5736_v13 = vpop.f32.mrf.mxu2 }
 0x283   : > { %7620 = vst [vmem:[#allocation73_spill] sm:$0xff] %v5733_v17  ;;  %2114 = vmatmul.f32.gmra.mxu1 %v7477_v34  ;;  %2356 = vmatmul.f32.gmra.mxu3 %v7482_v47 }
 0x284   : > { %7621 = vst [vmem:[#allocation71_spill] sm:$0xff] %v5736_v13  ;;  %v4367_v13 = vld [vmem:[%s4522_s29 + $0x8] sm:$0xff] }
 0x285   : > { %2249 = vmatmul.f32.gmra.mxu2 %v7476_v21  ;;  %v2775_v46 = vperm.slane %v4367_v13, 1  ;;  %v2763_v21 = vperm.slane %v4367_v13, 0 }
 0x287   : > { %vm2783_vm5 = vcmp.eq.s32.totalorder %v4525_v9, %v2775_v46  ;;  %vm2779_vm6 = vcmp.eq.s32.totalorder %v4510_v5, %v2775_v46  ;;  %vm2771_vm7 = vcmp.eq.s32.totalorder %v4525_v9, %v2763_v21  ;;  %vm2767_vm8 = vcmp.eq.s32.totalorder %v4510_v5, %v2763_v21 }
 0x288   : > { %v5741_v58 = vpop.f32.mrf.mxu3 }
 0x289   : > { %7622 = vst [vmem:[#allocation114_spill] sm:$0xff] %v5741_v58  ;;  %v5743_v31 = vpop.f32.mrf.mxu0  ;;  %v5745_v44 = vpop.f32.mrf.mxu1  ;;  %v2787_v58 = vperm.slane %v4367_v13, 5 }
 0x28a   : > { %7623 = vst [vmem:[#allocation115_spill] sm:$0xff] %v5743_v31  ;;  %2039 = vmatmul.f32.gmra.mxu0 %v7486_v29  ;;  %v5748_v23 = vpop.f32.mrf.mxu2 }
 0x28b   : > { %7624 = vst [vmem:[#allocation116_spill] sm:$0xff] %v5745_v44  ;;  %2118 = vmatmul.f32.gmra.mxu1 %v7482_v47  ;;  %2360 = vmatmul.f32.gmra.mxu3 %v7486_v29 }
 0x28c   : > { %7625 = vst [vmem:[#allocation117_spill] sm:$0xff] %v5748_v23  ;;  %v2795_v23 = vsel %vm2783_vm5, %v2787_v58, 0.0 }
 0x28d   : > { %2257 = vmatmul.f32.gmra.mxu2 %v7481_v33  ;;  %v2799_v33 = vperm.slane %v4367_v13, 4 }
 0x28f   : > { %v5769_v54 = vsel %vm2771_vm7, %v2799_v33, %v2795_v23 }
 0x290   : > { %v5755_v17 = vpop.f32.mrf.mxu3  ;;  %v2871_v46 = vmul.f32 %v5769_v54, %v5395_v41 }
 0x291   : > { %7626 = vst [vmem:[#allocation118_spill] sm:$0xff] %v5755_v17  ;;  %v5757_v4 = vpop.f32.mrf.mxu0  ;;  %v5759_v44 = vpop.f32.mrf.mxu1  ;;  %v2791_v17 = vsel %vm2779_vm6, %v2787_v58, 0.0 }
 0x292   : > { %7627 = vst [vmem:[#allocation119_spill] sm:$0xff] %v5757_v4  ;;  %2043 = vmatmul.f32.gmra.mxu0 %v7494_v2  ;;  %v5764_v31 = vpop.f32.mrf.mxu2  ;;  %v5774_v9 = vsel %vm2767_vm8, %v2799_v33, %v2791_v17  ;;  %v5784_v21 = vand.u32 4294901760, %v2871_v46  ;;  %v2855_v33 = vmul.f32 %v5769_v54, %v5303_v55 }
 0x293   : > { %7628 = vst [vmem:[#allocation120_spill] sm:$0xff] %v5759_v44  ;;  %2122 = vmatmul.f32.gmra.mxu1 %v7486_v29  ;;  %2364 = vmatmul.f32.gmra.mxu3 %v7494_v2  ;;  %v2867_v13 = vmul.f32 %v5774_v9, %v5353_v49  ;;  %v2859_v49 = vmul.f32 %v5774_v9, %v5310_v19 }
 0x294   : > { %7629 = vst [vmem:[#allocation121_spill] sm:$0xff] %v5764_v31  ;;  %v5799_v17 = vsub.f32 %v2871_v46, %v5784_v21  ;;  %v2843_v53 = vmul.f32 %v5774_v9, %v7648_v40  ;;  %v7652_v40 = vld [vmem:[#allocation21_spill] sm:$0xff] }
 0x295   : > { %2265 = vmatmul.f32.gmra.mxu2 %v7485_v0  ;;  %v2863_v0 = vmul.f32 %v5769_v54, %v5327_v10  ;;  %v5795_v41 = vand.u32 4294901760, %v2867_v13  ;;  %v2839_v7 = vmul.f32 %v5769_v54, %v7652_v40 }
 0x296   : > { %7634 = vst [vmem:[#allocation126_spill] sm:$0xff] %v5799_v17 }
 0x297   : > { %v5801_v23 = vand.u32 4294901760, %v2863_v0 }
 0x298   : > { %v5776_v44 = vpop.f32.mrf.mxu3 }
 0x299   : > { %7630 = vst [vmem:[#allocation122_spill] sm:$0xff] %v5776_v44  ;;  %v5780_v31 = vpop.f32.mrf.mxu0  ;;  %v5782_v4 = vpop.f32.mrf.mxu1  ;;  %v5807_v44 = vand.u32 4294901760, %v2859_v49 }
 0x29a   : > { %7631 = vst [vmem:[#allocation123_spill] sm:$0xff] %v5780_v31  ;;  %2047 = vmatmul.f32.gmra.mxu0 %v7511_v3  ;;  %v5787_v58 = vpop.f32.mrf.mxu2  ;;  %v7642_v31 = vld [vmem:[#allocation92_spill] sm:$0xff] }
 0x29b   : > { %7632 = vst [vmem:[#allocation124_spill] sm:$0xff] %v5782_v4  ;;  %2126 = vmatmul.f32.gmra.mxu1 %v7494_v2  ;;  %2368 = vmatmul.f32.gmra.mxu3 %v7511_v3  ;;  %v2851_v55 = vmul.f32 %v5774_v9, %v7642_v31  ;;  %v5832_v51 = vsub.f32 %v2859_v49, %v5807_v44  ;;  %v7647_v31 = vand.u32 4294901760, %v5799_v17 }
 0x29c   : > { %7633 = vst [vmem:[#allocation125_spill] sm:$0xff] %v5787_v58  ;;  %v5810_v58 = vsub.f32 %v2867_v13, %v5795_v41  ;;  %v5827_v13 = vand.u32 4294901760, %v2855_v33 }
 0x29d   : > { %2273 = vmatmul.f32.gmra.mxu2 %v7493_v59  ;;  %7635 = vst [vmem:[#allocation127_spill] sm:$0xff] %v5801_v23  ;;  %v7640_v59 = vld [vmem:[#allocation48_spill] sm:$0xff]  ;;  %v5841_v27 = vand.u32 4294901760, %v2851_v55 }
 0x29e   : > { %7637 = vst [vmem:[#allocation129_spill] sm:$0xff] %v5810_v58  ;;  %v7275_v25 = vand.u32 4294901760, %v5810_v58 }
 0x29f   : > { %v5867_v2 = vsub.f32 %v2851_v55, %v5841_v27 }
 0x2a0   : > { %v5805_v10 = vpop.f32.mrf.mxu3 }
 0x2a1   : > { %7636 = vst [vmem:[#allocation128_spill] sm:$0xff] %v5805_v10  ;;  %v5812_v19 = vpop.f32.mrf.mxu1  ;;  %v5814_v4 = vpop.f32.mrf.mxu0  ;;  %v5823_v10 = vsub.f32 %v2863_v0, %v5801_v23  ;;  %v3260_v0 = vsub.f32 %v5799_v17, %v7647_v31  ;;  %v7653_v17 = vld [vmem:[#allocation5_spill] sm:$0xff]  ;;  %v7658_v31 = vld [vmem:[#allocation95_spill] sm:$0xff] }
 0x2a2   : > { %7638 = vst [vmem:[#allocation130_spill] sm:$0xff] %v5812_v19  ;;  %2051 = vmatmul.f32.gmra.mxu0 %v7640_v59  ;;  %v5817_v46 = vpop.f32.mrf.mxu2  ;;  %v7644_v19 = vld [vmem:[#allocation34_spill] sm:$0xff] }
 0x2a3   : > { %7639 = vst [vmem:[#allocation131_spill] sm:$0xff] %v5814_v4  ;;  %2130 = vmatmul.f32.gmra.mxu1 %v7511_v3  ;;  %2372 = vmatmul.f32.gmra.mxu3 %v7640_v59  ;;  %v2847_v4 = vmul.f32 %v5769_v54, %v7644_v19  ;;  %v5845_v19 = vsub.f32 %v2855_v33, %v5827_v13  ;;  %v3261_v14 = vand.u32 4294901760, %v3260_v0  ;;  %v7667_v0 = vld [vmem:[#allocation36_spill] sm:$0xff] }
 0x2a4   : > { %7641 = vst [vmem:[#allocation132_spill] sm:$0xff] %v5817_v46  ;;  %v7646_v46 = vld [vmem:[#allocation52_spill] sm:$0xff] }
 0x2a5   : > { %7643 = vst [vmem:[#allocation92_spill] sm:$0xff] %v5823_v10  ;;  %2281 = vmatmul.f32.gmra.mxu2 %v7646_v46  ;;  %v5849_v60 = vand.u32 4294901760, %v2847_v4  ;;  %v3266_v46 = vsub.f32 %v5810_v58, %v7275_v25  ;;  %v7657_v25 = vand.u32 4294901760, %v5823_v10 }
 0x2a6   : > { %7645 = vst [vmem:[#allocation34_spill] sm:$0xff] %v5832_v51 }
 0x2a7   : > { %7649 = vst [vmem:[#allocation52_spill] sm:$0xff] %v5845_v19  ;;  %v3272_v40 = vsub.f32 %v5823_v10, %v7657_v25  ;;  %v5880_v55 = vsub.f32 %v2847_v4, %v5849_v60  ;;  %v3267_v58 = vand.u32 4294901760, %v3266_v46  ;;  %v5886_v25 = vand.u32 4294901760, %v2839_v7 }
 0x2a8   : > { %v5847_v49 = vpop.f32.mrf.mxu3  ;;  %7656 = vst [vmem:[#allocation134_spill] sm:$0xff] %v5867_v2  ;;  %v7668_v10 = vand.u32 4294901760, %v7667_v0 }
 0x2a9   : > { %7650 = vst [vmem:[#allocation30_spill] sm:$0xff] %v5847_v49  ;;  %v5854_v15 = vpop.f32.mrf.mxu0  ;;  %v5864_v49 = vand.u32 4294901760, %v2843_v53  ;;  %v5911_v0 = vsub.f32 %v2839_v7, %v5886_v25 }
 0x2aa   : > { %7651 = vst [vmem:[#allocation133_spill] sm:$0xff] %v5854_v15  ;;  %2398 = vmatmul.f32.vlgmr.msrb.gmra.mxu0 %v7653_v17  ;;  %v5860_v33 = vpop.f32.mrf.mxu1  ;;  %v5862_v3 = vpop.f32.mrf.mxu2  ;;  %v7659_v17 = vand.u32 4294901760, %v7658_v31  ;;  %v7663_v31 = vld [vmem:[#allocation46_spill] sm:$0xff] }
 0x2ab   : > { %7654 = vst [vmem:[#allocation21_spill] sm:$0xff] %v5860_v33  ;;  %2134 = vmatmul.f32.gmra.mxu1 %v7640_v59  ;;  %2698 = vmatmul.f32.vlgmr.msrb.gmra.mxu3 %v4512_v6  ;;  %v7660_v33 = vld [vmem:[#allocation113_spill] sm:$0xff]  ;;  %v5894_v4 = vsub.f32 %v2843_v53, %v5864_v49 }
 0x2ac   : > { %7655 = vst [vmem:[#allocation5_spill] sm:$0xff] %v5862_v3  ;;  %3116 = vmatpush.msrb.mxu0 %v7659_v17  ;;  %3262 = vmatpush.msrb.mxu3 %v3261_v14  ;;  %v2835_v15 = vmul.f32 %v5774_v9, %v7660_v33  ;;  %v7662_v3 = vand.u32 4294901760, %v5832_v51  ;;  %v7664_v17 = vand.u32 4294901760, %v7663_v31  ;;  %v7665_v14 = vld [vmem:[#allocation112_spill] sm:$0xff] }
 0x2ad   : > { %7661 = vst [vmem:[#allocation95_spill] sm:$0xff] %v5880_v55  ;;  %2615 = vmatmul.f32.vlgmr.msrb.gmra.mxu2 %v4512_v6  ;;  %v2831_v33 = vmul.f32 %v5769_v54, %v7665_v14  ;;  %v3273_v6 = vand.u32 4294901760, %v3272_v40  ;;  %v7681_v40 = vld [vmem:[#allocation38_spill] sm:$0xff] }
 0x2ae   : > { %v3278_v59 = vsub.f32 %v5832_v51, %v7662_v3  ;;  %3120 = vmatpush.msrb.mxu0 %v7664_v17  ;;  %3218 = vmatpush.msrb.mxu2 %v5784_v21  ;;  %7666 = vst [vmem:[#allocation113_spill] sm:$0xff] %v5894_v4  ;;  %v7669_v3 = vand.u32 4294901760, %v5845_v19  ;;  %v7671_v51 = vld [vmem:[#allocation111_spill] sm:$0xff]  ;;  %v5907_v53 = vand.u32 4294901760, %v2835_v15 }
 0x2af   : > { %3268 = vmatpush.msrb.mxu3 %v3267_v58  ;;  %v2827_v14 = vmul.f32 %v5774_v9, %v7671_v51  ;;  %v7675_v51 = vand.u32 4294901760, %v5867_v2 }
 0x2b0   : > { %3124 = vmatpush.msrb.mxu0 %v7668_v10  ;;  %3220 = vmatpush.msrb.mxu2 %v5795_v41  ;;  %v3284_v31 = vsub.f32 %v5845_v19, %v7669_v3  ;;  %v5903_v17 = vpop.f32.mrf.mxu3  ;;  %v3279_v58 = vand.u32 4294901760, %v3278_v59  ;;  %v7672_v10 = vld [vmem:[#allocation69_spill] sm:$0xff]  ;;  %v5916_v3 = vand.u32 4294901760, %v2831_v33  ;;  %v7674_v19 = vld [vmem:[#allocation8_spill] sm:$0xff] }
 0x2b1   : > { %7670 = vst [vmem:[#allocation46_spill] sm:$0xff] %v5903_v17  ;;  %3274 = vmatpush.msrb.mxu3 %v3273_v6  ;;  %v7673_v46 = vand.u32 4294901760, %v7672_v10  ;;  %v3290_v6 = vsub.f32 %v5867_v2, %v7675_v51  ;;  %v7677_v17 = vld [vmem:[#allocation110_spill] sm:$0xff]  ;;  %v7678_v10 = vld [vmem:[#allocation7_spill] sm:$0xff]  ;;  %v5936_v51 = vsub.f32 %v2835_v15, %v5907_v53  ;;  %v7682_v2 = vand.u32 4294901760, %v5880_v55 }
 0x2b2   : > { %3222 = vmatpush.msrb.mxu2 %v5801_v23  ;;  %2403 = vmatmul.f32.gmra.mxu0 %v7674_v19  ;;  %v5933_v19 = vand.u32 4294901760, %v2827_v14  ;;  %v5949_v15 = vsub.f32 %v2831_v33, %v5916_v3 }
 0x2b3   : > { %3128 = vmatpush.msrb.mxu0 %v7673_v46  ;;  %3280 = vmatpush.msrb.mxu3 %v3279_v58  ;;  %v5922_v59 = vpop.f32.mrf.mxu0  ;;  %v5925_v7 = vpop.f32.mrf.mxu2  ;;  %v2823_v46 = vmul.f32 %v5769_v54, %v7677_v17  ;;  %v3285_v58 = vand.u32 4294901760, %v3284_v31  ;;  %v3296_v17 = vsub.f32 %v5880_v55, %v7682_v2 }
 0x2b4   : > { %7676 = vst [vmem:[#allocation112_spill] sm:$0xff] %v5922_v59  ;;  %2498 = vmatmul.f32.vlgmr.msrb.gmra.mxu1 %v7678_v10  ;;  %2702 = vmatmul.f32.gmra.mxu3 %v4517_v8  ;;  %v5931_v23 = vpop.f32.mrf.mxu1  ;;  %v7680_v59 = vand.u32 4294901760, %v5431_v12  ;;  %v7683_v10 = vld [vmem:[#allocation109_spill] sm:$0xff]  ;;  %v7684_v12 = vand.u32 4294901760, %v5456_v39  ;;  %v5964_v31 = vsub.f32 %v2827_v14, %v5933_v19 }
 0x2b5   : > { %7679 = vst [vmem:[#allocation36_spill] sm:$0xff] %v5931_v23  ;;  %3182 = vmatpush.msrb.mxu1 %v7681_v40  ;;  %3224 = vmatpush.msrb.mxu2 %v5807_v44  ;;  %v2819_v23 = vmul.f32 %v5774_v9, %v7683_v10  ;;  %v3291_v40 = vand.u32 4294901760, %v3290_v6  ;;  %v5957_v55 = vand.u32 4294901760, %v2823_v46  ;;  %v7687_v10 = vld [vmem:[#allocation108_spill] sm:$0xff]  ;;  %v3297_v39 = vand.u32 4294901760, %v3296_v17 }
 0x2b6   : > { %3132 = vmatpush.msrb.mxu0 %v7680_v59  ;;  %3286 = vmatpush.msrb.mxu3 %v3285_v58  ;;  %v7685_v59 = vand.u32 4294901760, %v5894_v4  ;;  %v7686_v58 = vld [vmem:[#allocation28_spill] sm:$0xff]  ;;  %v2815_v33 = vmul.f32 %v5769_v54, %v7687_v10  ;;  %v7293_v6 = vand.u32 4294901760, %v5936_v51  ;;  %v7691_v54 = vld [vmem:[#allocation107_spill] sm:$0xff]  ;;  %v7703_v10 = vld [vmem:[#allocation101_spill] sm:$0xff] }
 0x2b7   : > { %2619 = vmatmul.f32.gmra.mxu2 %v4517_v8  ;;  %3184 = vmatpush.msrb.mxu1 %v7686_v58  ;;  %v7688_v8 = vand.u32 4294901760, %v5468_v48  ;;  %v2811_v14 = vmul.f32 %v5774_v9, %v7691_v54  ;;  %v7693_v48 = vand.u32 4294901760, %v5485_v18  ;;  %v7696_v9 = vld [vmem:[#allocation11_spill] sm:$0xff] }
 0x2b8   : > { %3136 = vmatpush.msrb.mxu0 %v7684_v12  ;;  %v3302_v2 = vsub.f32 %v5894_v4, %v7685_v59  ;;  %3226 = vmatpush.msrb.mxu2 %v5827_v13  ;;  %v7689_v12 = vld [vmem:[#allocation42_spill] sm:$0xff]  ;;  %v7690_v59 = vand.u32 4294901760, %v5911_v0  ;;  %v3314_v18 = vsub.f32 %v5936_v51, %v7293_v6  ;;  %v7702_v6 = vand.u32 4294901760, %v5509_v28 }
 0x2b9   : > { %3292 = vmatpush.msrb.mxu3 %v3291_v40  ;;  %3186 = vmatpush.msrb.mxu1 %v7689_v12  ;;  %v5978_v40 = vand.u32 4294901760, %v2819_v23  ;;  %v7694_v12 = vld [vmem:[#allocation98_spill] sm:$0xff] }
 0x2ba   : > { %3140 = vmatpush.msrb.mxu0 %v7688_v8  ;;  %3228 = vmatpush.msrb.mxu2 %v5841_v27  ;;  %v3308_v58 = vsub.f32 %v5911_v0, %v7690_v59  ;;  %v5974_v4 = vpop.f32.mrf.mxu3  ;;  %v3303_v17 = vand.u32 4294901760, %v3302_v2  ;;  %v5984_v8 = vsub.f32 %v2823_v46, %v5957_v55  ;;  %v5988_v59 = vand.u32 4294901760, %v2815_v33  ;;  %v7698_v46 = vld [vmem:[#allocation10_spill] sm:$0xff] }
 0x2bb   : > { %7692 = vst [vmem:[#allocation111_spill] sm:$0xff] %v5978_v40  ;;  %3298 = vmatpush.msrb.mxu3 %v3297_v39  ;;  %3188 = vmatpush.msrb.mxu1 %v7694_v12  ;;  %v7704_v2 = vand.u32 4294901760, %v5949_v15  ;;  %v3315_v28 = vand.u32 4294901760, %v3314_v18 }
 0x2bc   : > { %3144 = vmatpush.msrb.mxu0 %v7693_v48  ;;  %3230 = vmatpush.msrb.mxu2 %v5849_v60  ;;  %7695 = vst [vmem:[#allocation69_spill] sm:$0xff] %v5988_v59  ;;  %v3309_v48 = vand.u32 4294901760, %v3308_v58  ;;  %v7297_v58 = vand.u32 4294901760, %v5984_v8 }
 0x2bd   : > { %3304 = vmatpush.msrb.mxu3 %v3303_v17  ;;  %2408 = vmatmul.f32.gmra.mxu0 %v7696_v9  ;;  %v5994_v39 = vpop.f32.mrf.mxu0  ;;  %v5997_v54 = vpop.f32.mrf.mxu2  ;;  %v6003_v17 = vand.u32 4294901760, %v2811_v14  ;;  %v6006_v9 = vsub.f32 %v2819_v23, %v5978_v40  ;;  %v7706_v23 = vand.u32 4294901760, %v5532_v50 }
 0x2be   : > { %7697 = vst [vmem:[#allocation8_spill] sm:$0xff] %v5994_v39  ;;  %2504 = vmatmul.f32.gmra.mxu1 %v7698_v46  ;;  %2706 = vmatmul.f32.gmra.mxu3 %v4544_v24  ;;  %v6001_v12 = vpop.f32.mrf.mxu1  ;;  %v3320_v39 = vsub.f32 %v5949_v15, %v7704_v2  ;;  %v6017_v46 = vsub.f32 %v2815_v33, %v5988_v59  ;;  %v7710_v33 = vand.u32 4294901760, %v5550_v38 }
 0x2bf   : > { %7699 = vst [vmem:[#allocation110_spill] sm:$0xff] %v6001_v12  ;;  %3148 = vmatpush.msrb.mxu0 %v7702_v6  ;;  %3190 = vmatpush.msrb.mxu1 %v7703_v10  ;;  %v7707_v6 = vand.u32 4294901760, %v5964_v31  ;;  %v7708_v12 = vld [vmem:[#allocation105_spill] sm:$0xff]  ;;  %v6028_v2 = vsub.f32 %v2811_v14, %v6003_v17  ;;  %v7296_v50 = vand.u32 4294901760, %v6006_v9  ;;  %v3332_v18 = vsub.f32 %v5984_v8, %v7297_v58 }
 0x2c0   : > { %7700 = vst [vmem:[#allocation7_spill] sm:$0xff] %v6003_v17  ;;  %3232 = vmatpush.msrb.mxu2 %v5864_v49  ;;  %3310 = vmatpush.msrb.mxu3 %v3309_v48  ;;  %v7711_v48 = vld [vmem:[#allocation66_spill] sm:$0xff]  ;;  %v7712_v14 = vand.u32 4294901760, %v5561_v26  ;;  %v7295_v38 = vand.u32 4294901760, %v6017_v46  ;;  %v7756_v58 = vld [vmem:[#allocation25_spill] sm:$0xff] }
 0x2c1   : > { %7701 = vst [vmem:[#allocation38_spill] sm:$0xff] %v6006_v9  ;;  %2623 = vmatmul.f32.gmra.mxu2 %v4544_v24  ;;  %3152 = vmatpush.msrb.mxu0 %v7706_v23  ;;  %v3326_v10 = vsub.f32 %v5964_v31, %v7707_v6  ;;  %v3321_v24 = vand.u32 4294901760, %v3320_v39  ;;  %v7713_v39 = vld [vmem:[#allocation96_spill] sm:$0xff]  ;;  %v3338_v6 = vsub.f32 %v6006_v9, %v7296_v50  ;;  %v7755_v50 = vld [vmem:[#allocation26_spill] sm:$0xff] }
 0x2c2   : > { %7705 = vst [vmem:[#allocation109_spill] sm:$0xff] %v6017_v46  ;;  %3192 = vmatpush.msrb.mxu1 %v7708_v12  ;;  %3234 = vmatpush.msrb.mxu2 %v5886_v25 }
 0x2c3   : > { %7709 = vst [vmem:[#allocation28_spill] sm:$0xff] %v6028_v2  ;;  %3316 = vmatpush.msrb.mxu3 %v3315_v28  ;;  %3156 = vmatpush.msrb.mxu0 %v7710_v33  ;;  %v3327_v23 = vand.u32 4294901760, %v3326_v10  ;;  %v7714_v28 = vld [vmem:[#allocation13_spill] sm:$0xff]  ;;  %v7716_v10 = vld [vmem:[#allocation12_spill] sm:$0xff] }
 0x2c4   : > { %3194 = vmatpush.msrb.mxu1 %v7711_v48  ;;  %3236 = vmatpush.msrb.mxu2 %v5907_v53  ;;  %v6038_v12 = vpop.f32.mrf.mxu3  ;;  %v3333_v48 = vand.u32 4294901760, %v3332_v18  ;;  %v3339_v18 = vand.u32 4294901760, %v3338_v6 }
 0x2c5   : > { %3322 = vmatpush.msrb.mxu3 %v3321_v24  ;;  %3160 = vmatpush.msrb.mxu0 %v7712_v14  ;;  %v7294_v24 = vand.u32 4294901760, %v6028_v2 }
 0x2c6   : > { %3196 = vmatpush.msrb.mxu1 %v7713_v39  ;;  %3238 = vmatpush.msrb.mxu2 %v5916_v3  ;;  %v3344_v39 = vsub.f32 %v6017_v46, %v7295_v38  ;;  %v7798_v46 = vld [vmem:[#allocation97_spill] sm:$0xff] }
 0x2c7   : > { %3328 = vmatpush.msrb.mxu3 %v3327_v23  ;;  %2413 = vmatmul.f32.gmra.mxu0 %v7714_v28  ;;  %v6049_v33 = vpop.f32.mrf.mxu0  ;;  %v6052_v26 = vpop.f32.mrf.mxu2  ;;  %v7718_v23 = vand.u32 4294901760, %v5579_v16  ;;  %v7719_v28 = vand.u32 4294901760, %v5591_v22  ;;  %v3350_v16 = vsub.f32 %v6028_v2, %v7294_v24  ;;  %v7722_v22 = vand.u32 4294901760, %v5619_v61  ;;  %v7751_v24 = vld [vmem:[#allocation23_spill] sm:$0xff] }
 0x2c8   : > { %7715 = vst [vmem:[#allocation108_spill] sm:$0xff] %v6049_v33  ;;  %2510 = vmatmul.f32.gmra.mxu1 %v7716_v10  ;;  %2710 = vmatmul.f32.gmra.mxu3 %v4591_v52  ;;  %v6056_v14 = vpop.f32.mrf.mxu1  ;;  %v3345_v10 = vand.u32 4294901760, %v3344_v39  ;;  %v7793_v2 = vld [vmem:[#allocation67_spill] sm:$0xff] }
 0x2c9   : > { %7717 = vst [vmem:[#allocation42_spill] sm:$0xff] %v6056_v14  ;;  %3164 = vmatpush.msrb.mxu0 %v7718_v23  ;;  %3198 = vmatpush.msrb.mxu1 %v5472_v32  ;;  %v7720_v32 = vand.u32 4294901760, %v5606_v35  ;;  %v3351_v6 = vand.u32 4294901760, %v3350_v16  ;;  %v7727_v23 = vld [vmem:[#allocation14_spill] sm:$0xff]  ;;  %v7783_v14 = vld [vmem:[#allocation44_spill] sm:$0xff] }
 0x2ca   : > { %3240 = vmatpush.msrb.mxu2 %v5933_v19  ;;  %3334 = vmatpush.msrb.mxu3 %v3333_v48 }
 0x2cb   : > { %2627 = vmatmul.f32.gmra.mxu2 %v4591_v52  ;;  %3168 = vmatpush.msrb.mxu0 %v7719_v28 }
 0x2cc   : > { %3200 = vmatpush.msrb.mxu1 %v5499_v57  ;;  %3242 = vmatpush.msrb.mxu2 %v5957_v55 }
 0x2cd   : > { %3340 = vmatpush.msrb.mxu3 %v3339_v18  ;;  %3172 = vmatpush.msrb.mxu0 %v7720_v32  ;;  %v7732_v18 = vld [vmem:[#allocation17_spill] sm:$0xff]  ;;  %v7738_v32 = vld [vmem:[#allocation19_spill] sm:$0xff] }
 0x2ce   : > { %3202 = vmatpush.msrb.mxu1 %v5511_v30  ;;  %3244 = vmatpush.msrb.mxu2 %v5978_v40  ;;  %v6077_v52 = vpop.f32.mrf.mxu3  ;;  %v7726_v30 = vld [vmem:[#allocation15_spill] sm:$0xff] }
 0x2cf   : > { %7721 = vst [vmem:[#allocation107_spill] sm:$0xff] %v6077_v52  ;;  %3346 = vmatpush.msrb.mxu3 %v3345_v10  ;;  %3176 = vmatpush.msrb.mxu0 %v7722_v22  ;;  %v6081_v48 = vpop.f32.mrf.mxu0  ;;  %v7739_v10 = vld [vmem:[#allocation18_spill] sm:$0xff] }
 0x2d0   : > { %7723 = vst [vmem:[#allocation98_spill] sm:$0xff] %v6081_v48  ;;  %3204 = vmatpush.msrb.mxu1 %v5524_v42  ;;  %3246 = vmatpush.msrb.mxu2 %v5988_v59  ;;  %v6085_v57 = vpop.f32.mrf.mxu1  ;;  %v6087_v35 = vpop.f32.mrf.mxu2  ;;  %v7785_v48 = vld [vmem:[#allocation49_spill] sm:$0xff] }
 0x2d1   : > { %7724 = vst [vmem:[#allocation11_spill] sm:$0xff] %v6085_v57  ;;  %3352 = vmatpush.msrb.mxu3 %v3351_v6  ;;  %2418 = vmatmul.f32.gmra.mxu0 %v7726_v30  ;;  %v7744_v30 = vld [vmem:[#allocation22_spill] sm:$0xff]  ;;  %v7782_v57 = vld [vmem:[#allocation43_spill] sm:$0xff] }
 0x2d2   : > { %7725 = vst [vmem:[#allocation10_spill] sm:$0xff] %v6087_v35  ;;  %2516 = vmatmul.f32.gmra.mxu1 %v7727_v23  ;;  %2714 = vmatmul.f32.gmra.mxu3 %v4616_v62  ;;  %v7745_v23 = vld [vmem:[#allocation20_spill] sm:$0xff] }
 0x2d3   : > { %3206 = vmatpush.msrb.mxu1 %v5553_v36  ;;  %3248 = vmatpush.msrb.mxu2 %v6003_v17  ;;  %v7733_v36 = vld [vmem:[#allocation16_spill] sm:$0xff] }
 0x2d4   : > { %2631 = vmatmul.f32.gmra.mxu2 %v4616_v62  ;;  %v7792_v17 = vld [vmem:[#allocation32_spill] sm:$0xff] }
 0x2d5   : > { %3208 = vmatpush.msrb.mxu1 %v5565_v37 }
 0x2d6   : > { %v6096_v42 = vpop.f32.mrf.mxu3 }
 0x2d7   : > { %7728 = vst [vmem:[#allocation101_spill] sm:$0xff] %v6096_v42  ;;  %3210 = vmatpush.msrb.mxu1 %v5574_v1  ;;  %v6099_v61 = vpop.f32.mrf.mxu0  ;;  %v7775_v42 = vld [vmem:[#allocation40_spill] sm:$0xff] }
 0x2d8   : > { %7729 = vst [vmem:[#allocation105_spill] sm:$0xff] %v6099_v61  ;;  %v6101_v39 = vpop.f32.mrf.mxu1  ;;  %v6103_v28 = vpop.f32.mrf.mxu2 }
 0x2d9   : > { %7730 = vst [vmem:[#allocation66_spill] sm:$0xff] %v6101_v39  ;;  %3212 = vmatpush.msrb.mxu1 %v5586_v45  ;;  %2423 = vmatmul.f32.gmra.mxu0 %v7732_v18 }
 0x2da   : > { %7731 = vst [vmem:[#allocation96_spill] sm:$0xff] %v6103_v28  ;;  %2522 = vmatmul.f32.gmra.mxu1 %v7733_v36  ;;  %2718 = vmatmul.f32.gmra.mxu3 %v4637_v11 }
 0x2dc   : > { %2635 = vmatmul.f32.gmra.mxu2 %v4637_v11 }
 0x2de   : > { %v6110_v62 = vpop.f32.mrf.mxu3 }
 0x2df   : > { %7734 = vst [vmem:[#allocation13_spill] sm:$0xff] %v6110_v62  ;;  %v6112_v37 = vpop.f32.mrf.mxu0 }
 0x2e0   : > { %7735 = vst [vmem:[#allocation12_spill] sm:$0xff] %v6112_v37  ;;  %v6114_v1 = vpop.f32.mrf.mxu1  ;;  %v6116_v16 = vpop.f32.mrf.mxu2  ;;  %v7797_v37 = vld [vmem:[#allocation64_spill] sm:$0xff] }
 0x2e1   : > { %7736 = vst [vmem:[#allocation15_spill] sm:$0xff] %v6114_v1  ;;  %2428 = vmatmul.f32.gmra.mxu0 %v7738_v32 }
 0x2e2   : > { %7737 = vst [vmem:[#allocation14_spill] sm:$0xff] %v6116_v16  ;;  %2528 = vmatmul.f32.gmra.mxu1 %v7739_v10  ;;  %2722 = vmatmul.f32.gmra.mxu3 %v4657_v20  ;;  %v7750_v10 = vld [vmem:[#allocation24_spill] sm:$0xff] }
 0x2e4   : > { %2639 = vmatmul.f32.gmra.mxu2 %v4657_v20 }
 0x2e6   : > { %v6122_v45 = vpop.f32.mrf.mxu3 }
 0x2e7   : > { %7740 = vst [vmem:[#allocation17_spill] sm:$0xff] %v6122_v45  ;;  %v6124_v22 = vpop.f32.mrf.mxu0  ;;  %v7765_v45 = vld [vmem:[#allocation31_spill] sm:$0xff] }
 0x2e8   : > { %7741 = vst [vmem:[#allocation16_spill] sm:$0xff] %v6124_v22  ;;  %v6126_v11 = vpop.f32.mrf.mxu1  ;;  %v6128_v6 = vpop.f32.mrf.mxu2  ;;  %v7801_v22 = vld [vmem:[#allocation91_spill] sm:$0xff] }
 0x2e9   : > { %7742 = vst [vmem:[#allocation19_spill] sm:$0xff] %v6126_v11  ;;  %2433 = vmatmul.f32.gmra.mxu0 %v7744_v30 }
 0x2ea   : > { %7743 = vst [vmem:[#allocation18_spill] sm:$0xff] %v6128_v6  ;;  %2534 = vmatmul.f32.gmra.mxu1 %v7745_v23  ;;  %2726 = vmatmul.f32.gmra.mxu3 %v7462_v63  ;;  %v7768_v6 = vld [vmem:[#allocation37_spill] sm:$0xff] }
 0x2ec   : > { %2643 = vmatmul.f32.gmra.mxu2 %v7462_v63 }
 0x2ee   : > { %v6134_v18 = vpop.f32.mrf.mxu3 }
 0x2ef   : > { %7746 = vst [vmem:[#allocation22_spill] sm:$0xff] %v6134_v18  ;;  %v6136_v36 = vpop.f32.mrf.mxu0  ;;  %v7760_v18 = vld [vmem:[#allocation29_spill] sm:$0xff] }
 0x2f0   : > { %7747 = vst [vmem:[#allocation20_spill] sm:$0xff] %v6136_v36  ;;  %v6138_v20 = vpop.f32.mrf.mxu1  ;;  %v6140_v32 = vpop.f32.mrf.mxu2  ;;  %v7854_v36 = vld [vmem:[#allocation116_spill] sm:$0xff] }
 0x2f1   : > { %7748 = vst [vmem:[#allocation135_spill] sm:$0xff] %v6138_v20  ;;  %2438 = vmatmul.f32.gmra.mxu0 %v7750_v10  ;;  %v7796_v20 = vld [vmem:[#allocation104_spill] sm:$0xff] }
 0x2f2   : > { %7749 = vst [vmem:[#allocation136_spill] sm:$0xff] %v6140_v32  ;;  %2540 = vmatmul.f32.gmra.mxu1 %v7751_v24  ;;  %2730 = vmatmul.f32.gmra.mxu3 %v4697_v43  ;;  %v7761_v32 = vld [vmem:[#allocation27_spill] sm:$0xff]  ;;  %v1698_v52 = vadd.f32 %v7797_v37, %v7796_v20  ;;  %v7804_v37 = vld [vmem:[#allocation93_spill] sm:$0xff] }
 0x2f4   : > { %2647 = vmatmul.f32.gmra.mxu2 %v4697_v43 }
 0x2f6   : > { %v6146_v30 = vpop.f32.mrf.mxu3 }
 0x2f7   : > { %7752 = vst [vmem:[#allocation24_spill] sm:$0xff] %v6146_v30  ;;  %v6148_v23 = vpop.f32.mrf.mxu0 }
 0x2f8   : > { %v6150_v63 = vpop.f32.mrf.mxu1  ;;  %v6152_v38 = vpop.f32.mrf.mxu2 }
 0x2f9   : > { %7753 = vst [vmem:[#allocation23_spill] sm:$0xff] %v6150_v63  ;;  %2443 = vmatmul.f32.gmra.mxu0 %v7755_v50  ;;  %v7800_v63 = vld [vmem:[#allocation63_spill] sm:$0xff] }
 0x2fa   : > { %7754 = vst [vmem:[#allocation137_spill] sm:$0xff] %v6152_v38  ;;  %2546 = vmatmul.f32.gmra.mxu1 %v7756_v58  ;;  %2734 = vmatmul.f32.gmra.mxu3 %v4717_v56  ;;  %v1706_v40 = vadd.f32 %v7801_v22, %v7800_v63  ;;  %v7808_v22 = vld [vmem:[#allocation87_spill] sm:$0xff] }
 0x2fc   : > { %2651 = vmatmul.f32.gmra.mxu2 %v4717_v56 }
 0x2fe   : > { %v6158_v24 = vpop.f32.mrf.mxu3 }
 0x2ff   : > { %7757 = vst [vmem:[#allocation26_spill] sm:$0xff] %v6158_v24  ;;  %v6160_v10 = vpop.f32.mrf.mxu0  ;;  %v7764_v24 = vld [vmem:[#allocation33_spill] sm:$0xff] }
 0x300   : > { %v6162_v43 = vpop.f32.mrf.mxu1  ;;  %v6164_v30 = vpop.f32.mrf.mxu2 }
 0x301   : > { %7758 = vst [vmem:[#allocation25_spill] sm:$0xff] %v6162_v43  ;;  %2448 = vmatmul.f32.gmra.mxu0 %v7760_v18  ;;  %v7815_v43 = vld [vmem:[#allocation9_spill] sm:$0xff] }
 0x302   : > { %7759 = vst [vmem:[#allocation138_spill] sm:$0xff] %v6164_v30  ;;  %2552 = vmatmul.f32.gmra.mxu1 %v7761_v32  ;;  %2738 = vmatmul.f32.gmra.mxu3 %v7477_v34 }
 0x304   : > { %2655 = vmatmul.f32.gmra.mxu2 %v7477_v34 }
 0x306   : > { %v6170_v58 = vpop.f32.mrf.mxu3 }
 0x307   : > { %7762 = vst [vmem:[#allocation29_spill] sm:$0xff] %v6170_v58  ;;  %v6172_v50 = vpop.f32.mrf.mxu0  ;;  %v2876_v58 = vmul.u32 16, %v4510_v5 }
 0x308   : > { %v6174_v56 = vpop.f32.mrf.mxu1  ;;  %v6176_v38 = vpop.f32.mrf.mxu2 }
 0x309   : > { %7763 = vst [vmem:[#allocation27_spill] sm:$0xff] %v6176_v38  ;;  %2453 = vmatmul.f32.gmra.mxu0 %v7764_v24  ;;  %v7769_v38 = vld [vmem:[#allocation35_spill] sm:$0xff]  ;;  %v2878_v24 = vadd.s32 16, %v2876_v58 }
 0x30a   : > { %2558 = vmatmul.f32.gmra.mxu1 %v7765_v45  ;;  %2742 = vmatmul.f32.gmra.mxu3 %v7482_v47  ;;  %v7770_v45 = vlaneseq }
 0x30c   : > { %2659 = vmatmul.f32.gmra.mxu2 %v7482_v47  ;;  %v2875_v47 = vand.u32 127, %v7770_v45 }
 0x30e   : > { %v6182_v18 = vpop.f32.mrf.mxu3  ;;  %vm2877_vm9 = vcmp.ge.s32.totalorder %v2875_v47, %v2876_v58  ;;  %vm2879_vm10 = vcmp.lt.s32.totalorder %v2875_v47, %v2878_v24  ;;  %v7779_v24 = vld [vmem:[#allocation45_spill] sm:$0xff] }
 0x30f   : > { %7766 = vst [vmem:[#allocation33_spill] sm:$0xff] %v6182_v18  ;;  %v6184_v32 = vpop.f32.mrf.mxu0  ;;  %vm6207_vm11 = vmand %vm2877_vm9, %vm2879_vm10 }
 0x310   : > { %v6186_v34 = vpop.f32.mrf.mxu1  ;;  %v6188_v30 = vpop.f32.mrf.mxu2 }
 0x311   : > { %7767 = vst [vmem:[#allocation31_spill] sm:$0xff] %v6188_v30  ;;  %2458 = vmatmul.f32.gmra.mxu0 %v7768_v6  ;;  %v7773_v6 = vld [vmem:[#allocation41_spill] sm:$0xff] }
 0x312   : > { %2564 = vmatmul.f32.gmra.mxu1 %v7769_v38  ;;  %2746 = vmatmul.f32.gmra.mxu3 %v7486_v29  ;;  %v7774_v38 = vld [vmem:[#allocation39_spill] sm:$0xff] }
 0x314   : > { %2663 = vmatmul.f32.gmra.mxu2 %v7486_v29  ;;  %v7776_v29 = vmov 0 }
 0x315   : > { %v7777_v29 = vsel %vm6207_vm11, 4294967295, %v7776_v29 }
 0x316   : > { %v6196_v18 = vpop.f32.mrf.mxu3  ;;  %7778 = vst [vmem:[#allocation41_spill] sm:$0xff] %v7777_v29 }
 0x317   : > { %7771 = vst [vmem:[#allocation37_spill] sm:$0xff] %v6196_v18  ;;  %v6198_v62 = vpop.f32.mrf.mxu0  ;;  %v4434_v18 = vmov 0.0  }
 0x318   : > { %v6200_v16 = vpop.f32.mrf.mxu1  ;;  %v6202_v30 = vpop.f32.mrf.mxu2  ;;  %v2881_v28 = vsel %vm6207_vm11, 1.0, %v4434_v18 }
 0x319   : > { %7772 = vst [vmem:[#allocation35_spill] sm:$0xff] %v6202_v30  ;;  %2463 = vmatmul.f32.gmra.mxu0 %v7773_v6 }
 0x31a   : > { %2570 = vmatmul.f32.gmra.mxu1 %v7774_v38  ;;  %2750 = vmatmul.f32.gmra.mxu3 %v7775_v42  ;;  %v6221_v38 = vsub.f32 %v2881_v28, %v2881_v28 }
 0x31c   : > { %2667 = vmatmul.f32.gmra.mxu2 %v7775_v42  ;;  %7781 = vst [vmem:[#allocation40_spill] sm:$0xff] %v6221_v38  ;;  %v6227_v42 = vand.u32 4294901760, %v6221_v38 }
 0x31e   : > { %v2369_v45 = vpop.f32.mrf.mxu3  ;;  %7784 = vst [vmem:[#allocation45_spill] sm:$0xff] %v6227_v42  ;;  %v2916_v28 = vsub.f32 %v6221_v38, %v6227_v42 }
 0x31f   : > { %v6214_v30 = vpop.f32.mrf.mxu0 }
 0x320   : > { %v6216_v58 = vpop.f32.mrf.mxu1  ;;  %v2274_v47 = vpop.f32.mrf.mxu2 }
 0x321   : > { %2468 = vmatmul.f32.gmra.mxu0 %v7779_v24  ;;  %v6219_v6 = vadd.f32 %v2369_v45, %v2274_v47  ;;  %v7788_v47 = vld [vmem:[#allocation48_spill] sm:$0xff]  ;;  %v7790_v24 = vld [vmem:[#allocation5_spill] sm:$0xff] }
 0x322   : > { %2576 = vmatmul.f32.gmra.mxu1 %v7782_v57  ;;  %2754 = vmatmul.f32.gmra.mxu3 %v7783_v14  ;;  %v7787_v57 = vld [vmem:[#allocation47_spill] sm:$0xff] }
 0x323   : > { %7780 = vst [vmem:[#allocation39_spill] sm:$0xff] %v6219_v6  ;;  %v7791_v6 = vld [vmem:[#allocation30_spill] sm:$0xff] }
 0x324   : > { %2671 = vmatmul.f32.gmra.mxu2 %v7783_v14  ;;  %v6239_v14 = vand.u32 4294901760, %v2916_v28  ;;  %v2314_v11 = vadd.f32 %v7791_v6, %v7790_v24  ;;  %v7802_v24 = vld [vmem:[#allocation51_spill] sm:$0xff] }
 0x326   : > { %v2373_v18 = vpop.f32.mrf.mxu3  ;;  %7789 = vst [vmem:[#allocation44_spill] sm:$0xff] %v6239_v14 }
 0x327   : > { %v2399_v39 = vpop.f32.mrf.mxu0 }
 0x328   : > { %v6229_v33 = vpop.f32.mrf.mxu1  ;;  %v2282_v1 = vpop.f32.mrf.mxu2 }
 0x329   : > { %2473 = vmatmul.f32.gmra.mxu0 %v7785_v48  ;;  %v6232_v45 = vadd.f32 %v2373_v18, %v2282_v1  ;;  %v1690_v48 = vadd.f32 %v7793_v2, %v7792_v17  ;;  %v7794_v1 = vld [vmem:[#allocation50_spill] sm:$0xff]  ;;  %v7795_v18 = vld [vmem:[#allocation65_spill] sm:$0xff]  ;;  %v7803_v2 = vld [vmem:[#allocation99_spill] sm:$0xff] }
 0x32a   : > { %2582 = vmatmul.f32.gmra.mxu1 %v7787_v57  ;;  %2758 = vmatmul.f32.gmra.mxu3 %v7788_v47  ;;  %v2400_v57 = vadd.f32 %v2399_v39, %v2314_v11  ;;  %v7805_v11 = vld [vmem:[#allocation126_spill] sm:$0xff] }
 0x32b   : > { %7786 = vst [vmem:[#allocation43_spill] sm:$0xff] %v6232_v45  ;;  %v1694_v45 = vadd.f32 %v7795_v18, %v7794_v1  ;;  %v1776_v1 = vadd.f32 %v7803_v2, %v1690_v48  ;;  %v7807_v18 = vld [vmem:[#allocation86_spill] sm:$0xff]  ;;  %v7812_v48 = vld [vmem:[#allocation85_spill] sm:$0xff] }
 0x32c   : > { %2675 = vmatmul.f32.gmra.mxu2 %v7788_v47  ;;  %v7799_v47 = vld [vmem:[#allocation88_spill] sm:$0xff]  ;;  %v1710_v63 = vadd.f32 %v7808_v22, %v7807_v18  ;;  %v7821_v22 = vld [vmem:[#allocation81_spill] sm:$0xff] }
 0x32d   : > { %v1702_v28 = vadd.f32 %v7799_v47, %v7798_v46  ;;  %v1781_v39 = vadd.f32 %v7804_v37, %v1694_v45  ;;  %v7806_v46 = vld [vmem:[#allocation90_spill] sm:$0xff]  ;;  %v7813_v45 = vld [vmem:[#allocation129_spill] sm:$0xff]  ;;  %v7814_v37 = vand.u32 4294901760, %v7805_v11 }
 0x32e   : > { %v2699_v61 = vpop.f32.mrf.mxu3  ;;  %v1786_v20 = vadd.f32 %v7806_v46, %v1698_v52  ;;  %v7816_v52 = vld [vmem:[#allocation78_spill] sm:$0xff] }
 0x32f   : > { %v2404_v35 = vpop.f32.mrf.mxu0  ;;  %v1718_v46 = vadd.f32 %v7816_v52, %v7815_v43  ;;  %v7824_v43 = vld [vmem:[#allocation100_spill] sm:$0xff]  ;;  %v7827_v52 = vld [vmem:[#allocation123_spill] sm:$0xff] }
 0x330   : > { %v2616_v59 = vpop.f32.mrf.mxu2 }
 0x331   : > { %2918 = vmatmul.f32.vlgmr.msra.gmra.mxu0 %v6239_v14  ;;  %v2499_v6 = vpop.f32.mrf.mxu1 }
 0x332   : > { %2588 = vmatmul.f32.gmra.mxu1 %v7802_v24  ;;  %3109 = vmatmul.f32.vlgmr.msra.gmra.mxu3 %v6227_v42  ;;  %v2500_v17 = vadd.f32 %v2499_v6, %v2400_v57  ;;  %v7809_v24 = vld [vmem:[#allocation106_spill] sm:$0xff]  ;;  %v7810_v42 = vld [vmem:[#allocation61_spill] sm:$0xff] }
 0x333   : > { %3359 = vmatpush.msra.mxu0 %v7805_v11  ;;  %3517 = vmatpush.msra.mxu3 %v5784_v21  ;;  %v1791_v14 = vadd.f32 %v7809_v24, %v1702_v28  ;;  %v1796_v57 = vadd.f32 %v7810_v42, %v1706_v40  ;;  %v7811_v6 = vld [vmem:[#allocation89_spill] sm:$0xff]  ;;  %v7819_v28 = vld [vmem:[#allocation103_spill] sm:$0xff]  ;;  %v7820_v42 = vld [vmem:[#allocation58_spill] sm:$0xff]  ;;  %v7823_v11 = vand.u32 4294901760, %v7813_v45 }
 0x334   : > { %3071 = vmatmul.f32.vlgmr.msra.gmra.mxu2 %v6221_v38  ;;  %v2617_v47 = vadd.f32 %v2616_v59, %v2500_v17  ;;  %v1714_v2 = vadd.f32 %v7812_v48, %v7811_v6  ;;  %v7818_v59 = vld [vmem:[#allocation102_spill] sm:$0xff]  ;;  %v6280_v40 = vadd.f32 %v7819_v28, %v1781_v39  ;;  %v1722_v24 = vadd.f32 %v7821_v22, %v7820_v42  ;;  %v7822_v6 = vld [vmem:[#allocation92_spill] sm:$0xff] }
 0x335   : > { %3362 = vmatpush.msra.mxu0 %v7813_v45  ;;  %3451 = vmatpush.msra.mxu2 %v7814_v37  ;;  %v6277_v17 = vadd.f32 %v7818_v59, %v1776_v1  ;;  %v6288_v37 = vadd.f32 %v7824_v43, %v1786_v20  ;;  %v7828_v1 = vld [vmem:[#allocation130_spill] sm:$0xff]  ;;  %v7838_v43 = vld [vmem:[#allocation83_spill] sm:$0xff] }
 0x336   : > { %3519 = vmatpush.msra.mxu3 %v5795_v41  ;;  %v6274_v18 = vadd.f32 %v2699_v61, %v2617_v47  ;;  %v7826_v61 = vld [vmem:[#allocation60_spill] sm:$0xff]  ;;  %v1750_v59 = vadd.f32 %v7828_v1, %v7827_v52  ;;  %v7829_v39 = vld [vmem:[#allocation46_spill] sm:$0xff]  ;;  %v7839_v52 = vld [vmem:[#allocation119_spill] sm:$0xff] }
 0x337   : > { %3365 = vmatpush.msra.mxu0 %v7822_v6  ;;  %3455 = vmatpush.msra.mxu2 %v7823_v11  ;;  %v2703_v48 = vpop.f32.mrf.mxu3  ;;  %7825 = vst [vmem:[#allocation47_spill] sm:$0xff] %v6288_v37  ;;  %v1801_v47 = vadd.f32 %v7826_v61, %v1710_v63  ;;  %v2318_v28 = vadd.f32 %v7829_v39, %v5925_v7  ;;  %v7831_v42 = vld [vmem:[#allocation94_spill] sm:$0xff]  ;;  %v7835_v11 = vld [vmem:[#allocation59_spill] sm:$0xff]  ;;  %v7837_v63 = vand.u32 4294901760, %v7822_v6  ;;  %v7840_v1 = vld [vmem:[#allocation124_spill] sm:$0xff] }
 0x338   : > { %7817 = vst [vmem:[#allocation49_spill] sm:$0xff] %v6274_v18  ;;  %v7830_v18 = vld [vmem:[#allocation127_spill] sm:$0xff]  ;;  %v6297_v22 = vadd.f32 %v7831_v42, %v1791_v14  ;;  %v7833_v38 = vld [vmem:[#allocation62_spill] sm:$0xff]  ;;  %v1806_v9 = vadd.f32 %v7835_v11, %v1714_v2  ;;  %v1811_v61 = vadd.f32 %v7838_v43, %v1718_v46  ;;  %v1746_v7 = vadd.f32 %v7840_v1, %v7839_v52  ;;  %v7842_v11 = vld [vmem:[#allocation76_spill] sm:$0xff] }
 0x339   : > { %3521 = vmatpush.msra.mxu3 %v7830_v18  ;;  %v6300_v45 = vadd.f32 %v7833_v38, %v1796_v57  ;;  %v7836_v20 = vld [vmem:[#allocation34_spill] sm:$0xff]  ;;  %3459 = vmatpush.msra.mxu2 %v7837_v63  ;;  %v2405_v39 = vadd.f32 %v2404_v35, %v2318_v28  ;;  %v7316_v14 = vmov 1.0   ;;  %v7841_v2 = vld [vmem:[#allocation79_spill] sm:$0xff]  ;;  %v7845_v46 = vld [vmem:[#allocation120_spill] sm:$0xff] }
 0x33a   : > { %7832 = vst [vmem:[#allocation48_spill] sm:$0xff] %v6297_v22  ;;  %3368 = vmatpush.msra.mxu0 %v7836_v20  ;;  %4308 = vmatmul.msk.f32.vlgmr.msra.gmra.mxu1 %vm6207_vm11, %v7316_v14  ;;  %v2409_v38 = vpop.f32.mrf.mxu0  ;;  %v2620_v57 = vpop.f32.mrf.mxu2  ;;  %v1816_v42 = vadd.f32 %v7841_v2, %v1722_v24  ;;  %v7843_v6 = vld [vmem:[#allocation55_spill] sm:$0xff]  ;;  %v7846_v22 = vld [vmem:[#allocation52_spill] sm:$0xff]  ;;  %v7849_v29 = vand.u32 4294901760, %v7836_v20  ;;  %v7850_v2 = vld [vmem:[#allocation82_spill] sm:$0xff] }
 0x33b   : > { %7834 = vst [vmem:[#allocation5_spill] sm:$0xff] %v6300_v45  ;;  %3523 = vmatpush.msra.mxu3 %v5807_v44  ;;  %v1726_v63 = vadd.f32 %v7843_v6, %v7842_v11  ;;  %v7844_v45 = vld [vmem:[#allocation115_spill] sm:$0xff]  ;;  %3411 = vmatpush.msra.mxu1 %v5784_v21  ;;  %v2505_v35 = vpop.f32.mrf.mxu1  ;;  %v7847_v28 = vld [vmem:[#allocation84_spill] sm:$0xff]  ;;  %v6328_v11 = vadd.f32 %v7850_v2, %v1806_v9  ;;  %v7852_v6 = vld [vmem:[#allocation73_spill] sm:$0xff] }
 0x33c   : > { %v1742_v43 = vadd.f32 %v7845_v46, %v7844_v45  ;;  %3371 = vmatpush.msra.mxu0 %v7846_v22  ;;  %v6321_v52 = vadd.f32 %v7847_v28, %v1801_v47  ;;  %v7848_v1 = vld [vmem:[#allocation132_spill] sm:$0xff]  ;;  %3463 = vmatpush.msra.mxu2 %v7849_v29  ;;  %v2506_v24 = vadd.f32 %v2505_v35, %v2405_v39  ;;  %v7851_v45 = vld [vmem:[#allocation54_spill] sm:$0xff]  ;;  %v7857_v29 = vld [vmem:[#allocation125_spill] sm:$0xff]  ;;  %v7858_v39 = vand.u32 4294901760, %v7846_v22 }
 0x33d   : > { %v1851_v14 = vadd.f32 %v7848_v1, %v1750_v59  ;;  %3525 = vmatpush.msra.mxu3 %v5827_v13  ;;  %v1734_v46 = vadd.f32 %v7852_v6, %v7851_v45  ;;  %v7853_v21 = vld [vmem:[#allocation68_spill] sm:$0xff]  ;;  %v7855_v47 = vld [vmem:[#allocation134_spill] sm:$0xff]  ;;  %3413 = vmatpush.msra.mxu1 %v5795_v41  ;;  %v1846_v28 = vadd.f32 %v7857_v29, %v1746_v7  ;;  %v7859_v35 = vld [vmem:[#allocation57_spill] sm:$0xff] }
 0x33e   : > { %v1738_v37 = vadd.f32 %v7854_v36, %v7853_v21  ;;  %3374 = vmatpush.msra.mxu0 %v7855_v47  ;;  %v7856_v59 = vld [vmem:[#allocation80_spill] sm:$0xff]  ;;  %3467 = vmatpush.msra.mxu2 %v7858_v39  ;;  %v2621_v9 = vadd.f32 %v2620_v57, %v2506_v24  ;;  %v6344_v1 = vadd.f32 %v7859_v35, %v1816_v42  ;;  %v7861_v45 = vld [vmem:[#allocation121_spill] sm:$0xff]  ;;  %v7863_v7 = vld [vmem:[#allocation74_spill] sm:$0xff]  ;;  %v7866_v57 = vand.u32 4294901760, %v7855_v47 }
 0x33f   : > { %v6337_v20 = vadd.f32 %v7856_v59, %v1811_v61  ;;  %3527 = vmatpush.msra.mxu3 %v5841_v27  ;;  %v7860_v2 = vld [vmem:[#allocation72_spill] sm:$0xff]  ;;  %v1841_v6 = vadd.f32 %v7861_v45, %v1742_v43  ;;  %v4368_v41 = vld [vmem:[%s4522_s29 + $0x10] sm:$0xff]  ;;  %v7862_v61 = vld [vmem:[#allocation95_spill] sm:$0xff]  ;;  %3415 = vmatpush.msra.mxu1 %v7830_v18 }
 0x340   : > { %v6347_v36 = vadd.f32 %v7860_v2, %v1726_v63  ;;  %v2776_v21 = vperm.slane %v4368_v41, 1  ;;  %3377 = vmatpush.msra.mxu0 %v7862_v61  ;;  %v7864_v22 = vld [vmem:[#allocation70_spill] sm:$0xff]  ;;  %v7865_v29 = vld [vmem:[#allocation128_spill] sm:$0xff]  ;;  %3471 = vmatpush.msra.mxu2 %v7866_v57  ;;  %v6359_v42 = vadd.f32 %v2703_v48, %v2621_v9  ;;  %v7867_v63 = vld [vmem:[#allocation71_spill] sm:$0xff]  ;;  %v2764_v2 = vperm.slane %v4368_v41, 0 }
 0x341   : > { %v1730_v59 = vadd.f32 %v7864_v22, %v7863_v7  ;;  %v1966_v39 = vadd.f32 %v7865_v29, %v1851_v14  ;;  %3529 = vmatpush.msra.mxu3 %v5849_v60  ;;  %v1831_v43 = vadd.f32 %v7867_v63, %v1734_v46  ;;  %v7868_v24 = vld [vmem:[#allocation117_spill] sm:$0xff]  ;;  %v7869_v45 = vld [vmem:[#allocation6_spill] sm:$0xff]  ;;  %3417 = vmatpush.msra.mxu1 %v5807_v44  ;;  %v2707_v7 = vpop.f32.mrf.mxu3  ;;  %v2788_v47 = vperm.slane %v4368_v41, 5 }
 0x342   : > { %v1836_v35 = vadd.f32 %v7868_v24, %v1738_v37  ;;  %vm2784_vm12 = vcmp.eq.s32.totalorder %v7869_v45, %v2776_v21  ;;  %v7870_v18 = vld [vmem:[#allocation113_spill] sm:$0xff]  ;;  %v7871_v14 = vld [vmem:[#allocation122_spill] sm:$0xff]  ;;  %v2322_v29 = vadd.f32 %v5974_v4, %v5997_v54  ;;  %v7872_v46 = vand.u32 4294901760, %v7862_v61 }
 0x343   : > { %3380 = vmatpush.msra.mxu0 %v7870_v18  ;;  %v1960_v22 = vadd.f32 %v7871_v14, %v1846_v28  ;;  %v2053_v48 = vadd.f32 %v6214_v30, %v1966_v39  ;;  %3531 = vmatpush.msra.mxu3 %v5864_v49  ;;  %v7873_v37 = vld [vmem:[#allocation118_spill] sm:$0xff]  ;;  %vm6375_vm13 = vcmp.eq.s32.totalorder %v4510_v5, %v2776_v21  ;;  %v2796_v4 = vsel %vm2784_vm12, %v2788_v47, 0.0  ;;  %v7879_v39 = vld [vmem:[#allocation75_spill] sm:$0xff] }
 0x344   : > { %3475 = vmatpush.msra.mxu2 %v7872_v46  ;;  %v1954_v9 = vadd.f32 %v7873_v37, %v1841_v6  ;;  %vm6380_vm14 = vcmp.eq.s32.totalorder %v7869_v45, %v2764_v2  ;;  %3419 = vmatpush.msra.mxu1 %v5827_v13  ;;  %v2410_v28 = vadd.f32 %v2409_v38, %v2322_v29  ;;  %v7878_v6 = vand.u32 4294901760, %v7870_v18  ;;  %v2414_v21 = vpop.f32.mrf.mxu0  ;;  %v2624_v61 = vpop.f32.mrf.mxu2  ;;  %v7880_v24 = vld [vmem:[#allocation114_spill] sm:$0xff] }
 0x345   : > { %3383 = vmatpush.msra.mxu0 %v5911_v0  ;;  %v2049_v54 = vadd.f32 %v6198_v62, %v1960_v22  ;;  %v2136_v30 = vadd.f32 %v6229_v33, %v2053_v48  ;;  %3533 = vmatpush.msra.mxu3 %v5886_v25  ;;  %v1826_v63 = vadd.f32 %v7879_v39, %v1730_v59  ;;  %v2800_v62 = vperm.slane %v4368_v41, 4  ;;  %v2511_v33 = vpop.f32.mrf.mxu1  ;;  %v7884_v22 = vld [vmem:[#allocation53_spill] sm:$0xff] }
 0x346   : > { %3479 = vmatpush.msra.mxu2 %v7878_v6  ;;  %v1948_v14 = vadd.f32 %v7880_v24, %v1836_v35  ;;  %vm6394_vm15 = vcmp.eq.s32.totalorder %v4510_v5, %v2764_v2  ;;  %3421 = vmatpush.msra.mxu1 %v5841_v27  ;;  %v2792_v38 = vsel %vm6375_vm13, %v2788_v47, 0.0  ;;  %v2045_v18 = vadd.f32 %v6184_v32, %v1954_v9  ;;  %v7886_v47 = vld [vmem:[#allocation77_spill] sm:$0xff]  ;;  %v7888_v9 = vld [vmem:[#allocation56_spill] sm:$0xff]  ;;  %v7898_v24 = vld [vmem:[#allocation111_spill] sm:$0xff] }
 0x347   : > { %3386 = vmatpush.msra.mxu0 %v5936_v51  ;;  %v2132_v59 = vadd.f32 %v6216_v58, %v2049_v54  ;;  %v7883_v35 = vand.u32 4294901760, %v5911_v0  ;;  %3535 = vmatpush.msra.mxu3 %v5907_v53  ;;  %v2512_v2 = vadd.f32 %v2511_v33, %v2410_v28  ;;  %v1942_v41 = vadd.f32 %v7884_v22, %v1831_v43  ;;  %v7896_v6 = vld [vmem:[#allocation25_spill] sm:$0xff]  ;;  %v7900_v33 = vld [vmem:[#allocation8_spill] sm:$0xff] }
 0x348   : > { %v6410_v29 = vsel %vm6380_vm14, %v2800_v62, %v2796_v4  ;;  %v2041_v27 = vadd.f32 %v6172_v50, %v1948_v14  ;;  %3423 = vmatpush.msra.mxu1 %v5849_v60  ;;  %v2128_v32 = vadd.f32 %v6200_v16, %v2045_v18  ;;  %v7885_v58 = vand.u32 4294901760, %v5936_v51  ;;  %v7901_v18 = vld [vmem:[#allocation16_spill] sm:$0xff] }
 0x349   : > { %3483 = vmatpush.msra.mxu2 %v7883_v35  ;;  %3389 = vmatpush.msra.mxu0 %v5949_v15  ;;  %v2872_v0 = vmul.f32 %v6410_v29, %v2136_v30  ;;  %v2625_v43 = vadd.f32 %v2624_v61, %v2512_v2  ;;  %v1936_v48 = vadd.f32 %v7886_v47, %v1826_v63  ;;  %v7887_v16 = vand.u32 4294901760, %v5949_v15  ;;  %v7903_v2 = vld [vmem:[#allocation109_spill] sm:$0xff] }
 0x34a   : > { %3537 = vmatpush.msra.mxu3 %v5916_v3  ;;  %v6423_v46 = vsel %vm6394_vm15, %v2800_v62, %v2792_v38  ;;  %v2037_v50 = vadd.f32 %v6160_v10, %v1942_v41  ;;  %3425 = vmatpush.msra.mxu1 %v5864_v49  ;;  %v2124_v60 = vadd.f32 %v6186_v34, %v2041_v27  ;;  %v7889_v10 = vld [vmem:[#allocation131_spill] sm:$0xff]  ;;  %v7899_v62 = vld [vmem:[#allocation48_spill] sm:$0xff] }
 0x34b   : > { %3487 = vmatpush.msra.mxu2 %v7885_v58  ;;  %3392 = vmatpush.msra.mxu0 %v5964_v31  ;;  %v2868_v51 = vmul.f32 %v6423_v46, %v2132_v59  ;;  %v6433_v37 = vadd.f32 %v2707_v7, %v2625_v43  ;;  %v1930_v57 = vadd.f32 %v7888_v9, %v6347_v36  ;;  %v2711_v15 = vpop.f32.mrf.mxu3  ;;  %v6448_v54 = vand.u32 4294901760, %v2872_v0  ;;  %v7902_v59 = vld [vmem:[#allocation23_spill] sm:$0xff]  ;;  %v7906_v58 = vld [vmem:[#allocation10_spill] sm:$0xff] }
 0x34c   : > { %3539 = vmatpush.msra.mxu3 %v5933_v19  ;;  %v6439_v44 = vadd.f32 %v7889_v10, %v6277_v17  ;;  %v2326_v49 = vadd.f32 %v6038_v12, %v6052_v26  ;;  %3427 = vmatpush.msra.mxu1 %v5886_v25  ;;  %v2033_v34 = vadd.f32 %v6148_v23, %v1936_v48  ;;  %v7890_v36 = vand.u32 4294901760, %v5964_v31  ;;  %v7891_v12 = vld [vmem:[#allocation133_spill] sm:$0xff]  ;;  %v7892_v17 = vld [vmem:[#allocation47_spill] sm:$0xff]  ;;  %v7893_v25 = vld [vmem:[#allocation112_spill] sm:$0xff] }
 0x34d   : > { %3491 = vmatpush.msra.mxu2 %v7887_v16  ;;  %3395 = vmatpush.msra.mxu0 %v5984_v8  ;;  %v2120_v7 = vadd.f32 %v6174_v56, %v2037_v50  ;;  %v2864_v4 = vmul.f32 %v6410_v29, %v2128_v32  ;;  %v6455_v26 = vadd.f32 %v7891_v12, %v6280_v40  ;;  %v7894_v23 = vld [vmem:[#allocation20_spill] sm:$0xff]  ;;  %v7895_v56 = vld [vmem:[#allocation38_spill] sm:$0xff]  ;;  %v6466_v39 = vand.u32 4294901760, %v2868_v51  ;;  %v7905_v32 = vld [vmem:[#allocation69_spill] sm:$0xff] }
 0x34e   : > { %3541 = vmatpush.msra.mxu3 %v5957_v55  ;;  %v6459_v30 = vadd.f32 %v7893_v25, %v7892_v17  ;;  %v2029_v28 = vadd.f32 %v7894_v23, %v1930_v57  ;;  %3429 = vmatpush.msra.mxu1 %v5907_v53  ;;  %v2116_v61 = vadd.f32 %v7896_v6, %v2033_v34  ;;  %v7897_v40 = vand.u32 4294901760, %v5984_v8  ;;  %v2419_v14 = vpop.f32.mrf.mxu0  ;;  %v2628_v13 = vpop.f32.mrf.mxu2  ;;  %v7907_v43 = vld [vmem:[#allocation107_spill] sm:$0xff]  ;;  %v7908_v48 = vld [vmem:[#allocation12_spill] sm:$0xff] }
 0x34f   : > { %3495 = vmatpush.msra.mxu2 %v7890_v36  ;;  %3398 = vmatpush.msra.mxu0 %v7895_v56  ;;  %v2860_v31 = vmul.f32 %v6423_v46, %v2124_v60  ;;  %v2415_v63 = vadd.f32 %v2414_v21, %v2326_v49  ;;  %v2005_v38 = vadd.f32 %v7900_v33, %v7899_v62  ;;  %v2517_v21 = vpop.f32.mrf.mxu1  ;;  %v6479_v22 = vand.u32 4294901760, %v2864_v4  ;;  %v7909_v50 = vld [vmem:[#allocation135_spill] sm:$0xff]  ;;  %v7910_v16 = vld [vmem:[#allocation28_spill] sm:$0xff] }
 0x350   : > { %3543 = vmatpush.msra.mxu3 %v7898_v24  ;;  %v2025_v53 = vadd.f32 %v7901_v18, %v6344_v1  ;;  %v2112_v35 = vadd.f32 %v7902_v59, %v2029_v28  ;;  %3431 = vmatpush.msra.mxu1 %v5916_v3  ;;  %v2856_v8 = vmul.f32 %v6410_v29, %v2120_v7  ;;  %v7904_v27 = vand.u32 4294901760, %v7895_v56  ;;  %v7912_v10 = vld [vmem:[#allocation7_spill] sm:$0xff]  ;;  %v7917_v56 = vld [vmem:[#allocation98_spill] sm:$0xff]  ;;  %v7920_v18 = vld [vmem:[#allocation44_spill] sm:$0xff] }
 0x351   : > { %3499 = vmatpush.msra.mxu2 %v7897_v40  ;;  %3401 = vmatpush.msra.mxu0 %v7903_v2  ;;  %v6482_v41 = vsub.f32 %v2872_v0, %v6448_v54  ;;  %v2518_v1 = vadd.f32 %v2517_v21, %v2415_v63  ;;  %v2330_v47 = vadd.f32 %v7907_v43, %v7906_v58  ;;  %v6495_v9 = vand.u32 4294901760, %v2860_v31  ;;  %v7914_v36 = vld [vmem:[#allocation19_spill] sm:$0xff]  ;;  %v7921_v59 = vld [vmem:[#allocation5_spill] sm:$0xff] }
 0x352   : > { %3545 = vmatpush.msra.mxu3 %v7905_v32  ;;  %v2021_v3 = vadd.f32 %v7908_v48, %v6337_v20  ;;  %v2108_v60 = vadd.f32 %v7909_v50, %v2025_v53  ;;  %3433 = vmatpush.msra.mxu1 %v5933_v19  ;;  %v2852_v0 = vmul.f32 %v6423_v46, %v2116_v61  ;;  %v7911_v57 = vand.u32 4294901760, %v7903_v2  ;;  %v7913_v20 = vld [vmem:[#allocation105_spill] sm:$0xff]  ;;  %v7918_v61 = vld [vmem:[#allocation15_spill] sm:$0xff]  ;;  %v7923_v2 = vld [vmem:[#allocation66_spill] sm:$0xff] }
 0x353   : > { %3503 = vmatpush.msra.mxu2 %v7904_v27  ;;  %3404 = vmatpush.msra.mxu0 %v7910_v16  ;;  %v2629_v49 = vadd.f32 %v2628_v13, %v2518_v1  ;;  %v6501_v34 = vsub.f32 %v2868_v51, %v6466_v39  ;;  %v2017_v7 = vadd.f32 %v7913_v20, %v6328_v11  ;;  %v7915_v17 = vmov 1.0  }
 0x354   : > { %3547 = vmatpush.msra.mxu3 %v7912_v10  ;;  %v2104_v12 = vadd.f32 %v7914_v36, %v2021_v3  ;;  %v2848_v19 = vmul.f32 %v6410_v29, %v2112_v35  ;;  %4309 = vmatmul.msk.f32.vlgmr.msrb.gmra.mxu0 %vm6207_vm11, %v7915_v17  ;;  %v6513_v23 = vand.u32 4294901760, %v2856_v8  ;;  %v3594_v51 = vand.u32 4294901760, %v6482_v41  ;;  %v7922_v35 = vld [vmem:[#allocation108_spill] sm:$0xff]  ;;  %v7924_v3 = vld [vmem:[#allocation42_spill] sm:$0xff] }
 0x355   : > { %3507 = vmatpush.msra.mxu2 %v7911_v57  ;;  %4311 = vmatmul.msk.f32.vlgmr.msrb.gmra.mxu3 %vm6207_vm11, %v7915_v17  ;;  %v6518_v11 = vadd.f32 %v2711_v15, %v2629_v49  ;;  %v6521_v28 = vsub.f32 %v2864_v4, %v6479_v22  ;;  %v2013_v6 = vadd.f32 %v7917_v56, %v6321_v52  ;;  %v7919_v13 = vand.u32 4294901760, %v7910_v16  ;;  %v2715_v62 = vpop.f32.mrf.mxu3  ;;  %v7926_v36 = vld [vmem:[#allocation96_spill] sm:$0xff] }
 0x356   : > { %3553 = vmatpush.msrb.mxu0 %v6448_v54  ;;  %3746 = vmatpush.msrb.mxu3 %v6448_v54  ;;  %v2100_v63 = vadd.f32 %v7918_v61, %v2017_v7  ;;  %v2844_v40 = vmul.f32 %v6423_v46, %v2108_v60  ;;  %v6530_v33 = vand.u32 4294901760, %v2852_v0  ;;  %v2420_v15 = vadd.f32 %v2419_v14, %v2330_v47  ;;  %v2424_v4 = vpop.f32.mrf.mxu0  ;;  %v7925_v60 = vld [vmem:[#allocation11_spill] sm:$0xff] }
 0x357   : > { %3435 = vmatpush.msra.mxu1 %v5957_v55  ;;  %3511 = vmatpush.msra.mxu2 %v7919_v13  ;;  %v6535_v52 = vsub.f32 %v2860_v31, %v6495_v9  ;;  %v3600_v53 = vand.u32 4294901760, %v6501_v34  ;;  %v2009_v55 = vadd.f32 %v7922_v35, %v7921_v59  ;;  %v2096_v21 = vadd.f32 %v7923_v2, %v2013_v6  ;;  %v2523_v14 = vpop.f32.mrf.mxu1  ;;  %v2632_v58 = vpop.f32.mrf.mxu2 }
 0x358   : > { %3253 = vmatmul.f32.vlgmr.msrb.gmra.mxu2 %v7920_v18  ;;  %3555 = vmatpush.msrb.mxu0 %v6466_v39  ;;  %v2840_v27 = vmul.f32 %v6410_v29, %v2104_v12  ;;  %v6542_v1 = vand.u32 4294901760, %v2848_v19  ;;  %v2524_v31 = vadd.f32 %v2523_v14, %v2420_v15  ;;  %v3595_v43 = vsub.f32 %v6482_v41, %v3594_v51  ;;  %v7927_v12 = vld [vmem:[#allocation101_spill] sm:$0xff]  ;;  %v7928_v15 = vld [vmem:[#allocation110_spill] sm:$0xff] }
 0x359   : > { %3694 = vmatpush.msrb.mxu2 %v6482_v41  ;;  %3748 = vmatpush.msrb.mxu3 %v6466_v39  ;;  %v6552_v47 = vsub.f32 %v2856_v8, %v6513_v23  ;;  %v3606_v48 = vand.u32 4294901760, %v6521_v28  ;;  %v2088_v50 = vadd.f32 %v7924_v3, %v2005_v38  ;;  %v2092_v16 = vadd.f32 %v7925_v60, %v2009_v55 }
 0x35a   : > { %3437 = vmatpush.msra.mxu1 %v7898_v24  ;;  %3557 = vmatpush.msrb.mxu0 %v6479_v22  ;;  %v2836_v57 = vmul.f32 %v6423_v46, %v2100_v63  ;;  %v6558_v49 = vand.u32 4294901760, %v2844_v40  ;;  %v2633_v24 = vadd.f32 %v2632_v58, %v2524_v31  ;;  %v3601_v8 = vsub.f32 %v6501_v34, %v3600_v53  ;;  %v7929_v58 = vld [vmem:[#allocation36_spill] sm:$0xff] }
 0x35b   : > { %3697 = vmatpush.msrb.mxu2 %v6501_v34  ;;  %3750 = vmatpush.msrb.mxu3 %v6479_v22  ;;  %v6568_v38 = vsub.f32 %v2852_v0, %v6530_v33  ;;  %v3612_v20 = vand.u32 4294901760, %v6535_v52  ;;  %v2832_v7 = vmul.f32 %v6410_v29, %v2096_v21  ;;  %v2334_v56 = vadd.f32 %v7927_v12, %v7926_v36 }
 0x35c   : > { %3439 = vmatpush.msra.mxu1 %v7905_v32  ;;  %3559 = vmatpush.msrb.mxu0 %v6495_v9  ;;  %v6574_v6 = vand.u32 4294901760, %v2840_v27  ;;  %v6579_v32 = vsub.f32 %v2848_v19, %v6542_v1  ;;  %v3596_v0 = vand.u32 4294901760, %v3595_v43  ;;  %v6583_v61 = vadd.f32 %v2715_v62, %v2633_v24 }
 0x35d   : > { %3700 = vmatpush.msrb.mxu2 %v6521_v28  ;;  %3752 = vmatpush.msrb.mxu3 %v6495_v9  ;;  %v3607_v63 = vsub.f32 %v6521_v28, %v3606_v48  ;;  %v7325_v13 = vand.u32 4294901760, %v6552_v47  ;;  %v2084_v59 = vadd.f32 %v7928_v15, %v6459_v30  ;;  %v2828_v35 = vmul.f32 %v6423_v46, %v2092_v16  ;;  %v2719_v62 = vpop.f32.mrf.mxu3 }
 0x35e   : > { %3441 = vmatpush.msra.mxu1 %v7912_v10  ;;  %3561 = vmatpush.msrb.mxu0 %v6513_v23  ;;  %v6592_v19 = vand.u32 4294901760, %v2836_v57  ;;  %v6599_v10 = vsub.f32 %v2844_v40, %v6558_v49  ;;  %v2425_v55 = vadd.f32 %v2424_v4, %v2334_v56  ;;  %v3602_v2 = vand.u32 4294901760, %v3601_v8  ;;  %v2429_v30 = vpop.f32.mrf.mxu0  ;;  %v7930_v8 = vld [vmem:[#allocation21_spill] sm:$0xff] }
 0x35f   : > { %4310 = vmatmul.msk.f32.vlgmr.msrb.gmra.mxu1 %vm6207_vm11, %v7915_v17  ;;  %3703 = vmatpush.msrb.mxu2 %v6535_v52  ;;  %v3613_v21 = vsub.f32 %v6535_v52, %v3612_v20  ;;  %v7323_v14 = vand.u32 4294901760, %v6568_v38  ;;  %v2080_v31 = vadd.f32 %v7929_v58, %v6455_v26  ;;  %v2824_v43 = vmul.f32 %v6410_v29, %v2088_v50  ;;  %v2529_v4 = vpop.f32.mrf.mxu1  ;;  %v2636_v3 = vpop.f32.mrf.mxu2  ;;  %v7932_v58 = vld [vmem:[#allocation13_spill] sm:$0xff] }
 0x360   : > { %3597 = vmatpush.msrb.mxu1 %v3596_v0  ;;  %3754 = vmatpush.msrb.mxu3 %v6513_v23  ;;  %v6609_v40 = vand.u32 4294901760, %v2832_v7  ;;  %v6614_v60 = vsub.f32 %v2840_v27, %v6574_v6  ;;  %v3608_v16 = vand.u32 4294901760, %v3607_v63  ;;  %v2530_v24 = vadd.f32 %v2529_v4, %v2425_v55 }
 0x361   : > { %3563 = vmatpush.msrb.mxu0 %v6530_v33  ;;  %3706 = vmatpush.msrb.mxu2 %v6552_v47  ;;  %v3619_v26 = vsub.f32 %v6552_v47, %v7325_v13  ;;  %v7322_v50 = vand.u32 4294901760, %v6579_v32  ;;  %v2076_v36 = vadd.f32 %v7930_v8, %v6439_v44  ;;  %v2820_v12 = vmul.f32 %v6423_v46, %v2084_v59 }
 0x362   : > { %3603 = vmatpush.msrb.mxu1 %v3602_v2  ;;  %3756 = vmatpush.msrb.mxu3 %v6530_v33  ;;  %v6624_v56 = vand.u32 4294901760, %v2828_v35  ;;  %v6629_v27 = vsub.f32 %v2836_v57, %v6592_v19  ;;  %v3614_v0 = vand.u32 4294901760, %v3613_v21  ;;  %v2637_v63 = vadd.f32 %v2636_v3, %v2530_v24  ;;  %v7931_v2 = vld [vmem:[#allocation14_spill] sm:$0xff] }
 0x363   : > { %3565 = vmatpush.msrb.mxu0 %v6542_v1  ;;  %3709 = vmatpush.msrb.mxu2 %v6568_v38  ;;  %v3625_v44 = vsub.f32 %v6568_v38, %v7323_v14  ;;  %v7320_v15 = vand.u32 4294901760, %v6599_v10  ;;  %v2816_v59 = vmul.f32 %v6410_v29, %v2080_v31  ;;  %v6637_v55 = vand.u32 4294901760, %v2824_v43 }
 0x364   : > { %3609 = vmatpush.msrb.mxu1 %v3608_v16  ;;  %3758 = vmatpush.msrb.mxu3 %v6542_v1  ;;  %v2338_v4 = vadd.f32 %v7932_v58, %v7931_v2  ;;  %v6644_v57 = vsub.f32 %v2832_v7, %v6609_v40  ;;  %v3620_v21 = vand.u32 4294901760, %v3619_v26  ;;  %v6647_v3 = vadd.f32 %v2719_v62, %v2637_v63 }
 0x365   : > { %3567 = vmatpush.msrb.mxu0 %v6558_v49  ;;  %3712 = vmatpush.msrb.mxu2 %v6579_v32  ;;  %v3631_v29 = vsub.f32 %v6579_v32, %v7322_v50  ;;  %v7321_v31 = vand.u32 4294901760, %v6614_v60  ;;  %v2812_v16 = vmul.f32 %v6423_v46, %v2076_v36  ;;  %v6654_v24 = vand.u32 4294901760, %v2820_v12  ;;  %v2723_v26 = vpop.f32.mrf.mxu3  ;;  %v7934_v50 = vld [vmem:[#allocation17_spill] sm:$0xff] }
 0x366   : > { %3615 = vmatpush.msrb.mxu1 %v3614_v0  ;;  %3760 = vmatpush.msrb.mxu3 %v6558_v49  ;;  %v6659_v7 = vsub.f32 %v2828_v35, %v6624_v56  ;;  %v2430_v62 = vadd.f32 %v2429_v30, %v2338_v4  ;;  %v3626_v8 = vand.u32 4294901760, %v3625_v44  ;;  %v2434_v0 = vpop.f32.mrf.mxu0  ;;  %v3637_v46 = vsub.f32 %v6599_v10, %v7320_v15 }
 0x367   : > { %3569 = vmatpush.msrb.mxu0 %v6574_v6  ;;  %3715 = vmatpush.msrb.mxu2 %v6599_v10  ;;  %v7324_v36 = vand.u32 4294901760, %v6629_v27  ;;  %v6666_v63 = vand.u32 4294901760, %v2816_v59  ;;  %v2535_v35 = vpop.f32.mrf.mxu1  ;;  %v2640_v2 = vpop.f32.mrf.mxu2  ;;  %v6671_v30 = vsub.f32 %v2824_v43, %v6637_v55  ;;  %v3632_v44 = vand.u32 4294901760, %v3631_v29 }
 0x368   : > { %3621 = vmatpush.msrb.mxu1 %v3620_v21  ;;  %3762 = vmatpush.msrb.mxu3 %v6574_v6  ;;  %v2536_v58 = vadd.f32 %v2535_v35, %v2430_v62  ;;  %v3643_v4 = vsub.f32 %v6614_v60, %v7321_v31  ;;  %v7328_v21 = vand.u32 4294901760, %v6644_v57  ;;  %v6678_v15 = vand.u32 4294901760, %v2812_v16 }
 0x369   : > { %3571 = vmatpush.msrb.mxu0 %v6592_v19  ;;  %3718 = vmatpush.msrb.mxu2 %v6614_v60  ;;  %v6683_v43 = vsub.f32 %v2820_v12, %v6654_v24  ;;  %v3638_v29 = vand.u32 4294901760, %v3637_v46  ;;  %v7326_v35 = vand.u32 4294901760, %v6659_v7  ;;  %v6693_v31 = vsub.f32 %v2816_v59, %v6666_v63 }
 0x36a   : > { %3627 = vmatpush.msrb.mxu1 %v3626_v8  ;;  %3764 = vmatpush.msrb.mxu3 %v6592_v19  ;;  %v2641_v62 = vadd.f32 %v2640_v2, %v2536_v58  ;;  %v3649_v8 = vsub.f32 %v6629_v27, %v7324_v36  ;;  %v7327_v12 = vand.u32 4294901760, %v6671_v30  ;;  %v3644_v46 = vand.u32 4294901760, %v3643_v4 }
 0x36b   : > { %3573 = vmatpush.msrb.mxu0 %v6609_v40  ;;  %3721 = vmatpush.msrb.mxu2 %v6629_v27  ;;  %v3655_v58 = vsub.f32 %v6644_v57, %v7328_v21  ;;  %v6707_v59 = vsub.f32 %v2812_v16, %v6678_v15 }
 0x36c   : > { %3633 = vmatpush.msrb.mxu1 %v3632_v44  ;;  %3766 = vmatpush.msrb.mxu3 %v6609_v40  ;;  %v7933_v44 = vld [vmem:[#allocation18_spill] sm:$0xff]  ;;  %v6699_v2 = vadd.f32 %v2723_v26, %v2641_v62  ;;  %v3661_v26 = vsub.f32 %v6659_v7, %v7326_v35 }
 0x36d   : > { %3575 = vmatpush.msrb.mxu0 %v6624_v56  ;;  %3724 = vmatpush.msrb.mxu2 %v6644_v57  ;;  %v2342_v14 = vadd.f32 %v7934_v50, %v7933_v44  ;;  %v2727_v36 = vpop.f32.mrf.mxu3  ;;  %v3650_v50 = vand.u32 4294901760, %v3649_v8  ;;  %v3667_v8 = vsub.f32 %v6671_v30, %v7327_v12  ;;  %v3678_v44 = vand.u32 4294901760, %v6693_v31 }
 0x36e   : > { %3639 = vmatpush.msrb.mxu1 %v3638_v29  ;;  %3768 = vmatpush.msrb.mxu3 %v6624_v56  ;;  %v2439_v4 = vpop.f32.mrf.mxu0  ;;  %v7329_v29 = vand.u32 4294901760, %v6683_v43 }
 0x36f   : > { %3577 = vmatpush.msrb.mxu0 %v6637_v55  ;;  %3727 = vmatpush.msrb.mxu2 %v6659_v7  ;;  %v2435_v13 = vadd.f32 %v2434_v0, %v2342_v14  ;;  %v2541_v62 = vpop.f32.mrf.mxu1  ;;  %v2644_v16 = vpop.f32.mrf.mxu2  ;;  %v3656_v14 = vand.u32 4294901760, %v3655_v58 }
 0x370   : > { %3645 = vmatpush.msrb.mxu1 %v3644_v46  ;;  %3770 = vmatpush.msrb.mxu3 %v6637_v55  ;;  %v3662_v46 = vand.u32 4294901760, %v3661_v26  ;;  %v3673_v58 = vsub.f32 %v6683_v43, %v7329_v29  ;;  %v3679_v26 = vsub.f32 %v6693_v31, %v3678_v44 }
 0x371   : > { %3579 = vmatpush.msrb.mxu0 %v6654_v24  ;;  %3730 = vmatpush.msrb.mxu2 %v6671_v30  ;;  %v2542_v0 = vadd.f32 %v2541_v62, %v2435_v13  ;;  %v3684_v13 = vand.u32 4294901760, %v6707_v59  ;;  %v7936_v62 = vld [vmem:[#allocation22_spill] sm:$0xff] }
 0x372   : > { %3651 = vmatpush.msrb.mxu1 %v3650_v50  ;;  %3772 = vmatpush.msrb.mxu3 %v6654_v24  ;;  %v7935_v50 = vld [vmem:[#allocation136_spill] sm:$0xff]  ;;  %v3680_v41 = vand.u32 4294901760, %v3679_v26  ;;  %v4369_v26 = vld [vmem:[%s4522_s29 + $0x18] sm:$0xff]  ;;  %s134_s29 = sand.u32 1, %s4424_s10  }
 0x373   : > { %3581 = vmatpush.msrb.mxu0 %v6666_v63  ;;  %3733 = vmatpush.msrb.mxu2 %v6683_v43  ;;  %v2645_v35 = vadd.f32 %v2644_v16, %v2542_v0  ;;  %v2346_v12 = vadd.f32 %v7936_v62, %v7935_v50  ;;  %v7937_v16 = vld [vmem:[#allocation40_spill] sm:$0xff]  ;;  %s4305_s21 = sshll.u32 %s134_s29, 3  ;;  %s4227_s13 = scalar_lea.sflag [#allocation3], %s134_s29 }
 0x374   : > { %3657 = vmatpush.msrb.mxu1 %v3656_v14  ;;  %3774 = vmatpush.msrb.mxu3 %v6666_v63  ;;  %v3668_v14 = vand.u32 4294901760, %v3667_v8  ;;  %v7938_v8 = vld [vmem:[#allocation45_spill] sm:$0xff]  ;;  %s136_s26 = scalar_lea.vmem [#allocation2], %s4305_s21 }
 0x375   : > { %3583 = vmatpush.msrb.mxu0 %v6678_v15  ;;  %3736 = vmatpush.msrb.mxu2 %v6693_v31  ;;  %v6733_v21 = vadd.f32 %v2727_v36, %v2645_v35  ;;  %v2731_v0 = vpop.f32.mrf.mxu3  ;;  %v2440_v29 = vadd.f32 %v2439_v4, %v2346_v12  ;;  %v3685_v36 = vsub.f32 %v6707_v59, %v3684_v13  ;;  %s4239_s27 = sshll.u32 %s136_s26, 4  ;;  %s4240_s27 = int_to_ptr.vmem [resolvable:$true] %s4239_s27 }
 0x376   : > { %3663 = vmatpush.msrb.mxu1 %v3662_v46  ;;  %3776 = vmatpush.msrb.mxu3 %v6678_v15  ;;  %v3674_v46 = vand.u32 4294901760, %v3673_v58  ;;  %v6742_v50 = vpop.f32.mrf.mxu0 }
 0x377   : > { %3406 = vmatmul.f32.vlgmr.msra.gmra.mxu0 %v7937_v16  ;;  %3739 = vmatpush.msrb.mxu2 %v6707_v59  ;;  %v2547_v35 = vpop.f32.mrf.mxu1  ;;  %v2648_v62 = vpop.f32.mrf.mxu2  ;;  %v3686_v12 = vand.u32 4294901760, %v3685_v36  ;;  %v7954_v36 = vld [vmem:[#allocation29_spill] sm:$0xff] }
 0x378   : > { %3786 = vmatpush.msra.mxu0 %v3594_v51  ;;  %3669 = vmatpush.msrb.mxu1 %v3668_v14  ;;  %v2548_v51 = vadd.f32 %v2547_v35, %v2440_v29 }
 0x379   : > { %3444 = vmatmul.f32.vlgmr.msra.gmra.mxu1 %v7938_v8  ;;  %4312 = vmatmul.msk.f32.vlgmr.msra.gmra.mxu2 %vm6207_vm11, %v7915_v17 }
 0x37a   : > { %3790 = vmatpush.msra.mxu0 %v3600_v53  ;;  %3675 = vmatpush.msrb.mxu1 %v3674_v46  ;;  %v2649_v4 = vadd.f32 %v2648_v62, %v2548_v51  ;;  %v7939_v53 = vand.u32 4294901760, %v6552_v47  ;;  %v7956_v51 = vld [vmem:[#allocation26_spill] sm:$0xff] }
 0x37b   : > { %4313 = vmatmul.msk.f32.vlgmr.msra.gmra.mxu3 %vm6207_vm11, %v7915_v17 }
 0x37c   : > { %3794 = vmatpush.msra.mxu0 %v3606_v48  ;;  %3681 = vmatpush.msrb.mxu1 %v3680_v41  ;;  %v6760_v58 = vadd.f32 %v2731_v0, %v2649_v4  ;;  %v2777_v0 = vperm.slane %v4369_v26, 1  ;;  %v7955_v41 = vld [vmem:[#allocation138_spill] sm:$0xff]  ;;  %v2765_v4 = vperm.slane %v4369_v26, 0 }
 0x37d   : > { %v6763_v34 = vpop.f32.mrf.mxu3 }
 0x37e   : > { %3798 = vmatpush.msra.mxu0 %v3612_v20  ;;  %3687 = vmatpush.msrb.mxu1 %v3686_v12  ;;  %v6768_v28 = vpop.f32.mrf.mxu0  ;;  %v7940_v20 = vand.u32 4294901760, %v6568_v38  ;;  %v7943_v38 = vand.u32 4294901760, %v6614_v60  ;;  %v2354_v12 = vadd.f32 %v7956_v51, %v7955_v41  ;;  %vm2781_vm0 = vcmp.eq.s32.totalorder %v4510_v5, %v2777_v0 }
 0x37f   : > { %3588 = vmatmul.f32.vlgmr.msrb.gmra.mxu0 %v7920_v18  ;;  %v6771_v48 = vpop.f32.mrf.mxu1  ;;  %v6773_v52 = vpop.f32.mrf.mxu2  ;;  %vm2785_vm1 = vcmp.eq.s32.totalorder %v7869_v45, %v2777_v0  ;;  %vm2769_vm2 = vcmp.eq.s32.totalorder %v4510_v5, %v2765_v4  ;;  %vm2773_vm3 = vcmp.eq.s32.totalorder %v7869_v45, %v2765_v4 }
 0x380   : > { %3852 = vmatpush.msra.mxu1 %v6448_v54  ;;  %3802 = vmatpush.msra.mxu0 %v7939_v53  ;;  %v7941_v54 = vand.u32 4294901760, %v6579_v32  ;;  %v7944_v32 = vand.u32 4294901760, %v6629_v27  ;;  %v2789_v53 = vperm.slane %v4369_v26, 5 }
 0x381   : > { %3741 = vmatmul.f32.vlgmr.msrb.gmra.mxu2 %v7937_v16  ;;  %4314 = vmatmul.msk.f32.vlgmr.msrb.gmra.mxu1 %vm6207_vm11, %v7915_v17 }
 0x382   : > { %3854 = vmatpush.msra.mxu1 %v6466_v39  ;;  %3806 = vmatpush.msra.mxu0 %v7940_v20  ;;  %v7942_v39 = vand.u32 4294901760, %v6599_v10 }
 0x383   : > { %3779 = vmatmul.f32.vlgmr.msrb.gmra.mxu3 %v7938_v8 }
 0x384   : > { %3856 = vmatpush.msra.mxu1 %v6479_v22  ;;  %3810 = vmatpush.msra.mxu0 %v7941_v54 }
 0x385   : > { %v6789_v47 = vpop.f32.mrf.mxu3 }
 0x386   : > { %3858 = vmatpush.msra.mxu1 %v6495_v9  ;;  %3814 = vmatpush.msra.mxu0 %v7942_v39  ;;  %v2454_v29 = vpop.f32.mrf.mxu0  ;;  %v7945_v9 = vand.u32 4294901760, %v6644_v57  ;;  %v7948_v57 = vand.u32 4294901760, %v6683_v43  ;;  %v7957_v39 = vld [vmem:[#allocation39_spill] sm:$0xff] }
 0x387   : > { %v2559_v22 = vpop.f32.mrf.mxu1  ;;  %v6794_v14 = vpop.f32.mrf.mxu2 }
 0x388   : > { %3860 = vmatpush.msra.mxu1 %v6513_v23  ;;  %3818 = vmatpush.msra.mxu0 %v7943_v38  ;;  %v7946_v23 = vand.u32 4294901760, %v6659_v7  ;;  %v7949_v7 = vld [vmem:[#allocation35_spill] sm:$0xff] }
 0x38a   : > { %3862 = vmatpush.msra.mxu1 %v6530_v33  ;;  %3822 = vmatpush.msra.mxu0 %v7944_v32  ;;  %v7947_v33 = vand.u32 4294901760, %v6671_v30  ;;  %v7950_v30 = vld [vmem:[#allocation37_spill] sm:$0xff] }
 0x38b   : > { %v2366_v43 = vadd.f32 %v7950_v30, %v7949_v7 }
 0x38c   : > { %3864 = vmatpush.msra.mxu1 %v6542_v1  ;;  %3826 = vmatpush.msra.mxu0 %v7945_v9  ;;  %v7958_v9 = vld [vmem:[#allocation137_spill] sm:$0xff] }
 0x38d   : > { %v6805_v10 = vpop.f32.mrf.mxu3 }
 0x38e   : > { %3866 = vmatpush.msra.mxu1 %v6558_v49  ;;  %3830 = vmatpush.msra.mxu0 %v7946_v23  ;;  %v2459_v60 = vpop.f32.mrf.mxu0  ;;  %v7959_v23 = vld [vmem:[#allocation24_spill] sm:$0xff] }
 0x38f   : > { %v2565_v27 = vpop.f32.mrf.mxu1  ;;  %v2660_v1 = vpop.f32.mrf.mxu2 }
 0x390   : > { %3868 = vmatpush.msra.mxu1 %v6574_v6  ;;  %3834 = vmatpush.msra.mxu0 %v7947_v33  ;;  %v2350_v33 = vadd.f32 %v7959_v23, %v7958_v9 }
 0x392   : > { %3870 = vmatpush.msra.mxu1 %v6592_v19  ;;  %3838 = vmatpush.msra.mxu0 %v7948_v57 }
 0x394   : > { %3872 = vmatpush.msra.mxu1 %v6609_v40  ;;  %3842 = vmatpush.msra.mxu0 %v3678_v44  ;;  %v7951_v44 = vld [vmem:[#allocation31_spill] sm:$0xff] }
 0x395   : > { %v2747_v49 = vpop.f32.mrf.mxu3 }
 0x396   : > { %3874 = vmatpush.msra.mxu1 %v6624_v56  ;;  %3846 = vmatpush.msra.mxu0 %v3684_v13  ;;  %v2464_v6 = vpop.f32.mrf.mxu0  ;;  %v7952_v13 = vld [vmem:[#allocation33_spill] sm:$0xff] }
 0x397   : > { %4315 = vmatmul.msk.f32.vlgmr.msra.gmra.mxu0 %vm6207_vm11, %v7915_v17  ;;  %v2571_v19 = vpop.f32.mrf.mxu1  ;;  %v2664_v40 = vpop.f32.mrf.mxu2  ;;  %v2465_v46 = vadd.f32 %v2464_v6, %v2366_v43  ;;  %v2450_v6 = vadd.f32 %v6768_v28, %v2354_v12  ;;  %v2793_v43 = vsel %vm2781_vm0, %v2789_v53, 0.0 }
 0x398   : > { %3876 = vmatpush.msra.mxu1 %v6637_v55 }
 0x39a   : > { %3878 = vmatpush.msra.mxu1 %v6654_v24  ;;  %v2362_v24 = vadd.f32 %v7952_v13, %v7951_v44 }
 0x39c   : > { %3880 = vmatpush.msra.mxu1 %v6666_v63  ;;  %v7953_v63 = vld [vmem:[#allocation27_spill] sm:$0xff]  ;;  %v2460_v35 = vadd.f32 %v2459_v60, %v2362_v24  ;;  %v2797_v24 = vsel %vm2785_vm1, %v2789_v53, 0.0 }
 0x39d   : > { %v2751_v56 = vpop.f32.mrf.mxu3 }
 0x39e   : > { %3882 = vmatpush.msra.mxu1 %v6678_v15  ;;  %v2469_v59 = vpop.f32.mrf.mxu0  ;;  %v2358_v15 = vadd.f32 %v7954_v36, %v7953_v63  ;;  %v2572_v54 = vadd.f32 %v2571_v19, %v2460_v35  ;;  %v2445_v19 = vadd.f32 %v6742_v50, %v2350_v33 }
 0x39f   : > { %4316 = vmatmul.msk.f32.vlgmr.msra.gmra.mxu1 %vm6207_vm11, %v7915_v17  ;;  %v2577_v55 = vpop.f32.mrf.mxu1  ;;  %v2668_v31 = vpop.f32.mrf.mxu2  ;;  %v2470_v38 = vadd.f32 %v2469_v59, %v7957_v39  ;;  %v2560_v59 = vadd.f32 %v2559_v22, %v2450_v6 }
 0x3a0   : > { %v2578_v62 = vadd.f32 %v2577_v55, %v2465_v46  ;;  %v2455_v20 = vadd.f32 %v2454_v29, %v2358_v15  ;;  %v2801_v29 = vperm.slane %v4369_v26, 4  ;;  %v2665_v44 = vadd.f32 %v2664_v40, %v2572_v54  ;;  %v7960_v26 = vld [vmem:[#allocation43_spill] sm:$0xff] }
 0x3a1   : > { %v2554_v46 = vadd.f32 %v6771_v48, %v2445_v19  ;;  %v2657_v5 = vadd.f32 %v6794_v14, %v2560_v59 }
 0x3a2   : > { %v2566_v55 = vadd.f32 %v2565_v27, %v2455_v20  ;;  %v2669_v7 = vadd.f32 %v2668_v31, %v2578_v62  ;;  %v6847_v31 = vsel %vm2769_vm2, %v2801_v29, %v2793_v43  ;;  %v2748_v36 = vadd.f32 %v2747_v49, %v2665_v44 }
 0x3a3   : > { %v6852_v22 = vsel %vm2773_vm3, %v2801_v29, %v2797_v24  ;;  %v2653_v35 = vadd.f32 %v6773_v52, %v2554_v46  ;;  %v2740_v41 = vadd.f32 %v6789_v47, %v2657_v5  ;;  %v2845_v9 = vmul.f32 %v6847_v31, %v6760_v58 }
 0x3a4   : > { %v2661_v63 = vadd.f32 %v2660_v1, %v2566_v55  ;;  %v2752_v28 = vadd.f32 %v2751_v56, %v2669_v7  ;;  %v2861_v14 = vmul.f32 %v6847_v31, %v2748_v36  ;;  %v2841_v6 = vmul.f32 %v6852_v22, %v6733_v21 }
 0x3a5   : > { %v2755_v32 = vpop.f32.mrf.mxu3  ;;  %v2736_v12 = vadd.f32 %v6763_v34, %v2653_v35  ;;  %v2837_v43 = vmul.f32 %v6847_v31, %v6699_v2  ;;  %v6906_v29 = vand.u32 4294901760, %v2845_v9  ;;  %v2833_v44 = vmul.f32 %v6852_v22, %v6647_v3 }
 0x3a6   : > { %v2474_v0 = vpop.f32.mrf.mxu0  ;;  %v2744_v48 = vadd.f32 %v6805_v10, %v2661_v63  ;;  %v2865_v1 = vmul.f32 %v6852_v22, %v2752_v28  ;;  %v2853_v10 = vmul.f32 %v6847_v31, %v2740_v41  ;;  %v6866_v20 = vand.u32 4294901760, %v2861_v14 }
 0x3a7   : > { %v2583_v57 = vpop.f32.mrf.mxu1  ;;  %v2672_v60 = vpop.f32.mrf.mxu2  ;;  %v2475_v15 = vadd.f32 %v2474_v0, %v7960_v26  ;;  %v2849_v39 = vmul.f32 %v6852_v22, %v2736_v12  ;;  %v2829_v3 = vmul.f32 %v6847_v31, %v6583_v61  ;;  %v6937_v28 = vand.u32 4294901760, %v2837_v43 }
 0x3a8   : > { %v2584_v30 = vadd.f32 %v2583_v57, %v2470_v38  ;;  %v2857_v4 = vmul.f32 %v6852_v22, %v2744_v48  ;;  %v6863_v53 = vand.u32 4294901760, %v2865_v1  ;;  %v6882_v23 = vand.u32 4294901760, %v2853_v10 }
 0x3a9   : > { %v6890_v57 = vsub.f32 %v2861_v14, %v6866_v20  ;;  %v6895_v55 = vand.u32 4294901760, %v2849_v39  ;;  %v6945_v36 = vsub.f32 %v2845_v9, %v6906_v29  ;;  %v2825_v61 = vmul.f32 %v6852_v22, %v6518_v11 }
 0x3aa   : > { %v2673_v13 = vadd.f32 %v2672_v60, %v2584_v30  ;;  %v6873_v38 = vand.u32 4294901760, %v2857_v4  ;;  %v6878_v34 = vsub.f32 %v2865_v1, %v6863_v53  ;;  %v6918_v59 = vsub.f32 %v2853_v10, %v6882_v23 }
 0x3ab   : > { %v3947_v2 = vand.u32 4294901760, %v6890_v57  ;;  %v6932_v46 = vsub.f32 %v2849_v39, %v6895_v55  ;;  %v2821_v11 = vmul.f32 %v6847_v31, %v6433_v37  ;;  %v6964_v48 = vand.u32 4294901760, %v2829_v3 }
 0x3ac   : > { %v2756_v27 = vadd.f32 %v2755_v32, %v2673_v13  ;;  %v6901_v7 = vsub.f32 %v2857_v4, %v6873_v38  ;;  %v3941_v30 = vand.u32 4294901760, %v6878_v34  ;;  %v6923_v13 = vand.u32 4294901760, %v2841_v6 }
 0x3ad   : > { %v2759_v62 = vpop.f32.mrf.mxu3  ;;  %v3948_v5 = vsub.f32 %v6890_v57, %v3947_v2  ;;  %v3959_v26 = vand.u32 4294901760, %v6918_v59  ;;  %v3965_v35 = vand.u32 4294901760, %v6932_v46  ;;  %v3971_v41 = vand.u32 4294901760, %v6945_v36 }
 0x3ae   : > { %v2869_v50 = vmul.f32 %v6847_v31, %v2756_v27  ;;  %v3942_v0 = vsub.f32 %v6878_v34, %v3941_v30  ;;  %v3953_v63 = vand.u32 4294901760, %v6901_v7  ;;  %v2817_v37 = vmul.f32 %v6852_v22, %v6359_v42  ;;  %v7961_v42 = vld [vmem:[#allocation49_spill] sm:$0xff] }
 0x3af   : > { %v2589_v40 = vpop.f32.mrf.mxu1  ;;  %v2676_v45 = vpop.f32.mrf.mxu2  ;;  %v3949_v1 = vand.u32 4294901760, %v3948_v5  ;;  %v6978_v14 = vand.u32 4294901760, %v2825_v61  ;;  %v3966_v12 = vsub.f32 %v6932_v46, %v3965_v35  ;;  %v6992_v10 = vand.u32 4294901760, %v2821_v11 }
 0x3b0   : > { %v2590_v56 = vadd.f32 %v2589_v40, %v2475_v15  ;;  %v6859_v49 = vand.u32 4294901760, %v2869_v50  ;;  %v6950_v15 = vand.u32 4294901760, %v2833_v44  ;;  %v3954_v40 = vsub.f32 %v6901_v7, %v3953_v63 }
 0x3b1   : > { %v3972_v39 = vsub.f32 %v6945_v36, %v3971_v41  ;;  %v7001_v9 = vsub.f32 %v2829_v3, %v6964_v48 }
 0x3b2   : > { %v2677_v51 = vadd.f32 %v2676_v45, %v2590_v56  ;;  %v6870_v47 = vsub.f32 %v2869_v50, %v6859_v49  ;;  %v3943_v50 = vand.u32 4294901760, %v3942_v0  ;;  %v6959_v45 = vsub.f32 %v2841_v6, %v6923_v13 }
 0x3b3   : > { %v3960_v56 = vsub.f32 %v6918_v59, %v3959_v26  ;;  %v6987_v4 = vsub.f32 %v2833_v44, %v6950_v15  ;;  %v3973_v0 = vand.u32 4294901760, %v3972_v39  ;;  %v3995_v5 = vand.u32 4294901760, %v7001_v9 }
 0x3b4   : > { %v2760_v52 = vadd.f32 %v2759_v62, %v2677_v51  ;;  %v3935_v60 = vand.u32 4294901760, %v6870_v47  ;;  %v6973_v62 = vsub.f32 %v2837_v43, %v6937_v28  ;;  %v3955_v51 = vand.u32 4294901760, %v3954_v40 }
 0x3b5   : > { %v3967_v43 = vand.u32 4294901760, %v3966_v12  ;;  %v3989_v44 = vand.u32 4294901760, %v6987_v4 }
 0x3b6   : > { %v2873_v54 = vmul.f32 %v6852_v22, %v2760_v52  ;;  %v3936_v19 = vsub.f32 %v6870_v47, %v3935_v60  ;;  %v3977_v52 = vand.u32 4294901760, %v6959_v45  ;;  %v2813_v22 = vmul.f32 %v6847_v31, %v7961_v42 }
 0x3b7   : > { %v3983_v6 = vand.u32 4294901760, %v6973_v62  ;;  %v7004_v31 = vand.u32 4294901760, %v2817_v37 }
 0x3b8   : > { %v6875_v32 = vand.u32 4294901760, %v2873_v54  ;;  %v3937_v27 = vand.u32 4294901760, %v3936_v19  ;;  %v7013_v19 = vsub.f32 %v2825_v61, %v6978_v14 }
 0x3b9   : > { %v3984_v3 = vsub.f32 %v6973_v62, %v3983_v6  ;;  %v7035_v40 = vsub.f32 %v2817_v37, %v7004_v31 }
 0x3ba   : > { %v6885_v33 = vsub.f32 %v2873_v54, %v6875_v32  ;;  %3888 = vmatpush.msra.mxu2 %v6875_v32  ;;  %4081 = vmatpush.msrb.mxu1 %v6875_v32  ;;  %v3961_v54 = vand.u32 4294901760, %v3960_v56  ;;  %v3996_v56 = vsub.f32 %v7001_v9, %v3995_v5 }
 0x3bc   : > { %v3929_v58 = vand.u32 4294901760, %v6885_v33  ;;  %3890 = vmatpush.msra.mxu2 %v6859_v49  ;;  %4029 = vmatpush.msrb.mxu0 %v6885_v33 }
 0x3bd   : > { %4083 = vmatpush.msrb.mxu1 %v6859_v49 }
 0x3be   : > { %3892 = vmatpush.msra.mxu2 %v6863_v53  ;;  %4032 = vmatpush.msrb.mxu0 %v6870_v47  ;;  %v3930_v21 = vsub.f32 %v6885_v33, %v3929_v58 }
 0x3bf   : > { %4085 = vmatpush.msrb.mxu1 %v6863_v53 }
 0x3c0   : > { %3894 = vmatpush.msra.mxu2 %v6866_v20  ;;  %4035 = vmatpush.msrb.mxu0 %v6878_v34  ;;  %v3931_v24 = vand.u32 4294901760, %v3930_v21  ;;  %v3978_v21 = vsub.f32 %v6959_v45, %v3977_v52 }
 0x3c1   : > { %4087 = vmatpush.msrb.mxu1 %v6866_v20 }
 0x3c2   : > { %3896 = vmatpush.msra.mxu2 %v6873_v38  ;;  %3932 = vmatpush.msra.mxu3 %v3931_v24  ;;  %v7016_v24 = vand.u32 4294901760, %v2813_v22  ;;  %v3979_v61 = vand.u32 4294901760, %v3978_v21 }
 0x3c3   : > { %4038 = vmatpush.msrb.mxu0 %v6890_v57  ;;  %4089 = vmatpush.msrb.mxu1 %v6873_v38 }
 0x3c4   : > { %3898 = vmatpush.msra.mxu2 %v6882_v23  ;;  %3938 = vmatpush.msra.mxu3 %v3937_v27  ;;  %v7025_v27 = vsub.f32 %v2821_v11, %v6992_v10  ;;  %v4001_v11 = vand.u32 4294901760, %v7013_v19 }
 0x3c5   : > { %4041 = vmatpush.msrb.mxu0 %v6901_v7  ;;  %4091 = vmatpush.msrb.mxu1 %v6882_v23 }
 0x3c6   : > { %3900 = vmatpush.msra.mxu2 %v6895_v55  ;;  %3944 = vmatpush.msra.mxu3 %v3943_v50  ;;  %v3990_v50 = vsub.f32 %v6987_v4, %v3989_v44  ;;  %v4007_v37 = vand.u32 4294901760, %v7025_v27  ;;  %v4002_v42 = vsub.f32 %v7013_v19, %v4001_v11 }
 0x3c7   : > { %4044 = vmatpush.msrb.mxu0 %v6918_v59  ;;  %4093 = vmatpush.msrb.mxu1 %v6895_v55 }
 0x3c8   : > { %3902 = vmatpush.msra.mxu2 %v6906_v29  ;;  %3950 = vmatpush.msra.mxu3 %v3949_v1  ;;  %v3985_v1 = vand.u32 4294901760, %v3984_v3  ;;  %v3991_v12 = vand.u32 4294901760, %v3990_v50  ;;  %v4008_v39 = vsub.f32 %v7025_v27, %v4007_v37  ;;  %v4003_v21 = vand.u32 4294901760, %v4002_v42 }
 0x3c9   : > { %4047 = vmatpush.msrb.mxu0 %v6932_v46  ;;  %4095 = vmatpush.msrb.mxu1 %v6906_v29 }
 0x3ca   : > { %3904 = vmatpush.msra.mxu2 %v6923_v13  ;;  %3956 = vmatpush.msra.mxu3 %v3955_v51  ;;  %v7045_v51 = vsub.f32 %v2813_v22, %v7016_v24  ;;  %v3997_v22 = vand.u32 4294901760, %v3996_v56  ;;  %v4009_v3 = vand.u32 4294901760, %v4008_v39 }
 0x3cb   : > { %4050 = vmatpush.msrb.mxu0 %v6945_v36  ;;  %4097 = vmatpush.msrb.mxu1 %v6923_v13 }
 0x3cc   : > { %3906 = vmatpush.msra.mxu2 %v6937_v28  ;;  %3962 = vmatpush.msra.mxu3 %v3961_v54  ;;  %v4013_v54 = vand.u32 4294901760, %v7035_v40 }
 0x3cd   : > { %4053 = vmatpush.msrb.mxu0 %v6959_v45  ;;  %4099 = vmatpush.msrb.mxu1 %v6937_v28 }
 0x3ce   : > { %3908 = vmatpush.msra.mxu2 %v6950_v15  ;;  %3968 = vmatpush.msra.mxu3 %v3967_v43  ;;  %v4019_v43 = vand.u32 4294901760, %v7045_v51 }
 0x3cf   : > { %4056 = vmatpush.msrb.mxu0 %v6973_v62  ;;  %4101 = vmatpush.msrb.mxu1 %v6950_v15 }
 0x3d0   : > { %3910 = vmatpush.msra.mxu2 %v6964_v48  ;;  %3974 = vmatpush.msra.mxu3 %v3973_v0  ;;  %v4014_v0 = vsub.f32 %v7035_v40, %v4013_v54 }
 0x3d1   : > { %4059 = vmatpush.msrb.mxu0 %v6987_v4  ;;  %4103 = vmatpush.msrb.mxu1 %v6964_v48 }
 0x3d2   : > { %3912 = vmatpush.msra.mxu2 %v6978_v14  ;;  %3980 = vmatpush.msra.mxu3 %v3979_v61  ;;  %v4020_v61 = vsub.f32 %v7045_v51, %v4019_v43 }
 0x3d3   : > { %4062 = vmatpush.msrb.mxu0 %v7001_v9  ;;  %4105 = vmatpush.msrb.mxu1 %v6978_v14 }
 0x3d4   : > { %3914 = vmatpush.msra.mxu2 %v6992_v10  ;;  %3986 = vmatpush.msra.mxu3 %v3985_v1  ;;  %v4021_v33 = vand.u32 4294901760, %v4020_v61 }
 0x3d5   : > { %4065 = vmatpush.msrb.mxu0 %v7013_v19  ;;  %4107 = vmatpush.msrb.mxu1 %v6992_v10 }
 0x3d6   : > { %3916 = vmatpush.msra.mxu2 %v7004_v31  ;;  %3992 = vmatpush.msra.mxu3 %v3991_v12 }
 0x3d7   : > { %4068 = vmatpush.msrb.mxu0 %v7025_v27  ;;  %4109 = vmatpush.msrb.mxu1 %v7004_v31  ;;  %v4015_v27 = vand.u32 4294901760, %v4014_v0 }
 0x3d8   : > { %3918 = vmatpush.msra.mxu2 %v7016_v24  ;;  %3998 = vmatpush.msra.mxu3 %v3997_v22 }
 0x3d9   : > { %4071 = vmatpush.msrb.mxu0 %v7035_v40  ;;  %4111 = vmatpush.msrb.mxu1 %v7016_v24 }
 0x3da   : > { %4121 = vmatpush.msrb.mxu2 %v3929_v58  ;;  %4004 = vmatpush.msra.mxu3 %v4003_v21 }
 0x3db   : > { %4074 = vmatpush.msrb.mxu0 %v7045_v51  ;;  %3923 = vmatmul.f32.vlgmr.msra.gmra.mxu2 %v7920_v18  ;;  %v2919_v18 = vpop.f32.mrf.mxu0 }
 0x3dc   : > { %4125 = vmatpush.msrb.mxu2 %v3935_v60  ;;  %4010 = vmatpush.msra.mxu3 %v4009_v3 }
 0x3dd   : > { %4076 = vmatmul.f32.vlgmr.msrb.gmra.mxu0 %v7937_v16  ;;  %4114 = vmatmul.f32.vlgmr.msrb.gmra.mxu1 %v7938_v8  ;;  %v3019_v16 = vpop.f32.mrf.mxu1  ;;  %v3110_v8 = vpop.f32.mrf.mxu3 }
 0x3de   : > { %4129 = vmatpush.msrb.mxu2 %v3941_v30  ;;  %4016 = vmatpush.msra.mxu3 %v4015_v27  ;;  %v3020_v30 = vadd.f32 %v3019_v16, %v2919_v18 }
 0x3e0   : > { %4133 = vmatpush.msrb.mxu2 %v3947_v2  ;;  %4022 = vmatpush.msra.mxu3 %v4021_v33 }
 0x3e1   : > { %4317 = vmatmul.msk.f32.vlgmr.msra.gmra.mxu3 %vm6207_vm11, %v7915_v17 }
 0x3e2   : > { %4187 = vmatpush.msrb.mxu3 %v6875_v32  ;;  %4137 = vmatpush.msrb.mxu2 %v3953_v63 }
 0x3e4   : > { %4189 = vmatpush.msrb.mxu3 %v6859_v49  ;;  %4141 = vmatpush.msrb.mxu2 %v3959_v26  ;;  %v3072_v49 = vpop.f32.mrf.mxu2 }
 0x3e5   : > { %v3354_v47 = vpop.f32.mrf.mxu3  ;;  %v3073_v59 = vadd.f32 %v3072_v49, %v3020_v30 }
 0x3e6   : > { %4191 = vmatpush.msrb.mxu3 %v6863_v53  ;;  %4145 = vmatpush.msrb.mxu2 %v3965_v35  ;;  %v3178_v53 = vpop.f32.mrf.mxu0 }
 0x3e7   : > { %v3111_v36 = vadd.f32 %v3110_v8, %v3073_v59 }
 0x3e8   : > { %4193 = vmatpush.msrb.mxu3 %v6866_v20  ;;  %4149 = vmatpush.msrb.mxu2 %v3971_v41  ;;  %v3214_v20 = vpop.f32.mrf.mxu1 }
 0x3ea   : > { %4195 = vmatpush.msrb.mxu3 %v6873_v38  ;;  %4153 = vmatpush.msrb.mxu2 %v3977_v52 }
 0x3ec   : > { %4197 = vmatpush.msrb.mxu3 %v6882_v23  ;;  %4157 = vmatpush.msrb.mxu2 %v3983_v6  ;;  %v3254_v38 = vpop.f32.mrf.mxu2 }
 0x3ee   : > { %4199 = vmatpush.msrb.mxu3 %v6895_v55  ;;  %4161 = vmatpush.msrb.mxu2 %v3989_v44 }
 0x3f0   : > { %4201 = vmatpush.msrb.mxu3 %v6906_v29  ;;  %4165 = vmatpush.msrb.mxu2 %v3995_v5  ;;  %v3355_v29 = vadd.f32 %v3354_v47, %v3254_v38 }
 0x3f2   : > { %4203 = vmatpush.msrb.mxu3 %v6923_v13  ;;  %4169 = vmatpush.msrb.mxu2 %v4001_v11 }
 0x3f4   : > { %4205 = vmatpush.msrb.mxu3 %v6937_v28  ;;  %4173 = vmatpush.msrb.mxu2 %v4007_v37  ;;  %v3407_v32 = vpop.f32.mrf.mxu0 }
 0x3f5   : > { %v3408_v2 = vadd.f32 %v3407_v32, %v3355_v29 }
 0x3f6   : > { %4207 = vmatpush.msrb.mxu3 %v6950_v15  ;;  %4177 = vmatpush.msrb.mxu2 %v4013_v54  ;;  %v3445_v34 = vpop.f32.mrf.mxu1 }
 0x3f7   : > { %v3446_v26 = vadd.f32 %v3445_v34, %v3408_v2 }
 0x3f8   : > { %4209 = vmatpush.msrb.mxu3 %v6964_v48  ;;  %4181 = vmatpush.msrb.mxu2 %v4019_v43  ;;  %v3179_v48 = vadd.f32 %v3178_v53, %v3111_v36 }
 0x3f9   : > { %4318 = vmatmul.msk.f32.vlgmr.msrb.gmra.mxu2 %vm6207_vm11, %v7915_v17 }
 0x3fa   : > { %4211 = vmatpush.msrb.mxu3 %v6978_v14  ;;  %v3215_v52 = vadd.f32 %v3214_v20, %v3179_v48 }
 0x3fc   : > { %4213 = vmatpush.msrb.mxu3 %v6992_v10  ;;  %v3513_v57 = vpop.f32.mrf.mxu2  ;;  %v3589_v60 = vpop.f32.mrf.mxu0 }
 0x3fd   : > { %v3514_v62 = vadd.f32 %v3513_v57, %v3446_v26 }
 0x3fe   : > { %4215 = vmatpush.msrb.mxu3 %v7004_v31  ;;  %v3549_v23 = vpop.f32.mrf.mxu3  ;;  %v3689_v55 = vpop.f32.mrf.mxu1 }
 0x3ff   : > { %v3550_v10 = vadd.f32 %v3549_v23, %v3514_v62 }
 0x400   : > { %4217 = vmatpush.msrb.mxu3 %v7016_v24 }
 0x401   : > { %4319 = vmatmul.msk.f32.vlgmr.msrb.gmra.mxu3 %vm6207_vm11, %v7915_v17  ;;  %v3690_v17 = vadd.f32 %v3689_v55, %v3589_v60  ;;  %v4222_v19 = vmax.f32 %v3215_v52, %v3550_v10 }
 0x404   : > { %v3742_v7 = vpop.f32.mrf.mxu2 }
 0x405   : > { %v3743_v63 = vadd.f32 %v3742_v7, %v3690_v17 }
 0x406   : > { %v3780_v58 = vpop.f32.mrf.mxu3 }
 0x407   : > { %v3781_v35 = vadd.f32 %v3780_v58, %v3743_v63 }
 0x414   : > { %v3848_v25 = vpop.f32.mrf.mxu0 }
 0x415   : > { %v3849_v4 = vadd.f32 %v3848_v25, %v3781_v35 }
 0x41c   : > { %v3884_v13 = vpop.f32.mrf.mxu1 }
 0x41d   : > { %v3885_v31 = vadd.f32 %v3884_v13, %v3849_v4 }
 0x41f   : > { %v4223_v5 = vmax.f32 %v4222_v19, %v3885_v31 }
 0x45a   : > { %v4077_v45 = vpop.f32.mrf.mxu0  ;;  %v4115_v14 = vpop.f32.mrf.mxu1 }
 0x45e   : > { %v3924_v28 = vpop.f32.mrf.mxu2 }
 0x464   : > { %v4024_v46 = vpop.f32.mrf.mxu3 }
 0x465   : > { %v4025_v15 = vadd.f32 %v4024_v46, %v3924_v28 }
 0x467   : > { %v4078_v41 = vadd.f32 %v4077_v45, %v4025_v15 }
 0x469   : > { %v4116_v9 = vadd.f32 %v4115_v14, %v4078_v41 }
 0x47c   : > { %v4183_v6 = vpop.f32.mrf.mxu2 }
 0x47d   : > { %v4184_v44 = vadd.f32 %v4183_v6, %v4116_v9 }
 0x484   : > { %v4219_v24 = vpop.f32.mrf.mxu3 }
 0x485   : > { %v4220_v50 = vadd.f32 %v4219_v24, %v4184_v44 }
 0x487   : > { %v4224_v40 = vmax.f32 %v4223_v5, %v4220_v50 }
 0x489   : > { %4225 = vst [vmem:[%s136_s26] sm:$0xff] %v4224_v40 }
 0x48a   : > { %4397 = shalt.err (!%p4394_p3)
}
 0x48b   : > { %4325 = dma.vmem_to_hbm [thread:$0]  (%p4489_p5), %s4240_s27, 128, %s4242_s28, %s4227_s13  }
 0x48c PF: > { %p4331_p4 = scmp.ge.s32.totalorder %s4432_s12, 2  ;;  %s4253_s14 = sand.u32 1, %s4420_s9  }
 0x48d   : > { %s4254_s16 = scalar_lea.sflag [#allocation3], %s4253_s14 }
 0x48e   : > { %p4328_p7 = pnand %p4331_p4, %p4493_p6 }
 0x490   : > { %p4329_p8 = pneg %p4328_p7 }
 0x492   : > { %4415 = dma.done.wait (%p4329_p8), %s4254_s16, 128  }
 0x493   : > { %4417 = vsyncadd (%p4329_p8), %s4254_s16, 4294967168  ;;  %p12_p9 = scmp.ge.s32.totalorder %s4476_s15, 4   ;;  %s7962_s9 = smov %s4424_s10 }
 0x494   : > { %s7963_s10 = smov %s4428_s11  ;;  %s7964_s11 = smov %s4487_s18 }
 0x495   : > { %s7965_s12 = smov %s4476_s15  ;;  %14 = sbr.rel (!%p12_p9) target bundleno = 3 (0x3), region = 63 }
 0x49a   :  { %4260 = vsyncpa [#allocation3], 1 }
 0x49b   :  { %4262 = vsyncpa [#allocation3 + $0x1], 1 }

</bundles_post_ra>
